<compile_context>
chip_gen: v6e
topology: v6e:2x2x1
jax: 0.10.0
libtpu: 0.0.40
codegen_flags: <defaults>
</compile_context>

<pallas_src>
from functools import partial

import jax
import jax.numpy as jnp
import numpy as np
from jax.experimental import pallas as pl
from jax.experimental.pallas import tpu as pltpu

_PAD_N = 128  # lane-dense width for the final (256 -> 1) layer's weights


def _discriminator_kernel(x_ref, w1_ref, b1_ref, w2_ref, b2_ref,
                          w3_ref, b3_ref, out_ref):
    # In-kernel bf16 downcast of the streamed f32 activations (VPU filler
    # under the MXU; avoids a separate wrapper cast pass over HBM).
    x = x_ref[...].astype(jnp.bfloat16)

    # Layer 1: Linear(D -> 512) + LeakyReLU(0.2).  bf16 matmul, f32 acc.
    h1 = jnp.dot(x, w1_ref[...], preferred_element_type=jnp.float32)
    h1 = h1 + b1_ref[...]
    h1 = jnp.maximum(h1, 0.2 * h1)

    # Layer 2: Linear(512 -> 256) + LeakyReLU(0.2).
    h2 = jnp.dot(h1.astype(jnp.bfloat16), w2_ref[...],
                 preferred_element_type=jnp.float32)
    h2 = h2 + b2_ref[...]
    h2 = jnp.maximum(h2, 0.2 * h2)

    # Layer 3: Linear(256 -> 1) + Sigmoid. w3 is zero-padded to 128 output
    # lanes (one MXU pass either way); only column 0 is the real logit.
    logits = jnp.dot(h2.astype(jnp.bfloat16), w3_ref[...],
                     preferred_element_type=jnp.float32)
    logit = logits[:, 0:1] + b3_ref[...][0:1, 0:1]
    out_ref[...] = jax.nn.sigmoid(logit).astype(out_ref.dtype)


def _batch_tile(B, tb_max, num_cores):
    """Pick the batch tile TB.

    - Whole batch in one grid step when it fits (best on 1-TC v5e/v6e: every
      extra step is ~0.35 us of pure serial overhead).
    - num_cores=2 (v7x) caps TB so the grid has >= 2 steps and the "parallel"
      batch axis can be sharded across both TensorCores.
    - tb_max bounds per-step VMEM (the f32 x tile is double-buffered).
    """
    if num_cores > 1 and B > 8:
        per_core = ((B + num_cores - 1) // num_cores + 7) // 8 * 8
        tb_max = min(tb_max, per_core)
    if B <= tb_max:
        return B
    return max(8, (tb_max // 8) * 8)


def _weight_spec(shape, single_buffer):
    """Resident (constant index_map) block: whole tensor sits in VMEM, DMA'd
    once. single_buffer drops the dead second pipeline buffer (frees VMEM
    headroom; mostly matters on v7x)."""
    index_map = lambda i: (0,) * len(shape)
    if single_buffer:
        return pl.BlockSpec(shape, index_map, pipeline_mode=pl.Buffered(1))
    return pl.BlockSpec(shape, index_map)


@partial(jax.jit, static_argnames=("tb", "num_cores", "single_buffer"))
def _forward(img, prepared, tb, num_cores, single_buffer):
    w1, b1, w2, b2, w3, b3 = prepared
    B = img.shape[0]
    D = img.shape[1] * img.shape[2] * img.shape[3]
    # Flatten NCHW -> (B, D). Under jit this is a free, contiguous reshape;
    # dtype stays f32 — the bf16 downcast happens inside the kernel.
    x = img.reshape(B, D)

    TB = _batch_tile(B, tb, num_cores)
    grid = (pl.cdiv(B, TB),)
    # When B % TB != 0 the last tile's out-of-range rows are undefined; they
    # cannot contaminate valid rows (the matmuls contract over K, not M) and
    # their outputs are clipped by Pallas on writeback. Do not "optimize"
    # any masking around this away.

    return pl.pallas_call(
        _discriminator_kernel,
        out_shape=jax.ShapeDtypeStruct((B, 1), jnp.float32),
        grid=grid,
        in_specs=[
            pl.BlockSpec((TB, D), lambda i: (i, 0)),   # streamed f32 x tile
            _weight_spec(w1.shape, single_buffer),
            _weight_spec(b1.shape, single_buffer),
            _weight_spec(w2.shape, single_buffer),
            _weight_spec(b2.shape, single_buffer),
            _weight_spec(w3.shape, single_buffer),
            _weight_spec(b3.shape, single_buffer),
        ],
        out_specs=pl.BlockSpec((TB, 1), lambda i: (i, 0)),
        compiler_params=pltpu.CompilerParams(
            dimension_semantics=("parallel",),
            vmem_limit_bytes=48 * 1024 * 1024),
    )(x, w1, b1, w2, b2, w3, b3)


def discriminator_forward(img, prepared, tb=1024, num_cores=1):
    """img: (B, C, 32, 32) f32 NCHW; prepared = prepare_params(raw_params).
    Returns (B, 1) validity scores in (0, 1). Set num_cores=2 on v7x."""
    try:
        return _forward(img, prepared, tb=tb, num_cores=num_cores,
                        single_buffer=True)
    except Exception:
        # JAX without BlockSpec(pipeline_mode=...): identical kernel, default
        # (double-buffered) pipelining for the resident weights.
        return _forward(img, prepared, tb=tb, num_cores=num_cores,
                        single_buffer=False)


def init_params(key, in_channels=1):
    """Deterministic init matching PyTorch Linear shapes (stored transposed:
    (in_features, out_features) so the kernel computes x @ W)."""
    D = in_channels * 32 * 32
    dims = [(D, 512), (512, 256), (256, 1)]
    params = []
    for fan_in, fan_out in dims:
        kw, kb, key = jax.random.split(key, 3)
        bound = 1.0 / np.sqrt(fan_in)
        w = jax.random.uniform(kw, (fan_in, fan_out), jnp.float32, -bound, bound)
        b = jax.random.uniform(kb, (1, fan_out), jnp.float32, -bound, bound)
        params.extend([w, b])
    return tuple(params)


def prepare_params(params):
    """One-time (hoisted) kernel-side preprocessing: bf16 weights for the MXU,
    f32 biases for the VPU, final layer zero-padded to 128 output lanes."""
    w1, b1, w2, b2, w3, b3 = params
    w3p = jnp.pad(w3, ((0, 0), (0, _PAD_N - w3.shape[1])))
    b3p = jnp.pad(b3, ((0, 0), (0, _PAD_N - b3.shape[1])))
    return (w1.astype(jnp.bfloat16), b1.astype(jnp.float32),
            w2.astype(jnp.bfloat16), b2.astype(jnp.float32),
            w3p.astype(jnp.bfloat16), b3p.astype(jnp.float32))


def _leaky_relu(x, slope=0.2):
    return jnp.where(x > 0, x, slope * x)


def _reference_forward(img, params):
    """Pure-JAX f32 reference for correctness checking."""
    w1, b1, w2, b2, w3, b3 = params
    x = img.reshape(img.shape[0], -1).astype(jnp.float32)
    h1 = _leaky_relu(x @ w1 + b1)
    h2 = _leaky_relu(h1 @ w2 + b2)
    return jax.nn.sigmoid(h2 @ w3 + b3)


if __name__ == "__main__":
    key = jax.random.PRNGKey(0)
    k_img, k_params = jax.random.split(key)

    in_channels = 1
    batch = 2
    img = jax.random.normal(k_img, (batch, in_channels, 32, 32), jnp.float32)
    params = init_params(k_params, in_channels=in_channels)
    prepared = prepare_params(params)   # hoisted weight preprocessing

    validity = discriminator_forward(img, prepared)
    validity = jax.block_until_ready(validity)

    # sanity: shape (B, 1), values in (0, 1), matches f32 reference.
    # bf16 weights/activations with f32 accumulation give ~1e-2-level error
    # vs the f32 reference — fine for a GAN discriminator score.
    assert validity.shape == (batch, 1)
    assert bool(jnp.all((validity > 0.0) & (validity < 1.0)))
    ref = _reference_forward(img, params)
    assert bool(jnp.allclose(validity, ref, atol=3e-2)), (validity, ref)

    print("KERNEL_OK")
</pallas_src>

<mosaic_0001>
module attributes {stable_mosaic.version = 11 : i64} {
  func.func @_discriminator_kernel(%arg0: i32, %arg1: memref<2x1024xf32, #tpu.memory_space<vmem>>, %arg2: memref<1024x512xbf16, #tpu.memory_space<vmem>>, %arg3: memref<1x512xf32, #tpu.memory_space<vmem>>, %arg4: memref<512x256xbf16, #tpu.memory_space<vmem>>, %arg5: memref<1x256xf32, #tpu.memory_space<vmem>>, %arg6: memref<256x128xbf16, #tpu.memory_space<vmem>>, %arg7: memref<1x128xf32, #tpu.memory_space<vmem>>, %arg8: memref<2x1xf32, #tpu.memory_space<vmem>>) attributes {dimension_semantics = [#tpu.dimension_semantics<parallel>], iteration_bounds = array<i64: 1>, scalar_prefetch = 0 : i64, scratch_operands = 0 : i64, tpu.core_type = #tpu.core_type<tc>, window_params = [{transform_indices = @transform_0, window_bounds = array<i64: 2, 1024>}, {pipeline_mode = #tpu.pipeline_mode<synchronous>, transform_indices = @transform_1, window_bounds = array<i64: 1024, 512>}, {pipeline_mode = #tpu.pipeline_mode<synchronous>, transform_indices = @transform_2, window_bounds = array<i64: 1, 512>}, {pipeline_mode = #tpu.pipeline_mode<synchronous>, transform_indices = @transform_3, window_bounds = array<i64: 512, 256>}, {pipeline_mode = #tpu.pipeline_mode<synchronous>, transform_indices = @transform_4, window_bounds = array<i64: 1, 256>}, {pipeline_mode = #tpu.pipeline_mode<synchronous>, transform_indices = @transform_5, window_bounds = array<i64: 256, 128>}, {pipeline_mode = #tpu.pipeline_mode<synchronous>, transform_indices = @transform_6, window_bounds = array<i64: 1, 128>}, {transform_indices = @transform_7, window_bounds = array<i64: 2, 1>}]} {
    %c0 = arith.constant 0 : index
    %c0_0 = arith.constant 0 : index
    %0 = vector.load %arg1[%c0, %c0_0] : memref<2x1024xf32, #tpu.memory_space<vmem>>, vector<2x1024xf32>
    %1 = arith.truncf %0 : vector<2x1024xf32> to vector<2x1024xbf16>
    %c0_1 = arith.constant 0 : index
    %c0_2 = arith.constant 0 : index
    %2 = vector.load %arg2[%c0_1, %c0_2] : memref<1024x512xbf16, #tpu.memory_space<vmem>>, vector<1024x512xbf16>
    %cst = arith.constant dense<0.000000e+00> : vector<2x512xf32>
    %3 = tpu.matmul %1, %2, %cst {dimension_numbers = #tpu.dot_dimension_numbers<[1], [0], [0], [1], [0, 0, 1, 1], [], []>} : vector<2x1024xbf16>, vector<1024x512xbf16>, vector<2x512xf32> -> vector<2x512xf32>
    %c0_3 = arith.constant 0 : index
    %c0_4 = arith.constant 0 : index
    %4 = vector.load %arg3[%c0_3, %c0_4] : memref<1x512xf32, #tpu.memory_space<vmem>>, vector<1x512xf32>
    %5 = vector.broadcast %4 : vector<1x512xf32> to vector<2x512xf32>
    %6 = arith.addf %3, %5 : vector<2x512xf32>
    %cst_5 = arith.constant 2.000000e-01 : f32
    %7 = vector.broadcast %cst_5 : f32 to vector<2x512xf32>
    %8 = arith.mulf %7, %6 : vector<2x512xf32>
    %9 = arith.maximumf %6, %8 : vector<2x512xf32>
    %10 = arith.truncf %9 : vector<2x512xf32> to vector<2x512xbf16>
    %c0_6 = arith.constant 0 : index
    %c0_7 = arith.constant 0 : index
    %11 = vector.load %arg4[%c0_6, %c0_7] : memref<512x256xbf16, #tpu.memory_space<vmem>>, vector<512x256xbf16>
    %cst_8 = arith.constant dense<0.000000e+00> : vector<2x256xf32>
    %12 = tpu.matmul %10, %11, %cst_8 {dimension_numbers = #tpu.dot_dimension_numbers<[1], [0], [0], [1], [0, 0, 1, 1], [], []>} : vector<2x512xbf16>, vector<512x256xbf16>, vector<2x256xf32> -> vector<2x256xf32>
    %c0_9 = arith.constant 0 : index
    %c0_10 = arith.constant 0 : index
    %13 = vector.load %arg5[%c0_9, %c0_10] : memref<1x256xf32, #tpu.memory_space<vmem>>, vector<1x256xf32>
    %14 = vector.broadcast %13 : vector<1x256xf32> to vector<2x256xf32>
    %15 = arith.addf %12, %14 : vector<2x256xf32>
    %cst_11 = arith.constant 2.000000e-01 : f32
    %16 = vector.broadcast %cst_11 : f32 to vector<2x256xf32>
    %17 = arith.mulf %16, %15 : vector<2x256xf32>
    %18 = arith.maximumf %15, %17 : vector<2x256xf32>
    %19 = arith.truncf %18 : vector<2x256xf32> to vector<2x256xbf16>
    %c0_12 = arith.constant 0 : index
    %c0_13 = arith.constant 0 : index
    %20 = vector.load %arg6[%c0_12, %c0_13] : memref<256x128xbf16, #tpu.memory_space<vmem>>, vector<256x128xbf16>
    %cst_14 = arith.constant dense<0.000000e+00> : vector<2x128xf32>
    %21 = tpu.matmul %19, %20, %cst_14 {dimension_numbers = #tpu.dot_dimension_numbers<[1], [0], [0], [1], [0, 0, 1, 1], [], []>} : vector<2x256xbf16>, vector<256x128xbf16>, vector<2x128xf32> -> vector<2x128xf32>
    %22 = vector.extract_strided_slice %21 {offsets = [0, 0], sizes = [2, 1], strides = [1, 1]} : vector<2x128xf32> to vector<2x1xf32>
    %c0_15 = arith.constant 0 : index
    %c0_16 = arith.constant 0 : index
    %23 = vector.load %arg7[%c0_15, %c0_16] : memref<1x128xf32, #tpu.memory_space<vmem>>, vector<1x128xf32>
    %24 = vector.extract_strided_slice %23 {offsets = [0, 0], sizes = [1, 1], strides = [1, 1]} : vector<1x128xf32> to vector<1x1xf32>
    %25 = vector.broadcast %24 : vector<1x1xf32> to vector<2x1xf32>
    %26 = arith.addf %22, %25 : vector<2x1xf32>
    %27 = arith.negf %26 : vector<2x1xf32>
    %28 = math.exp %27 : vector<2x1xf32>
    %cst_17 = arith.constant 1.000000e+00 : f32
    %29 = vector.broadcast %cst_17 : f32 to vector<2x1xf32>
    %30 = arith.addf %29, %28 : vector<2x1xf32>
    %31 = arith.divf %29, %30 : vector<2x1xf32>
    %c0_18 = arith.constant 0 : index
    %c0_19 = arith.constant 0 : index
    %32 = vector.load %arg8[%c0_18, %c0_19] : memref<2x1xf32, #tpu.memory_space<vmem>>, vector<2x1xf32>
    tpu.vector_store %arg8[%c0_18, %c0_19], %31 {strides = array<i32>} : memref<2x1xf32, #tpu.memory_space<vmem>>, vector<2x1xf32>,
    return
  }
  func.func @transform_0(%arg0: i32) -> (i32, i32) {
    %c0_i32 = arith.constant 0 : i32
    %c0_i32_0 = arith.constant 0 : i32
    return %arg0, %c0_i32 : i32, i32
  }
  func.func @transform_1(%arg0: i32) -> (i32, i32) {
    %c0_i32 = arith.constant 0 : i32
    %c0_i32_0 = arith.constant 0 : i32
    %c0_i32_1 = arith.constant 0 : i32
    return %c0_i32, %c0_i32_0 : i32, i32
  }
  func.func @transform_2(%arg0: i32) -> (i32, i32) {
    %c0_i32 = arith.constant 0 : i32
    %c0_i32_0 = arith.constant 0 : i32
    %c0_i32_1 = arith.constant 0 : i32
    return %c0_i32, %c0_i32_0 : i32, i32
  }
  func.func @transform_3(%arg0: i32) -> (i32, i32) {
    %c0_i32 = arith.constant 0 : i32
    %c0_i32_0 = arith.constant 0 : i32
    %c0_i32_1 = arith.constant 0 : i32
    return %c0_i32, %c0_i32_0 : i32, i32
  }
  func.func @transform_4(%arg0: i32) -> (i32, i32) {
    %c0_i32 = arith.constant 0 : i32
    %c0_i32_0 = arith.constant 0 : i32
    %c0_i32_1 = arith.constant 0 : i32
    return %c0_i32, %c0_i32_0 : i32, i32
  }
  func.func @transform_5(%arg0: i32) -> (i32, i32) {
    %c0_i32 = arith.constant 0 : i32
    %c0_i32_0 = arith.constant 0 : i32
    %c0_i32_1 = arith.constant 0 : i32
    return %c0_i32, %c0_i32_0 : i32, i32
  }
  func.func @transform_6(%arg0: i32) -> (i32, i32) {
    %c0_i32 = arith.constant 0 : i32
    %c0_i32_0 = arith.constant 0 : i32
    %c0_i32_1 = arith.constant 0 : i32
    return %c0_i32, %c0_i32_0 : i32, i32
  }
  func.func @transform_7(%arg0: i32) -> (i32, i32) {
    %c0_i32 = arith.constant 0 : i32
    %c0_i32_0 = arith.constant 0 : i32
    return %arg0, %c0_i32 : i32, i32
  }
}

module attributes {stable_mosaic.version = 11 : i64} {
  func.func @_discriminator_kernel(%arg0: i32, %arg1: memref<2x1024xf32, #tpu.memory_space<vmem>>, %arg2: memref<1024x512xbf16, #tpu.memory_space<vmem>>, %arg3: memref<1x512xf32, #tpu.memory_space<vmem>>, %arg4: memref<512x256xbf16, #tpu.memory_space<vmem>>, %arg5: memref<1x256xf32, #tpu.memory_space<vmem>>, %arg6: memref<256x128xbf16, #tpu.memory_space<vmem>>, %arg7: memref<1x128xf32, #tpu.memory_space<vmem>>, %arg8: memref<2x1xf32, #tpu.memory_space<vmem>>) attributes {dimension_semantics = [#tpu.dimension_semantics<parallel>], iteration_bounds = array<i64: 1>, scalar_prefetch = 0 : i64, scratch_operands = 0 : i64, tpu.core_type = #tpu.core_type<tc>, window_params = [{transform_indices = @transform_0, window_bounds = array<i64: 2, 1024>}, {pipeline_mode = #tpu.pipeline_mode<synchronous>, transform_indices = @transform_1, window_bounds = array<i64: 1024, 512>}, {pipeline_mode = #tpu.pipeline_mode<synchronous>, transform_indices = @transform_2, window_bounds = array<i64: 1, 512>}, {pipeline_mode = #tpu.pipeline_mode<synchronous>, transform_indices = @transform_3, window_bounds = array<i64: 512, 256>}, {pipeline_mode = #tpu.pipeline_mode<synchronous>, transform_indices = @transform_4, window_bounds = array<i64: 1, 256>}, {pipeline_mode = #tpu.pipeline_mode<synchronous>, transform_indices = @transform_5, window_bounds = array<i64: 256, 128>}, {pipeline_mode = #tpu.pipeline_mode<synchronous>, transform_indices = @transform_6, window_bounds = array<i64: 1, 128>}, {transform_indices = @transform_7, window_bounds = array<i64: 2, 1>}]} {
    %c0 = arith.constant 0 : index
    %c0_0 = arith.constant 0 : index
    %0 = vector.load %arg1[%c0, %c0_0] : memref<2x1024xf32, #tpu.memory_space<vmem>>, vector<2x1024xf32>
    %1 = arith.truncf %0 : vector<2x1024xf32> to vector<2x1024xbf16>
    %c0_1 = arith.constant 0 : index
    %c0_2 = arith.constant 0 : index
    %2 = vector.load %arg2[%c0_1, %c0_2] : memref<1024x512xbf16, #tpu.memory_space<vmem>>, vector<1024x512xbf16>
    %cst = arith.constant dense<0.000000e+00> : vector<2x512xf32>
    %3 = tpu.matmul %1, %2, %cst {dimension_numbers = #tpu.dot_dimension_numbers<[1], [0], [0], [1], [0, 0, 1, 1], [], []>} : vector<2x1024xbf16>, vector<1024x512xbf16>, vector<2x512xf32> -> vector<2x512xf32>
    %c0_3 = arith.constant 0 : index
    %c0_4 = arith.constant 0 : index
    %4 = vector.load %arg3[%c0_3, %c0_4] : memref<1x512xf32, #tpu.memory_space<vmem>>, vector<1x512xf32>
    %5 = vector.broadcast %4 : vector<1x512xf32> to vector<2x512xf32>
    %6 = arith.addf %3, %5 : vector<2x512xf32>
    %cst_5 = arith.constant 2.000000e-01 : f32
    %7 = vector.broadcast %cst_5 : f32 to vector<2x512xf32>
    %8 = arith.mulf %7, %6 : vector<2x512xf32>
    %9 = arith.maximumf %6, %8 : vector<2x512xf32>
    %10 = arith.truncf %9 : vector<2x512xf32> to vector<2x512xbf16>
    %c0_6 = arith.constant 0 : index
    %c0_7 = arith.constant 0 : index
    %11 = vector.load %arg4[%c0_6, %c0_7] : memref<512x256xbf16, #tpu.memory_space<vmem>>, vector<512x256xbf16>
    %cst_8 = arith.constant dense<0.000000e+00> : vector<2x256xf32>
    %12 = tpu.matmul %10, %11, %cst_8 {dimension_numbers = #tpu.dot_dimension_numbers<[1], [0], [0], [1], [0, 0, 1, 1], [], []>} : vector<2x512xbf16>, vector<512x256xbf16>, vector<2x256xf32> -> vector<2x256xf32>
    %c0_9 = arith.constant 0 : index
    %c0_10 = arith.constant 0 : index
    %13 = vector.load %arg5[%c0_9, %c0_10] : memref<1x256xf32, #tpu.memory_space<vmem>>, vector<1x256xf32>
    %14 = vector.broadcast %13 : vector<1x256xf32> to vector<2x256xf32>
    %15 = arith.addf %12, %14 : vector<2x256xf32>
    %cst_11 = arith.constant 2.000000e-01 : f32
    %16 = vector.broadcast %cst_11 : f32 to vector<2x256xf32>
    %17 = arith.mulf %16, %15 : vector<2x256xf32>
    %18 = arith.maximumf %15, %17 : vector<2x256xf32>
    %19 = arith.truncf %18 : vector<2x256xf32> to vector<2x256xbf16>
    %c0_12 = arith.constant 0 : index
    %c0_13 = arith.constant 0 : index
    %20 = vector.load %arg6[%c0_12, %c0_13] : memref<256x128xbf16, #tpu.memory_space<vmem>>, vector<256x128xbf16>
    %cst_14 = arith.constant dense<0.000000e+00> : vector<2x128xf32>
    %21 = tpu.matmul %19, %20, %cst_14 {dimension_numbers = #tpu.dot_dimension_numbers<[1], [0], [0], [1], [0, 0, 1, 1], [], []>} : vector<2x256xbf16>, vector<256x128xbf16>, vector<2x128xf32> -> vector<2x128xf32>
    %22 = vector.extract_strided_slice %21 {offsets = [0, 0], sizes = [2, 1], strides = [1, 1]} : vector<2x128xf32> to vector<2x1xf32>
    %c0_15 = arith.constant 0 : index
    %c0_16 = arith.constant 0 : index
    %23 = vector.load %arg7[%c0_15, %c0_16] : memref<1x128xf32, #tpu.memory_space<vmem>>, vector<1x128xf32>
    %24 = vector.extract_strided_slice %23 {offsets = [0, 0], sizes = [1, 1], strides = [1, 1]} : vector<1x128xf32> to vector<1x1xf32>
    %25 = vector.broadcast %24 : vector<1x1xf32> to vector<2x1xf32>
    %26 = arith.addf %22, %25 : vector<2x1xf32>
    %27 = arith.negf %26 : vector<2x1xf32>
    %28 = math.exp %27 : vector<2x1xf32>
    %cst_17 = arith.constant 1.000000e+00 : f32
    %29 = vector.broadcast %cst_17 : f32 to vector<2x1xf32>
    %30 = arith.addf %29, %28 : vector<2x1xf32>
    %31 = arith.divf %29, %30 : vector<2x1xf32>
    %c0_18 = arith.constant 0 : index
    %c0_19 = arith.constant 0 : index
    %32 = vector.load %arg8[%c0_18, %c0_19] : memref<2x1xf32, #tpu.memory_space<vmem>>, vector<2x1xf32>
    tpu.vector_store %arg8[%c0_18, %c0_19], %31 {strides = array<i32>} : memref<2x1xf32, #tpu.memory_space<vmem>>, vector<2x1xf32>,
    return
  }
  func.func @transform_0(%arg0: i32) -> (i32, i32) {
    %c0_i32 = arith.constant 0 : i32
    %c0_i32_0 = arith.constant 0 : i32
    return %arg0, %c0_i32 : i32, i32
  }
  func.func @transform_1(%arg0: i32) -> (i32, i32) {
    %c0_i32 = arith.constant 0 : i32
    %c0_i32_0 = arith.constant 0 : i32
    %c0_i32_1 = arith.constant 0 : i32
    return %c0_i32, %c0_i32_0 : i32, i32
  }
  func.func @transform_2(%arg0: i32) -> (i32, i32) {
    %c0_i32 = arith.constant 0 : i32
    %c0_i32_0 = arith.constant 0 : i32
    %c0_i32_1 = arith.constant 0 : i32
    return %c0_i32, %c0_i32_0 : i32, i32
  }
  func.func @transform_3(%arg0: i32) -> (i32, i32) {
    %c0_i32 = arith.constant 0 : i32
    %c0_i32_0 = arith.constant 0 : i32
    %c0_i32_1 = arith.constant 0 : i32
    return %c0_i32, %c0_i32_0 : i32, i32
  }
  func.func @transform_4(%arg0: i32) -> (i32, i32) {
    %c0_i32 = arith.constant 0 : i32
    %c0_i32_0 = arith.constant 0 : i32
    %c0_i32_1 = arith.constant 0 : i32
    return %c0_i32, %c0_i32_0 : i32, i32
  }
  func.func @transform_5(%arg0: i32) -> (i32, i32) {
    %c0_i32 = arith.constant 0 : i32
    %c0_i32_0 = arith.constant 0 : i32
    %c0_i32_1 = arith.constant 0 : i32
    return %c0_i32, %c0_i32_0 : i32, i32
  }
  func.func @transform_6(%arg0: i32) -> (i32, i32) {
    %c0_i32 = arith.constant 0 : i32
    %c0_i32_0 = arith.constant 0 : i32
    %c0_i32_1 = arith.constant 0 : i32
    return %c0_i32, %c0_i32_0 : i32, i32
  }
  func.func @transform_7(%arg0: i32) -> (i32, i32) {
    %c0_i32 = arith.constant 0 : i32
    %c0_i32_0 = arith.constant 0 : i32
    return %arg0, %c0_i32 : i32, i32
  }
}

</mosaic_0001>

<bundles_post_ra>
// kernel: _forward.1
= control target key start
LH: loop header
LB: loop body
LE: loop exit
PB: predicated region body
PF: predicated region fallthrough
CT: control target
= control target key end

     0   :  { %12 = vsyncpa [#allocation3], 0  ;;  %s3790_s0 = inlined_call_operand.vmem [shape: f32[2,1024], index: 0, kind: input, shape index: {}]   ;;  %s3791_s1 = inlined_call_operand.hbm [shape: bf16[1024,512], index: 1, kind: input, shape index: {}]   ;;  %s3792_s2 = inlined_call_operand.vmem [shape: f32[1,512], index: 2, kind: input, shape index: {}]   ;;  %s3793_s3 = inlined_call_operand.hbm [shape: bf16[512,256], index: 3, kind: input, shape index: {}]   ;;  %s3794_s4 = inlined_call_operand.vmem [shape: f32[1,256], index: 4, kind: input, shape index: {}]   ;;  %s3795_s5 = inlined_call_operand.hbm [shape: bf16[256,128], index: 5, kind: input, shape index: {}]   ;;  %s3796_s6 = inlined_call_operand.vmem [shape: f32[1,128], index: 6, kind: input, shape index: {}]   ;;  %s3797_s7 = inlined_call_operand.vmem [shape: f32[2,1], index: 7, kind: output, shape index: {}]  }
   0x1   :  { %13 = vsyncpa [#allocation5], 0  ;;  %s3630_s24 = smov [#allocation4]  }
   0x2   :  { %s35_s25 = sshll.u32 %s3630_s24, 4  ;;  %s36_s25 = int_to_ptr.vmem [resolvable:$true] %s35_s25 }
   0x3   :  { %s3574_s26 = scalar_lea.vmem %s36_s25, 8192  ;;  %p3579_p1 = scmp.lt.s32.totalorder %s36_s25, %s36_s25 }
   0x4   :  { %p3575_p0 = scmp.ne.s32.totalorder %s36_s25, %s3574_s26  ;;  %p3580_p2 = scmp.lt.s32.totalorder %s3574_s26, %s3574_s26 }
   0x6   :  { %p3581_p3 = por %p3580_p2, %p3579_p1 }
   0x8   :  { %p3582_p4 = pnand %p3581_p3, %p3575_p0 }
   0xa   :  { %3585 = shalt.err (!%p3582_p4)
}
   0xb   :  { %s3631_s27 = smov 128   ;;  %s3632_s28 = smov 8  }
   0xc   :  { %41 = dma.hbm_to_vmem [thread:$0]  %s3793_s3, 8192, %s36_s25, [#allocation5], %s3631_s27, %s3631_s27, %s3632_s28  }
   0xd   :  { %s3633_s8 = smov [#allocation2]  }
   0xe   :  { %s21_s9 = sshll.u32 %s3633_s8, 4  ;;  %s22_s9 = int_to_ptr.vmem [resolvable:$true] %s21_s9 }
   0xf   :  { %s3594_s10 = scalar_lea.vmem %s22_s9, 32768  ;;  %p3599_p6 = scmp.lt.s32.totalorder %s22_s9, %s22_s9 }
  0x10   :  { %p3595_p5 = scmp.ne.s32.totalorder %s22_s9, %s3594_s10  ;;  %p3600_p7 = scmp.lt.s32.totalorder %s3594_s10, %s3594_s10 }
  0x12   :  { %p3601_p8 = por %p3600_p7, %p3599_p6 }
  0x14   :  { %p3602_p9 = pnand %p3601_p8, %p3595_p5 }
  0x16   :  { %3605 = shalt.err (!%p3602_p9)
}
  0x17   :  { %s3634_s11 = smov 256   ;;  %s3635_s12 = smov 16  }
  0x18   :  { %27 = dma.hbm_to_vmem [thread:$0]  %s3791_s1, 32768, %s22_s9, [#allocation3], %s3634_s11, %s3634_s11, %s3635_s12  }
  0x19   :  { %s3636_s15 = smov [#allocation6]  }
  0x1a   :  { %s49_s16 = sshll.u32 %s3636_s15, 4  ;;  %s50_s16 = int_to_ptr.vmem [resolvable:$true] %s49_s16 }
  0x1b   :  { %s3614_s3 = scalar_lea.vmem %s50_s16, 2048  ;;  %p3619_p11 = scmp.lt.s32.totalorder %s50_s16, %s50_s16 }
  0x1c   :  { %p3615_p10 = scmp.ne.s32.totalorder %s50_s16, %s3614_s3  ;;  %p3620_p12 = scmp.lt.s32.totalorder %s3614_s3, %s3614_s3 }
  0x1e   :  { %p3621_p13 = por %p3620_p12, %p3619_p11 }
  0x20   :  { %p3622_p0 = pnand %p3621_p13, %p3615_p10 }
  0x22   :  { %3625 = shalt.err (!%p3622_p0)
}
  0x23   :  { %s3637_s17 = smov 64   ;;  %s3638_s18 = smov 4  }
  0x24   :  { %55 = dma.hbm_to_vmem [thread:$0]  %s3795_s5, 2048, %s50_s16, [#allocation5], %s3637_s17, %s3637_s17, %s3638_s18  }
  0x25   :  { %3626 = dma.done.wait [#allocation3], 32768  }
  0x26   :  { %3627 = vsyncadd [#allocation3], 4294934528 }
  0x27   :  { %3628 = dma.done.wait [#allocation5], 10240  }
  0x28   :  { %3629 = vsyncadd [#allocation5], 4294957056  ;;  %v3064_v0 = vld [vmem:[#allocation2 + $0xe4] ss:$16 sps:$4 sm:$0xff]   ;;  %v3068_v2 = vld [vmem:[#allocation2 + $0xe0] ss:$16 sps:$4 sm:$0xff]   ;;  %v76_v38 = vlaneseq }
  0x29   :  { %v3066_v1 = vld [vmem:[#allocation2 + $0x2e4] ss:$16 sps:$4 sm:$0xff]   ;;  %1680 = vmatprep.subr.bf16.mxu0 %v3064_v0  ;;  %v3069_v3 = vld [vmem:[#allocation2 + $0x2e0] ss:$16 sps:$4 sm:$0xff]   ;;  %v3639_v36 = vmov 1983009808  }
  0x2a   :  { %1721 = vmatprep.subr.bf16.mxu1 %v3066_v1  ;;  %v3070_v4 = vld [vmem:[#allocation2 + $0xc4] ss:$16 sps:$4 sm:$0xff]   ;;  %1681 = vmatpush1.bf16.msra.mxu0 %v3068_v2  ;;  %v3074_v6 = vld [vmem:[#allocation2 + $0xc0] ss:$16 sps:$4 sm:$0xff]   ;;  %v74_v37 = vunpack.c.l.s4 %v3639_v36  ;;  %v3689_v43 = vshrl.u32 %v76_v38, 7  ;;  %vm2686_vm0 = vcmask 1024  }
  0x2b   :  { %1722 = vmatpush1.bf16.msra.mxu1 %v3069_v3  ;;  %v3072_v5 = vld [vmem:[#allocation2 + $0x2c4] ss:$16 sps:$4 sm:$0xff]   ;;  %1682 = vmatprep.subr.bf16.mxu0 %v3070_v4  ;;  %v3075_v7 = vld [vmem:[#allocation2 + $0x2c0] ss:$16 sps:$4 sm:$0xff]  }
  0x2c   :  { %1723 = vmatprep.subr.bf16.mxu1 %v3072_v5  ;;  %v3076_v8 = vld [vmem:[#allocation2 + $0xa4] ss:$16 sps:$4 sm:$0xff]   ;;  %v3080_v10 = vld [vmem:[#allocation2 + $0xa0] ss:$16 sps:$4 sm:$0xff]   ;;  %v75_v42 = vunpack.c.0.s8 %v74_v37 }
  0x2d   :  { %v3078_v9 = vld [vmem:[#allocation2 + $0x2a4] ss:$16 sps:$4 sm:$0xff]   ;;  %v3081_v11 = vld [vmem:[#allocation2 + $0x2a0] ss:$16 sps:$4 sm:$0xff]  }
  0x2e   :  { %1683 = vmatpush1.bf16.msra.mxu0 %v3074_v6  ;;  %v3082_v12 = vld [vmem:[#allocation2 + $0x84] ss:$16 sps:$4 sm:$0xff]   ;;  %v3086_v14 = vld [vmem:[#allocation2 + $0x80] ss:$16 sps:$4 sm:$0xff]   ;;  %v3692_v49 = vsub.s32 %v75_v42, %v3689_v43  ;;  %v69_v42 = vld [vmem:[%s3790_s0 + $0x8] sm:$0xff] }
  0x2f   :  { %1724 = vmatpush1.bf16.msra.mxu1 %v3075_v7  ;;  %1684 = vmatprep.subr.bf16.mxu0 %v3076_v8  ;;  %v3084_v13 = vld [vmem:[#allocation2 + $0x284] ss:$16 sps:$4 sm:$0xff]   ;;  %v3087_v15 = vld [vmem:[#allocation2 + $0x280] ss:$16 sps:$4 sm:$0xff]  }
  0x30   :  { %1725 = vmatprep.subr.bf16.mxu1 %v3078_v9  ;;  %v3088_v16 = vld [vmem:[#allocation2 + $0x64] ss:$16 sps:$4 sm:$0xff]   ;;  %v3092_v18 = vld [vmem:[#allocation2 + $0x60] ss:$16 sps:$4 sm:$0xff]  }
  0x31   :  { %v3090_v17 = vld [vmem:[#allocation2 + $0x264] ss:$16 sps:$4 sm:$0xff]   ;;  %v3093_v19 = vld [vmem:[#allocation2 + $0x260] ss:$16 sps:$4 sm:$0xff]  }
  0x32   :  { %1685 = vmatpush1.bf16.msra.mxu0 %v3080_v10  ;;  %v3094_v20 = vld [vmem:[#allocation2 + $0x44] ss:$16 sps:$4 sm:$0xff]   ;;  %v3098_v22 = vld [vmem:[#allocation2 + $0x40] ss:$16 sps:$4 sm:$0xff]  }
  0x33   :  { %1726 = vmatpush1.bf16.msra.mxu1 %v3081_v11  ;;  %1686 = vmatprep.subr.bf16.mxu0 %v3082_v12  ;;  %v3096_v21 = vld [vmem:[#allocation2 + $0x244] ss:$16 sps:$4 sm:$0xff]   ;;  %v3099_v23 = vld [vmem:[#allocation2 + $0x240] ss:$16 sps:$4 sm:$0xff]  }
  0x34   :  { %1727 = vmatprep.subr.bf16.mxu1 %v3084_v13  ;;  %v3100_v24 = vld [vmem:[#allocation2 + $0x24] ss:$16 sps:$4 sm:$0xff]   ;;  %v3104_v26 = vld [vmem:[#allocation2 + $0x20] ss:$16 sps:$4 sm:$0xff]  }
  0x35   :  { %v3102_v25 = vld [vmem:[#allocation2 + $0x224] ss:$16 sps:$4 sm:$0xff]   ;;  %v3105_v27 = vld [vmem:[#allocation2 + $0x220] ss:$16 sps:$4 sm:$0xff]  }
  0x36   :  { %1687 = vmatpush1.bf16.msra.mxu0 %v3086_v14  ;;  %v3106_v28 = vld [vmem:[#allocation2 + $0x4] ss:$16 sps:$4 sm:$0xff]   ;;  %v3110_v30 = vld [vmem:[#allocation2] ss:$16 sps:$4 sm:$0xff]  }
  0x37   :  { %1728 = vmatpush1.bf16.msra.mxu1 %v3087_v15  ;;  %1688 = vmatprep.subr.bf16.mxu0 %v3088_v16  ;;  %v3108_v29 = vld [vmem:[#allocation2 + $0x204] ss:$16 sps:$4 sm:$0xff]   ;;  %v3111_v31 = vld [vmem:[#allocation2 + $0x200] ss:$16 sps:$4 sm:$0xff]  }
  0x38   :  { %1729 = vmatprep.subr.bf16.mxu1 %v3090_v17  ;;  %v3112_v32 = vld [vmem:[#allocation2 + $0x1e4] ss:$16 sps:$4 sm:$0xff]   ;;  %v3116_v34 = vld [vmem:[#allocation2 + $0x1e0] ss:$16 sps:$4 sm:$0xff]  }
  0x39   :  { %v3114_v33 = vld [vmem:[#allocation2 + $0x3e4] ss:$16 sps:$4 sm:$0xff]   ;;  %v3117_v35 = vld [vmem:[#allocation2 + $0x3e0] ss:$16 sps:$4 sm:$0xff]  }
  0x3a   :  { %1689 = vmatpush1.bf16.msra.mxu0 %v3092_v18  ;;  %v3118_v39 = vld [vmem:[#allocation2 + $0x1c4] ss:$16 sps:$4 sm:$0xff]   ;;  %v3122_v41 = vld [vmem:[#allocation2 + $0x1c0] ss:$16 sps:$4 sm:$0xff]  }
  0x3b   :  { %1730 = vmatpush1.bf16.msra.mxu1 %v3093_v19  ;;  %1690 = vmatprep.subr.bf16.mxu0 %v3094_v20  ;;  %v3120_v40 = vld [vmem:[#allocation2 + $0x3c4] ss:$16 sps:$4 sm:$0xff]   ;;  %v3123_v44 = vld [vmem:[#allocation2 + $0x3c0] ss:$16 sps:$4 sm:$0xff]  }
  0x3c   :  { %1731 = vmatprep.subr.bf16.mxu1 %v3096_v21  ;;  %v3124_v45 = vld [vmem:[#allocation2 + $0x1a4] ss:$16 sps:$4 sm:$0xff]   ;;  %v3128_v47 = vld [vmem:[#allocation2 + $0x1a0] ss:$16 sps:$4 sm:$0xff]  }
  0x3d   :  { %v3126_v46 = vld [vmem:[#allocation2 + $0x3a4] ss:$16 sps:$4 sm:$0xff]   ;;  %v3129_v48 = vld [vmem:[#allocation2 + $0x3a0] ss:$16 sps:$4 sm:$0xff]  }
  0x3e   :  { %1691 = vmatpush1.bf16.msra.mxu0 %v3098_v22  ;;  %v3130_v50 = vld [vmem:[#allocation2 + $0x184] ss:$16 sps:$4 sm:$0xff]   ;;  %v3134_v53 = vld [vmem:[#allocation2 + $0x180] ss:$16 sps:$4 sm:$0xff]  }
  0x3f   :  { %1732 = vmatpush1.bf16.msra.mxu1 %v3099_v23  ;;  %1692 = vmatprep.subr.bf16.mxu0 %v3100_v24  ;;  %v3132_v51 = vld [vmem:[#allocation2 + $0x384] ss:$16 sps:$4 sm:$0xff]   ;;  %v3135_v56 = vld [vmem:[#allocation2 + $0x380] ss:$16 sps:$4 sm:$0xff]  }
  0x40   :  { %1733 = vmatprep.subr.bf16.mxu1 %v3102_v25  ;;  %v68_v52 = vld [vmem:[%s3790_s0] sm:$0xff] }
  0x41   :  { %v79_v54 = vrot.slane %v68_v52, %v3692_v49  ;;  %v72_v55 = vcombine.high %v68_v52, %v68_v52  ;;  %v3136_v57 = vld [vmem:[#allocation2 + $0x164] ss:$16 sps:$4 sm:$0xff]   ;;  %v3140_v61 = vld [vmem:[#allocation2 + $0x160] ss:$16 sps:$4 sm:$0xff]  }
  0x42   :  { %1693 = vmatpush1.bf16.msra.mxu0 %v3104_v26  ;;  %v3138_v58 = vld [vmem:[#allocation2 + $0x364] ss:$16 sps:$4 sm:$0xff]   ;;  %v3141_v0 = vld [vmem:[#allocation2 + $0x360] ss:$16 sps:$4 sm:$0xff]  }
  0x43   :  { %1734 = vmatpush1.bf16.msra.mxu1 %v3105_v27  ;;  %1694 = vmatprep.subr.bf16.mxu0 %v3106_v28  ;;  %v87_v59 = vcombine.high %v79_v54, %v79_v54  ;;  %v86_v60 = vrot.slane %v72_v55, %v3692_v49  ;;  %v3142_v1 = vld [vmem:[#allocation2 + $0x144] ss:$16 sps:$4 sm:$0xff]   ;;  %v3146_v4 = vld [vmem:[#allocation2 + $0x140] ss:$16 sps:$4 sm:$0xff]   ;;  %v3705_v16 = vpack.c.bf16 %v79_v54, %v79_v54 }
  0x44   :  { %1735 = vmatprep.subr.bf16.mxu1 %v3108_v29  ;;  %v3144_v2 = vld [vmem:[#allocation2 + $0x344] ss:$16 sps:$4 sm:$0xff]   ;;  %v3147_v5 = vld [vmem:[#allocation2 + $0x340] ss:$16 sps:$4 sm:$0xff]  }
  0x45   :  { %v3699_v62 = vpack.c.bf16 %v87_v59, %v87_v59  ;;  %v88_v63 = vcombine.high %v86_v60, %v86_v60  ;;  %v3148_v6 = vld [vmem:[#allocation2 + $0x124] ss:$16 sps:$4 sm:$0xff]   ;;  %v3152_v8 = vld [vmem:[#allocation2 + $0x120] ss:$16 sps:$4 sm:$0xff]   ;;  %v3707_v17 = vpack.c.bf16 %v86_v60, %v86_v60 }
  0x46   :  { %1695 = vmatpush1.bf16.msra.mxu0 %v3110_v30  ;;  %v3150_v7 = vld [vmem:[#allocation2 + $0x324] ss:$16 sps:$4 sm:$0xff]   ;;  %v3153_v9 = vld [vmem:[#allocation2 + $0x320] ss:$16 sps:$4 sm:$0xff]  }
  0x47   :  { %1736 = vmatpush1.bf16.msra.mxu1 %v3111_v31  ;;  %1696 = vmatprep.subr.bf16.mxu0 %v3112_v32  ;;  %v3701_v3 = vpack.c.bf16 %v88_v63, %v88_v63  ;;  %v3154_v10 = vld [vmem:[#allocation2 + $0x104] ss:$16 sps:$4 sm:$0xff]   ;;  %v3158_v12 = vld [vmem:[#allocation2 + $0x100] ss:$16 sps:$4 sm:$0xff]  }
  0x48   :  { %1737 = vmatprep.subr.bf16.mxu1 %v3114_v33  ;;  %1712 = vmatprep.mubr.bf16.mxu0 %v3699_v62  ;;  %v3156_v11 = vld [vmem:[#allocation2 + $0x304] ss:$16 sps:$4 sm:$0xff]   ;;  %v3159_v13 = vld [vmem:[#allocation2 + $0x300] ss:$16 sps:$4 sm:$0xff]  }
  0x49   :  { %1753 = vmatprep.mubr.bf16.mxu1 %v3701_v3  ;;  %v3163_v14 = vld [vmem:[#allocation2 + $0x4e4] ss:$16 sps:$4 sm:$0xff]   ;;  %v3161_v18 = vld [vmem:[#allocation2 + $0x4e0] ss:$16 sps:$4 sm:$0xff]  }
  0x4a   :  { %1697 = vmatpush2.bf16.msra.mxu0 %v3116_v34  ;;  %v3166_v15 = vld [vmem:[#allocation2 + $0x6e4] ss:$16 sps:$4 sm:$0xff]   ;;  %v3164_v19 = vld [vmem:[#allocation2 + $0x6e0] ss:$16 sps:$4 sm:$0xff]  }
  0x4b   :  { %1738 = vmatpush2.bf16.msra.mxu1 %v3117_v35  ;;  %1698 = vmatprep.subr.bf16.mxu0 %v3118_v39  ;;  %v3169_v20 = vld [vmem:[#allocation2 + $0x4c4] ss:$16 sps:$4 sm:$0xff]   ;;  %v3167_v22 = vld [vmem:[#allocation2 + $0x4c0] ss:$16 sps:$4 sm:$0xff]  }
  0x4c   :  { %1739 = vmatprep.subr.bf16.mxu1 %v3120_v40  ;;  %v3172_v21 = vld [vmem:[#allocation2 + $0x6c4] ss:$16 sps:$4 sm:$0xff]   ;;  %v3170_v23 = vld [vmem:[#allocation2 + $0x6c0] ss:$16 sps:$4 sm:$0xff]  }
  0x4d   :  { %v3175_v24 = vld [vmem:[#allocation2 + $0x4a4] ss:$16 sps:$4 sm:$0xff]   ;;  %v3173_v26 = vld [vmem:[#allocation2 + $0x4a0] ss:$16 sps:$4 sm:$0xff]  }
  0x4e   :  { %1699 = vmatpush2.bf16.msra.mxu0 %v3122_v41  ;;  %v3178_v25 = vld [vmem:[#allocation2 + $0x6a4] ss:$16 sps:$4 sm:$0xff]   ;;  %v3176_v27 = vld [vmem:[#allocation2 + $0x6a0] ss:$16 sps:$4 sm:$0xff]  }
  0x4f   :  { %1740 = vmatpush2.bf16.msra.mxu1 %v3123_v44  ;;  %1700 = vmatprep.subr.bf16.mxu0 %v3124_v45  ;;  %v3181_v28 = vld [vmem:[#allocation2 + $0x484] ss:$16 sps:$4 sm:$0xff]   ;;  %v3179_v30 = vld [vmem:[#allocation2 + $0x480] ss:$16 sps:$4 sm:$0xff]   ;;  %v3715_v44 = vrot.slane %v69_v42, %v3692_v49  ;;  %v89_v45 = vcombine.high %v69_v42, %v69_v42  ;;  %v3273_v42 = vld [vmem:[#allocation2 + $0x2a8] ss:$16 sps:$4 sm:$0xff]  }
  0x50   :  { %1741 = vmatprep.subr.bf16.mxu1 %v3126_v46  ;;  %v3184_v29 = vld [vmem:[#allocation2 + $0x684] ss:$16 sps:$4 sm:$0xff]   ;;  %v3182_v31 = vld [vmem:[#allocation2 + $0x680] ss:$16 sps:$4 sm:$0xff]  }
  0x51   :  { %v3187_v32 = vld [vmem:[#allocation2 + $0x464] ss:$16 sps:$4 sm:$0xff]   ;;  %v3185_v34 = vld [vmem:[#allocation2 + $0x460] ss:$16 sps:$4 sm:$0xff]  }
  0x52   :  { %1701 = vmatpush2.bf16.msra.mxu0 %v3128_v47  ;;  %v3190_v33 = vld [vmem:[#allocation2 + $0x664] ss:$16 sps:$4 sm:$0xff]   ;;  %v3188_v35 = vld [vmem:[#allocation2 + $0x660] ss:$16 sps:$4 sm:$0xff]  }
  0x53   :  { %1742 = vmatpush2.bf16.msra.mxu1 %v3129_v48  ;;  %1702 = vmatprep.subr.bf16.mxu0 %v3130_v50  ;;  %v3193_v36 = vld [vmem:[#allocation2 + $0x444] ss:$16 sps:$4 sm:$0xff]   ;;  %v3191_v38 = vld [vmem:[#allocation2 + $0x440] ss:$16 sps:$4 sm:$0xff]   ;;  %v104_v48 = vcombine.high %v3715_v44, %v3715_v44  ;;  %v3720_v50 = vrot.slane %v89_v45, %v3692_v49  ;;  %v3281_v45 = vld [vmem:[#allocation2 + $0x28c] ss:$16 sps:$4 sm:$0xff]  }
  0x54   :  { %1743 = vmatprep.subr.bf16.mxu1 %v3132_v51  ;;  %v3196_v37 = vld [vmem:[#allocation2 + $0x644] ss:$16 sps:$4 sm:$0xff]   ;;  %v3194_v39 = vld [vmem:[#allocation2 + $0x640] ss:$16 sps:$4 sm:$0xff]  }
  0x55   :  { %v3199_v40 = vld [vmem:[#allocation2 + $0x424] ss:$16 sps:$4 sm:$0xff]   ;;  %v3197_v46 = vld [vmem:[#allocation2 + $0x420] ss:$16 sps:$4 sm:$0xff]   ;;  %v105_v54 = vcombine.high %v3720_v50, %v3720_v50 }
  0x56   :  { %1703 = vmatpush2.bf16.msra.mxu0 %v3134_v53  ;;  %v3202_v41 = vld [vmem:[#allocation2 + $0x624] ss:$16 sps:$4 sm:$0xff]   ;;  %v3200_v47 = vld [vmem:[#allocation2 + $0x620] ss:$16 sps:$4 sm:$0xff]   ;;  %v3722_v53 = vpack.c.bf16 %v104_v48, %v104_v48  ;;  %v3284_v48 = vld [vmem:[#allocation2 + $0x6c] ss:$16 sps:$4 sm:$0xff]  }
  0x57   :  { %1744 = vmatpush2.bf16.msra.mxu1 %v3135_v56  ;;  %1704 = vmatprep.subr.bf16.mxu0 %v3136_v57  ;;  %v3205_v51 = vld [vmem:[#allocation2 + $0x404] ss:$16 sps:$4 sm:$0xff]   ;;  %v3203_v55 = vld [vmem:[#allocation2 + $0x400] ss:$16 sps:$4 sm:$0xff]   ;;  %v3726_v57 = vpack.c.bf16 %v105_v54, %v105_v54  ;;  %v3288_v54 = vld [vmem:[#allocation2 + $0x48] ss:$16 sps:$4 sm:$0xff]  }
  0x58   :  { %1745 = vmatprep.subr.bf16.mxu1 %v3138_v58  ;;  %v3208_v52 = vld [vmem:[#allocation2 + $0x604] ss:$16 sps:$4 sm:$0xff]   ;;  %v3206_v56 = vld [vmem:[#allocation2 + $0x600] ss:$16 sps:$4 sm:$0xff]  }
  0x59   :  { %v3211_v58 = vld [vmem:[#allocation2 + $0x5e4] ss:$16 sps:$4 sm:$0xff]   ;;  %v3209_v59 = vld [vmem:[#allocation2 + $0x5e0] ss:$16 sps:$4 sm:$0xff]  }
  0x5a   :  { %1705 = vmatpush2.bf16.msra.mxu0 %v3140_v61  ;;  %v3214_v49 = vld [vmem:[#allocation2 + $0x7e4] ss:$16 sps:$4 sm:$0xff]   ;;  %v3212_v60 = vld [vmem:[#allocation2 + $0x7e0] ss:$16 sps:$4 sm:$0xff]  }
  0x5b   :  { %1746 = vmatpush2.bf16.msra.mxu1 %v3141_v0  ;;  %1706 = vmatprep.subr.bf16.mxu0 %v3142_v1  ;;  %v3217_v61 = vld [vmem:[#allocation2 + $0x5c4] ss:$16 sps:$4 sm:$0xff]   ;;  %v3215_v0 = vld [vmem:[#allocation2 + $0x5c0] ss:$16 sps:$4 sm:$0xff]  }
  0x5c   :  { %1747 = vmatprep.subr.bf16.mxu1 %v3144_v2  ;;  %v3220_v63 = vld [vmem:[#allocation2 + $0x7c4] ss:$16 sps:$4 sm:$0xff]   ;;  %v3218_v1 = vld [vmem:[#allocation2 + $0x7c0] ss:$16 sps:$4 sm:$0xff]  }
  0x5d   :  { %v3223_v2 = vld [vmem:[#allocation2 + $0x5a4] ss:$16 sps:$4 sm:$0xff]  }
  0x5e   :  { %1707 = vmatpush2.bf16.msra.mxu0 %v3146_v4  ;;  %v3226_v4 = vld [vmem:[#allocation2 + $0x7a4] ss:$16 sps:$4 sm:$0xff]  }
  0x5f   :  { %1748 = vmatpush2.bf16.msra.mxu1 %v3147_v5  ;;  %1708 = vmatprep.subr.bf16.mxu0 %v3148_v6  ;;  %v3221_v5 = vld [vmem:[#allocation2 + $0x5a0] ss:$16 sps:$4 sm:$0xff]  }
  0x60   :  { %1749 = vmatprep.subr.bf16.mxu1 %v3150_v7  ;;  %v3224_v6 = vld [vmem:[#allocation2 + $0x7a0] ss:$16 sps:$4 sm:$0xff]   ;;  %v3229_v7 = vld [vmem:[#allocation2 + $0x584] ss:$16 sps:$4 sm:$0xff]  }
  0x62   :  { %1709 = vmatpush2.bf16.msra.mxu0 %v3152_v8  ;;  %v3232_v8 = vld [vmem:[#allocation2 + $0x784] ss:$16 sps:$4 sm:$0xff]  }
  0x63   :  { %1750 = vmatpush2.bf16.msra.mxu1 %v3153_v9  ;;  %1710 = vmatprep.subr.bf16.mxu0 %v3154_v10  ;;  %v3227_v9 = vld [vmem:[#allocation2 + $0x580] ss:$16 sps:$4 sm:$0xff]  }
  0x64   :  { %1751 = vmatprep.subr.bf16.mxu1 %v3156_v11  ;;  %v3230_v10 = vld [vmem:[#allocation2 + $0x780] ss:$16 sps:$4 sm:$0xff]   ;;  %v3235_v11 = vld [vmem:[#allocation2 + $0x564] ss:$16 sps:$4 sm:$0xff]  }
  0x66   :  { %1711 = vmatpush2.bf16.msra.mxu0 %v3158_v12  ;;  %v3238_v12 = vld [vmem:[#allocation2 + $0x764] ss:$16 sps:$4 sm:$0xff]  }
  0x67   :  { %1752 = vmatpush2.bf16.msra.mxu1 %v3159_v13  ;;  %1762 = vmatprep.subr.bf16.mxu0 %v3163_v14  ;;  %v3233_v13 = vld [vmem:[#allocation2 + $0x560] ss:$16 sps:$4 sm:$0xff]  }
  0x68   :  { %1803 = vmatprep.subr.bf16.mxu1 %v3166_v15  ;;  %v3236_v14 = vld [vmem:[#allocation2 + $0x760] ss:$16 sps:$4 sm:$0xff]   ;;  %v3241_v15 = vld [vmem:[#allocation2 + $0x544] ss:$16 sps:$4 sm:$0xff]  }
  0x69   :  { %1713 = vmatmul.mubr.bf16.vlgmr.msra.gmra.mxu0 %v3705_v16 }
  0x6a   :  { %1754 = vmatmul.mubr.bf16.vlgmr.msra.gmra.mxu1 %v3707_v17  ;;  %1763 = vmatpush1.bf16.msra.mxu0 %v3161_v18  ;;  %v3244_v18 = vld [vmem:[#allocation2 + $0x744] ss:$16 sps:$4 sm:$0xff]  }
  0x6b   :  { %1804 = vmatpush1.bf16.msra.mxu1 %v3164_v19  ;;  %1764 = vmatprep.subr.bf16.mxu0 %v3169_v20  ;;  %v3239_v19 = vld [vmem:[#allocation2 + $0x540] ss:$16 sps:$4 sm:$0xff]  }
  0x6c   :  { %1805 = vmatprep.subr.bf16.mxu1 %v3172_v21  ;;  %1794 = vmatprep.mubr.bf16.mxu0 %v3722_v53  ;;  %v3242_v20 = vld [vmem:[#allocation2 + $0x740] ss:$16 sps:$4 sm:$0xff]   ;;  %v3247_v21 = vld [vmem:[#allocation2 + $0x524] ss:$16 sps:$4 sm:$0xff]  }
  0x6d   :  { %1835 = vmatprep.mubr.bf16.mxu1 %v3726_v57 }
  0x6e   :  { %1765 = vmatpush1.bf16.msra.mxu0 %v3167_v22  ;;  %v3250_v22 = vld [vmem:[#allocation2 + $0x724] ss:$16 sps:$4 sm:$0xff]  }
  0x6f   :  { %1806 = vmatpush1.bf16.msra.mxu1 %v3170_v23  ;;  %1766 = vmatprep.subr.bf16.mxu0 %v3175_v24  ;;  %v3245_v23 = vld [vmem:[#allocation2 + $0x520] ss:$16 sps:$4 sm:$0xff]  }
  0x70   :  { %1807 = vmatprep.subr.bf16.mxu1 %v3178_v25  ;;  %v3248_v24 = vld [vmem:[#allocation2 + $0x720] ss:$16 sps:$4 sm:$0xff]   ;;  %v3253_v25 = vld [vmem:[#allocation2 + $0x504] ss:$16 sps:$4 sm:$0xff]  }
  0x72   :  { %1767 = vmatpush1.bf16.msra.mxu0 %v3173_v26  ;;  %v3256_v26 = vld [vmem:[#allocation2 + $0x704] ss:$16 sps:$4 sm:$0xff]  }
  0x73   :  { %1808 = vmatpush1.bf16.msra.mxu1 %v3176_v27  ;;  %1768 = vmatprep.subr.bf16.mxu0 %v3181_v28  ;;  %v3251_v27 = vld [vmem:[#allocation2 + $0x500] ss:$16 sps:$4 sm:$0xff]  }
  0x74   :  { %1809 = vmatprep.subr.bf16.mxu1 %v3184_v29  ;;  %v3254_v28 = vld [vmem:[#allocation2 + $0x700] ss:$16 sps:$4 sm:$0xff]   ;;  %v3260_v29 = vld [vmem:[#allocation2 + $0xec] ss:$16 sps:$4 sm:$0xff]  }
  0x76   :  { %1769 = vmatpush1.bf16.msra.mxu0 %v3179_v30  ;;  %v3263_v30 = vld [vmem:[#allocation2 + $0x2ec] ss:$16 sps:$4 sm:$0xff]  }
  0x77   :  { %1810 = vmatpush1.bf16.msra.mxu1 %v3182_v31  ;;  %1770 = vmatprep.subr.bf16.mxu0 %v3187_v32  ;;  %v3732_v31 = vpack.c.bf16 %v3715_v44, %v3715_v44  ;;  %v3736_v32 = vpack.c.bf16 %v3720_v50, %v3720_v50  ;;  %v3278_v44 = vld [vmem:[#allocation2 + $0x8c] ss:$16 sps:$4 sm:$0xff]  }
  0x78   :  { %1811 = vmatprep.subr.bf16.mxu1 %v3190_v33  ;;  %v3258_v33 = vld [vmem:[#allocation2 + $0xe8] ss:$16 sps:$4 sm:$0xff]   ;;  %v3287_v50 = vld [vmem:[#allocation2 + $0x26c] ss:$16 sps:$4 sm:$0xff]  }
  0x7a   :  { %1771 = vmatpush1.bf16.msra.mxu0 %v3185_v34  ;;  %v3261_v34 = vld [vmem:[#allocation2 + $0x2e8] ss:$16 sps:$4 sm:$0xff]  }
  0x7b   :  { %1812 = vmatpush1.bf16.msra.mxu1 %v3188_v35  ;;  %1772 = vmatprep.subr.bf16.mxu0 %v3193_v36  ;;  %v3266_v35 = vld [vmem:[#allocation2 + $0xcc] ss:$16 sps:$4 sm:$0xff]  }
  0x7c   :  { %1813 = vmatprep.subr.bf16.mxu1 %v3196_v37  ;;  %v3269_v36 = vld [vmem:[#allocation2 + $0x2cc] ss:$16 sps:$4 sm:$0xff]   ;;  %v3264_v37 = vld [vmem:[#allocation2 + $0xc8] ss:$16 sps:$4 sm:$0xff]  }
  0x7e   :  { %1773 = vmatpush1.bf16.msra.mxu0 %v3191_v38  ;;  %v3267_v38 = vld [vmem:[#allocation2 + $0x2c8] ss:$16 sps:$4 sm:$0xff]  }
  0x7f   :  { %1814 = vmatpush1.bf16.msra.mxu1 %v3194_v39  ;;  %1774 = vmatprep.subr.bf16.mxu0 %v3199_v40  ;;  %v3272_v39 = vld [vmem:[#allocation2 + $0xac] ss:$16 sps:$4 sm:$0xff]  }
  0x80   :  { %1815 = vmatprep.subr.bf16.mxu1 %v3202_v41  ;;  %v3275_v40 = vld [vmem:[#allocation2 + $0x2ac] ss:$16 sps:$4 sm:$0xff]   ;;  %v3270_v41 = vld [vmem:[#allocation2 + $0xa8] ss:$16 sps:$4 sm:$0xff]  }
  0x82   :  { %1775 = vmatpush1.bf16.msra.mxu0 %v3197_v46  ;;  %v3276_v46 = vld [vmem:[#allocation2 + $0x88] ss:$16 sps:$4 sm:$0xff]  }
  0x83   :  { %1816 = vmatpush1.bf16.msra.mxu1 %v3200_v47  ;;  %1776 = vmatprep.subr.bf16.mxu0 %v3205_v51  ;;  %v3279_v47 = vld [vmem:[#allocation2 + $0x288] ss:$16 sps:$4 sm:$0xff]   ;;  %v3290_v51 = vld [vmem:[#allocation2 + $0x4c] ss:$16 sps:$4 sm:$0xff]  }
  0x84   :  { %1817 = vmatprep.subr.bf16.mxu1 %v3208_v52  ;;  %v3293_v52 = vld [vmem:[#allocation2 + $0x24c] ss:$16 sps:$4 sm:$0xff]  }
  0x86   :  { %1777 = vmatpush1.bf16.msra.mxu0 %v3203_v55  ;;  %v3291_v55 = vld [vmem:[#allocation2 + $0x248] ss:$16 sps:$4 sm:$0xff]  }
  0x87   :  { %1818 = vmatpush1.bf16.msra.mxu1 %v3206_v56  ;;  %1778 = vmatprep.subr.bf16.mxu0 %v3211_v58  ;;  %v3296_v56 = vld [vmem:[#allocation2 + $0x2c] ss:$16 sps:$4 sm:$0xff]  }
  0x88   :  { %1819 = vmatprep.subr.bf16.mxu1 %v3214_v49  ;;  %v3299_v58 = vld [vmem:[#allocation2 + $0x22c] ss:$16 sps:$4 sm:$0xff]   ;;  %v3294_v49 = vld [vmem:[#allocation2 + $0x28] ss:$16 sps:$4 sm:$0xff]  }
  0x8a   :  { %1779 = vmatpush2.bf16.msra.mxu0 %v3209_v59  ;;  %v3297_v59 = vld [vmem:[#allocation2 + $0x228] ss:$16 sps:$4 sm:$0xff]  }
  0x8b   :  { %1820 = vmatpush2.bf16.msra.mxu1 %v3212_v60  ;;  %1780 = vmatprep.subr.bf16.mxu0 %v3217_v61  ;;  %v3302_v60 = vld [vmem:[#allocation2 + $0xc] ss:$16 sps:$4 sm:$0xff]  }
  0x8c   :  { %1821 = vmatprep.subr.bf16.mxu1 %v3220_v63  ;;  %v3305_v61 = vld [vmem:[#allocation2 + $0x20c] ss:$16 sps:$4 sm:$0xff]   ;;  %v3300_v63 = vld [vmem:[#allocation2 + $0x8] ss:$16 sps:$4 sm:$0xff]  }
  0x8e   :  { %1781 = vmatpush2.bf16.msra.mxu0 %v3215_v0  ;;  %v3303_v0 = vld [vmem:[#allocation2 + $0x208] ss:$16 sps:$4 sm:$0xff]  }
  0x8f   :  { %1822 = vmatpush2.bf16.msra.mxu1 %v3218_v1  ;;  %1782 = vmatprep.subr.bf16.mxu0 %v3223_v2  ;;  %v3308_v1 = vld [vmem:[#allocation2 + $0x1ec] ss:$16 sps:$4 sm:$0xff]  }
  0x90   :  { %1823 = vmatprep.subr.bf16.mxu1 %v3226_v4  ;;  %v3311_v2 = vld [vmem:[#allocation2 + $0x3ec] ss:$16 sps:$4 sm:$0xff]   ;;  %v3306_v4 = vld [vmem:[#allocation2 + $0x1e8] ss:$16 sps:$4 sm:$0xff]  }
  0x92   :  { %1783 = vmatpush2.bf16.msra.mxu0 %v3221_v5  ;;  %v3309_v5 = vld [vmem:[#allocation2 + $0x3e8] ss:$16 sps:$4 sm:$0xff]  }
  0x93   :  { %1824 = vmatpush2.bf16.msra.mxu1 %v3224_v6  ;;  %1784 = vmatprep.subr.bf16.mxu0 %v3229_v7  ;;  %v3314_v6 = vld [vmem:[#allocation2 + $0x1cc] ss:$16 sps:$4 sm:$0xff]  }
  0x94   :  { %1825 = vmatprep.subr.bf16.mxu1 %v3232_v8  ;;  %v3317_v7 = vld [vmem:[#allocation2 + $0x3cc] ss:$16 sps:$4 sm:$0xff]   ;;  %v3312_v8 = vld [vmem:[#allocation2 + $0x1c8] ss:$16 sps:$4 sm:$0xff]  }
  0x96   :  { %1785 = vmatpush2.bf16.msra.mxu0 %v3227_v9  ;;  %v3315_v9 = vld [vmem:[#allocation2 + $0x3c8] ss:$16 sps:$4 sm:$0xff]  }
  0x97   :  { %1826 = vmatpush2.bf16.msra.mxu1 %v3230_v10  ;;  %1786 = vmatprep.subr.bf16.mxu0 %v3235_v11  ;;  %v3320_v10 = vld [vmem:[#allocation2 + $0x1ac] ss:$16 sps:$4 sm:$0xff]  }
  0x98   :  { %1827 = vmatprep.subr.bf16.mxu1 %v3238_v12  ;;  %v3323_v11 = vld [vmem:[#allocation2 + $0x3ac] ss:$16 sps:$4 sm:$0xff]   ;;  %v3318_v12 = vld [vmem:[#allocation2 + $0x1a8] ss:$16 sps:$4 sm:$0xff]  }
  0x9a   :  { %1787 = vmatpush2.bf16.msra.mxu0 %v3233_v13  ;;  %v3321_v13 = vld [vmem:[#allocation2 + $0x3a8] ss:$16 sps:$4 sm:$0xff]  }
  0x9b   :  { %1828 = vmatpush2.bf16.msra.mxu1 %v3236_v14  ;;  %1788 = vmatprep.subr.bf16.mxu0 %v3241_v15  ;;  %v3326_v14 = vld [vmem:[#allocation2 + $0x18c] ss:$16 sps:$4 sm:$0xff]  }
  0x9c   :  { %1829 = vmatprep.subr.bf16.mxu1 %v3244_v18  ;;  %v3329_v15 = vld [vmem:[#allocation2 + $0x38c] ss:$16 sps:$4 sm:$0xff]   ;;  %v3324_v18 = vld [vmem:[#allocation2 + $0x188] ss:$16 sps:$4 sm:$0xff]  }
  0x9e   :  { %1789 = vmatpush2.bf16.msra.mxu0 %v3239_v19  ;;  %v3327_v19 = vld [vmem:[#allocation2 + $0x388] ss:$16 sps:$4 sm:$0xff]  }
  0x9f   :  { %1830 = vmatpush2.bf16.msra.mxu1 %v3242_v20  ;;  %1790 = vmatprep.subr.bf16.mxu0 %v3247_v21  ;;  %v3332_v20 = vld [vmem:[#allocation2 + $0x16c] ss:$16 sps:$4 sm:$0xff]  }
  0xa0   :  { %1831 = vmatprep.subr.bf16.mxu1 %v3250_v22  ;;  %v3335_v21 = vld [vmem:[#allocation2 + $0x36c] ss:$16 sps:$4 sm:$0xff]   ;;  %v3330_v22 = vld [vmem:[#allocation2 + $0x168] ss:$16 sps:$4 sm:$0xff]  }
  0xa2   :  { %1791 = vmatpush2.bf16.msra.mxu0 %v3245_v23  ;;  %v3333_v23 = vld [vmem:[#allocation2 + $0x368] ss:$16 sps:$4 sm:$0xff]  }
  0xa3   :  { %1832 = vmatpush2.bf16.msra.mxu1 %v3248_v24  ;;  %1792 = vmatprep.subr.bf16.mxu0 %v3253_v25  ;;  %v3338_v24 = vld [vmem:[#allocation2 + $0x14c] ss:$16 sps:$4 sm:$0xff]  }
  0xa4   :  { %1833 = vmatprep.subr.bf16.mxu1 %v3256_v26  ;;  %v3341_v25 = vld [vmem:[#allocation2 + $0x34c] ss:$16 sps:$4 sm:$0xff]   ;;  %v3336_v26 = vld [vmem:[#allocation2 + $0x148] ss:$16 sps:$4 sm:$0xff]  }
  0xa6   :  { %1793 = vmatpush2.bf16.msra.mxu0 %v3251_v27  ;;  %v3339_v27 = vld [vmem:[#allocation2 + $0x348] ss:$16 sps:$4 sm:$0xff]  }
  0xa7   :  { %1834 = vmatpush2.bf16.msra.mxu1 %v3254_v28  ;;  %1844 = vmatprep.subr.bf16.mxu0 %v3260_v29  ;;  %v3344_v28 = vld [vmem:[#allocation2 + $0x12c] ss:$16 sps:$4 sm:$0xff]  }
  0xa8   :  { %1885 = vmatprep.subr.bf16.mxu1 %v3263_v30  ;;  %v3347_v29 = vld [vmem:[#allocation2 + $0x32c] ss:$16 sps:$4 sm:$0xff]   ;;  %v3342_v30 = vld [vmem:[#allocation2 + $0x128] ss:$16 sps:$4 sm:$0xff]  }
  0xa9   :  { %1795 = vmatmul.mubr.bf16.vlgmr.msra.gmra.mxu0 %v3732_v31 }
  0xaa   :  { %1836 = vmatmul.mubr.bf16.vlgmr.msra.gmra.mxu1 %v3736_v32  ;;  %1845 = vmatpush1.bf16.msra.mxu0 %v3258_v33  ;;  %v3345_v33 = vld [vmem:[#allocation2 + $0x328] ss:$16 sps:$4 sm:$0xff]  }
  0xab   :  { %1886 = vmatpush1.bf16.msra.mxu1 %v3261_v34  ;;  %1846 = vmatprep.subr.bf16.mxu0 %v3266_v35  ;;  %v3350_v34 = vld [vmem:[#allocation2 + $0x10c] ss:$16 sps:$4 sm:$0xff]  }
  0xac   :  { %1887 = vmatprep.subr.bf16.mxu1 %v3269_v36  ;;  %1876 = vmatprep.mubr.bf16.mxu0 %v3699_v62  ;;  %v3282_v62 = vld [vmem:[#allocation2 + $0x68] ss:$16 sps:$4 sm:$0xff]   ;;  %v3353_v35 = vld [vmem:[#allocation2 + $0x30c] ss:$16 sps:$4 sm:$0xff]  }
  0xad   :  { %1917 = vmatprep.mubr.bf16.mxu1 %v3701_v3  ;;  %v3285_v3 = vld [vmem:[#allocation2 + $0x268] ss:$16 sps:$4 sm:$0xff]  }
  0xae   :  { %1847 = vmatpush1.bf16.msra.mxu0 %v3264_v37  ;;  %v3348_v36 = vld [vmem:[#allocation2 + $0x108] ss:$16 sps:$4 sm:$0xff]  }
  0xaf   :  { %1888 = vmatpush1.bf16.msra.mxu1 %v3267_v38  ;;  %1848 = vmatprep.subr.bf16.mxu0 %v3272_v39  ;;  %v3351_v37 = vld [vmem:[#allocation2 + $0x308] ss:$16 sps:$4 sm:$0xff]   ;;  %v3356_v38 = vld [vmem:[#allocation2 + $0x4ec] ss:$16 sps:$4 sm:$0xff]  }
  0xb0   :  { %1889 = vmatprep.subr.bf16.mxu1 %v3275_v40  ;;  %v3359_v39 = vld [vmem:[#allocation2 + $0x6ec] ss:$16 sps:$4 sm:$0xff]   ;;  %v3354_v40 = vld [vmem:[#allocation2 + $0x4e8] ss:$16 sps:$4 sm:$0xff]  }
  0xb2   :  { %1849 = vmatpush1.bf16.msra.mxu0 %v3270_v41  ;;  %v3357_v41 = vld [vmem:[#allocation2 + $0x6e8] ss:$16 sps:$4 sm:$0xff]  }
  0xb3   :  { %1890 = vmatpush1.bf16.msra.mxu1 %v3273_v42  ;;  %1850 = vmatprep.subr.bf16.mxu0 %v3278_v44  ;;  %v3362_v42 = vld [vmem:[#allocation2 + $0x4cc] ss:$16 sps:$4 sm:$0xff]  }
  0xb4   :  { %1891 = vmatprep.subr.bf16.mxu1 %v3281_v45  ;;  %v3365_v44 = vld [vmem:[#allocation2 + $0x6cc] ss:$16 sps:$4 sm:$0xff]   ;;  %v3360_v45 = vld [vmem:[#allocation2 + $0x4c8] ss:$16 sps:$4 sm:$0xff]  }
  0xb6   :  { %1851 = vmatpush1.bf16.msra.mxu0 %v3276_v46  ;;  %v3363_v46 = vld [vmem:[#allocation2 + $0x6c8] ss:$16 sps:$4 sm:$0xff]  }
  0xb7   :  { %1892 = vmatpush1.bf16.msra.mxu1 %v3279_v47  ;;  %1852 = vmatprep.subr.bf16.mxu0 %v3284_v48  ;;  %v3368_v47 = vld [vmem:[#allocation2 + $0x4ac] ss:$16 sps:$4 sm:$0xff]  }
  0xb8   :  { %1893 = vmatprep.subr.bf16.mxu1 %v3287_v50  ;;  %v3371_v48 = vld [vmem:[#allocation2 + $0x6ac] ss:$16 sps:$4 sm:$0xff]   ;;  %v3366_v50 = vld [vmem:[#allocation2 + $0x4a8] ss:$16 sps:$4 sm:$0xff]  }
  0xba   :  { %1853 = vmatpush1.bf16.msra.mxu0 %v3282_v62  ;;  %v3369_v62 = vld [vmem:[#allocation2 + $0x6a8] ss:$16 sps:$4 sm:$0xff]  }
  0xbb   :  { %1894 = vmatpush1.bf16.msra.mxu1 %v3285_v3  ;;  %1854 = vmatprep.subr.bf16.mxu0 %v3290_v51  ;;  %v3374_v3 = vld [vmem:[#allocation2 + $0x48c] ss:$16 sps:$4 sm:$0xff]  }
  0xbc   :  { %1895 = vmatprep.subr.bf16.mxu1 %v3293_v52  ;;  %v3377_v51 = vld [vmem:[#allocation2 + $0x68c] ss:$16 sps:$4 sm:$0xff]  }
  0xbd   :  { %v3380_v52 = vld [vmem:[#allocation2 + $0x46c] ss:$16 sps:$4 sm:$0xff]  }
  0xbe   :  { %1855 = vmatpush1.bf16.msra.mxu0 %v3288_v54  ;;  %v3383_v54 = vld [vmem:[#allocation2 + $0x66c] ss:$16 sps:$4 sm:$0xff]  }
  0xbf   :  { %1896 = vmatpush1.bf16.msra.mxu1 %v3291_v55  ;;  %1856 = vmatprep.subr.bf16.mxu0 %v3296_v56  ;;  %v3378_v55 = vld [vmem:[#allocation2 + $0x468] ss:$16 sps:$4 sm:$0xff]  }
  0xc0   :  { %1897 = vmatprep.subr.bf16.mxu1 %v3299_v58  ;;  %v3381_v56 = vld [vmem:[#allocation2 + $0x668] ss:$16 sps:$4 sm:$0xff]   ;;  %v3386_v58 = vld [vmem:[#allocation2 + $0x44c] ss:$16 sps:$4 sm:$0xff]  }
  0xc2   :  { %1857 = vmatpush1.bf16.msra.mxu0 %v3294_v49  ;;  %v3387_v49 = vld [vmem:[#allocation2 + $0x648] ss:$16 sps:$4 sm:$0xff]  }
  0xc3   :  { %1898 = vmatpush1.bf16.msra.mxu1 %v3297_v59  ;;  %1858 = vmatprep.subr.bf16.mxu0 %v3302_v60  ;;  %v3392_v59 = vld [vmem:[#allocation2 + $0x42c] ss:$16 sps:$4 sm:$0xff]  }
  0xc4   :  { %1899 = vmatprep.subr.bf16.mxu1 %v3305_v61  ;;  %v3395_v60 = vld [vmem:[#allocation2 + $0x62c] ss:$16 sps:$4 sm:$0xff]   ;;  %v3390_v61 = vld [vmem:[#allocation2 + $0x428] ss:$16 sps:$4 sm:$0xff]  }
  0xc6   :  { %1859 = vmatpush1.bf16.msra.mxu0 %v3300_v63  ;;  %v3393_v63 = vld [vmem:[#allocation2 + $0x628] ss:$16 sps:$4 sm:$0xff]  }
  0xc7   :  { %1900 = vmatpush1.bf16.msra.mxu1 %v3303_v0  ;;  %1860 = vmatprep.subr.bf16.mxu0 %v3308_v1  ;;  %v3398_v0 = vld [vmem:[#allocation2 + $0x40c] ss:$16 sps:$4 sm:$0xff]  }
  0xc8   :  { %1901 = vmatprep.subr.bf16.mxu1 %v3311_v2  ;;  %v3401_v1 = vld [vmem:[#allocation2 + $0x60c] ss:$16 sps:$4 sm:$0xff]   ;;  %v3396_v2 = vld [vmem:[#allocation2 + $0x408] ss:$16 sps:$4 sm:$0xff]  }
  0xca   :  { %1861 = vmatpush2.bf16.msra.mxu0 %v3306_v4  ;;  %v3399_v4 = vld [vmem:[#allocation2 + $0x608] ss:$16 sps:$4 sm:$0xff]  }
  0xcb   :  { %1902 = vmatpush2.bf16.msra.mxu1 %v3309_v5  ;;  %1862 = vmatprep.subr.bf16.mxu0 %v3314_v6  ;;  %v3404_v5 = vld [vmem:[#allocation2 + $0x5ec] ss:$16 sps:$4 sm:$0xff]  }
  0xcc   :  { %1903 = vmatprep.subr.bf16.mxu1 %v3317_v7  ;;  %v3407_v6 = vld [vmem:[#allocation2 + $0x7ec] ss:$16 sps:$4 sm:$0xff]   ;;  %v3402_v7 = vld [vmem:[#allocation2 + $0x5e8] ss:$16 sps:$4 sm:$0xff]  }
  0xce   :  { %1863 = vmatpush2.bf16.msra.mxu0 %v3312_v8  ;;  %v3405_v8 = vld [vmem:[#allocation2 + $0x7e8] ss:$16 sps:$4 sm:$0xff]  }
  0xcf   :  { %1904 = vmatpush2.bf16.msra.mxu1 %v3315_v9  ;;  %1864 = vmatprep.subr.bf16.mxu0 %v3320_v10  ;;  %v3410_v9 = vld [vmem:[#allocation2 + $0x5cc] ss:$16 sps:$4 sm:$0xff]  }
  0xd0   :  { %1905 = vmatprep.subr.bf16.mxu1 %v3323_v11  ;;  %v3413_v10 = vld [vmem:[#allocation2 + $0x7cc] ss:$16 sps:$4 sm:$0xff]   ;;  %v3408_v11 = vld [vmem:[#allocation2 + $0x5c8] ss:$16 sps:$4 sm:$0xff]  }
  0xd2   :  { %1865 = vmatpush2.bf16.msra.mxu0 %v3318_v12  ;;  %v3411_v12 = vld [vmem:[#allocation2 + $0x7c8] ss:$16 sps:$4 sm:$0xff]  }
  0xd3   :  { %1906 = vmatpush2.bf16.msra.mxu1 %v3321_v13  ;;  %1866 = vmatprep.subr.bf16.mxu0 %v3326_v14  ;;  %v3416_v13 = vld [vmem:[#allocation2 + $0x5ac] ss:$16 sps:$4 sm:$0xff]  }
  0xd4   :  { %1907 = vmatprep.subr.bf16.mxu1 %v3329_v15  ;;  %v3419_v14 = vld [vmem:[#allocation2 + $0x7ac] ss:$16 sps:$4 sm:$0xff]   ;;  %v3414_v15 = vld [vmem:[#allocation2 + $0x5a8] ss:$16 sps:$4 sm:$0xff]  }
  0xd6   :  { %1867 = vmatpush2.bf16.msra.mxu0 %v3324_v18  ;;  %v3417_v18 = vld [vmem:[#allocation2 + $0x7a8] ss:$16 sps:$4 sm:$0xff]  }
  0xd7   :  { %1908 = vmatpush2.bf16.msra.mxu1 %v3327_v19  ;;  %1868 = vmatprep.subr.bf16.mxu0 %v3332_v20  ;;  %v3422_v19 = vld [vmem:[#allocation2 + $0x58c] ss:$16 sps:$4 sm:$0xff]  }
  0xd8   :  { %1909 = vmatprep.subr.bf16.mxu1 %v3335_v21  ;;  %v3425_v20 = vld [vmem:[#allocation2 + $0x78c] ss:$16 sps:$4 sm:$0xff]   ;;  %v3420_v21 = vld [vmem:[#allocation2 + $0x588] ss:$16 sps:$4 sm:$0xff]  }
  0xda   :  { %1869 = vmatpush2.bf16.msra.mxu0 %v3330_v22  ;;  %v3423_v22 = vld [vmem:[#allocation2 + $0x788] ss:$16 sps:$4 sm:$0xff]  }
  0xdb   :  { %1910 = vmatpush2.bf16.msra.mxu1 %v3333_v23  ;;  %1870 = vmatprep.subr.bf16.mxu0 %v3338_v24  ;;  %v3428_v23 = vld [vmem:[#allocation2 + $0x56c] ss:$16 sps:$4 sm:$0xff]  }
  0xdc   :  { %1911 = vmatprep.subr.bf16.mxu1 %v3341_v25  ;;  %v3431_v24 = vld [vmem:[#allocation2 + $0x76c] ss:$16 sps:$4 sm:$0xff]   ;;  %v3426_v25 = vld [vmem:[#allocation2 + $0x568] ss:$16 sps:$4 sm:$0xff]  }
  0xde   :  { %1871 = vmatpush2.bf16.msra.mxu0 %v3336_v26  ;;  %v3429_v26 = vld [vmem:[#allocation2 + $0x768] ss:$16 sps:$4 sm:$0xff]  }
  0xdf   :  { %1912 = vmatpush2.bf16.msra.mxu1 %v3339_v27  ;;  %1872 = vmatprep.subr.bf16.mxu0 %v3344_v28  ;;  %v3434_v27 = vld [vmem:[#allocation2 + $0x54c] ss:$16 sps:$4 sm:$0xff]  }
  0xe0   :  { %1913 = vmatprep.subr.bf16.mxu1 %v3347_v29  ;;  %v3437_v28 = vld [vmem:[#allocation2 + $0x74c] ss:$16 sps:$4 sm:$0xff]   ;;  %v3432_v29 = vld [vmem:[#allocation2 + $0x548] ss:$16 sps:$4 sm:$0xff]  }
  0xe2   :  { %1873 = vmatpush2.bf16.msra.mxu0 %v3342_v30  ;;  %v3435_v30 = vld [vmem:[#allocation2 + $0x748] ss:$16 sps:$4 sm:$0xff]  }
  0xe3   :  { %1914 = vmatpush2.bf16.msra.mxu1 %v3345_v33  ;;  %1874 = vmatprep.subr.bf16.mxu0 %v3350_v34  ;;  %v3440_v33 = vld [vmem:[#allocation2 + $0x52c] ss:$16 sps:$4 sm:$0xff]  }
  0xe4   :  { %1915 = vmatprep.subr.bf16.mxu1 %v3353_v35  ;;  %v3443_v34 = vld [vmem:[#allocation2 + $0x72c] ss:$16 sps:$4 sm:$0xff]   ;;  %v3438_v35 = vld [vmem:[#allocation2 + $0x528] ss:$16 sps:$4 sm:$0xff]  }
  0xe6   :  { %1875 = vmatpush2.bf16.msra.mxu0 %v3348_v36  ;;  %v3441_v36 = vld [vmem:[#allocation2 + $0x728] ss:$16 sps:$4 sm:$0xff]  }
  0xe7   :  { %1916 = vmatpush2.bf16.msra.mxu1 %v3351_v37  ;;  %1926 = vmatprep.subr.bf16.mxu0 %v3356_v38  ;;  %v3446_v37 = vld [vmem:[#allocation2 + $0x50c] ss:$16 sps:$4 sm:$0xff]  }
  0xe8   :  { %1967 = vmatprep.subr.bf16.mxu1 %v3359_v39  ;;  %v3449_v38 = vld [vmem:[#allocation2 + $0x70c] ss:$16 sps:$4 sm:$0xff]   ;;  %v3444_v39 = vld [vmem:[#allocation2 + $0x508] ss:$16 sps:$4 sm:$0xff]  }
  0xe9   :  { %1877 = vmatmul.mubr.bf16.vlgmr.msra.gmra.mxu0 %v3705_v16  ;;  %v3372_v16 = vld [vmem:[#allocation2 + $0x488] ss:$16 sps:$4 sm:$0xff]  }
  0xea   :  { %1918 = vmatmul.mubr.bf16.vlgmr.msra.gmra.mxu1 %v3707_v17  ;;  %1927 = vmatpush1.bf16.msra.mxu0 %v3354_v40  ;;  %v3375_v17 = vld [vmem:[#allocation2 + $0x688] ss:$16 sps:$4 sm:$0xff]  }
  0xeb   :  { %1968 = vmatpush1.bf16.msra.mxu1 %v3357_v41  ;;  %1928 = vmatprep.subr.bf16.mxu0 %v3362_v42  ;;  %v3447_v40 = vld [vmem:[#allocation2 + $0x708] ss:$16 sps:$4 sm:$0xff]   ;;  %v3452_v41 = vld [vmem:[#allocation4 + $0x74] ss:$8 sps:$4 sm:$0xff]  }
  0xec   :  { %1969 = vmatprep.subr.bf16.mxu1 %v3365_v44  ;;  %1958 = vmatprep.mubr.bf16.mxu0 %v3722_v53  ;;  %v3389_v53 = vld [vmem:[#allocation2 + $0x64c] ss:$16 sps:$4 sm:$0xff]   ;;  %v3450_v42 = vld [vmem:[#allocation4 + $0x70] ss:$8 sps:$4 sm:$0xff]  }
  0xed   :  { %1999 = vmatprep.mubr.bf16.mxu1 %v3726_v57  ;;  %v3384_v57 = vld [vmem:[#allocation2 + $0x448] ss:$16 sps:$4 sm:$0xff]   ;;  %v3455_v44 = vld [vmem:[#allocation4 + $0x64] ss:$8 sps:$4 sm:$0xff]  }
  0xee   :  { %1929 = vmatpush1.bf16.msra.mxu0 %v3360_v45 }
  0xef   :  { %1970 = vmatpush1.bf16.msra.mxu1 %v3363_v46  ;;  %1930 = vmatprep.subr.bf16.mxu0 %v3368_v47  ;;  %v3453_v47 = vld [vmem:[#allocation4 + $0x60] ss:$8 sps:$4 sm:$0xff]  }
  0xf0   :  { %1971 = vmatprep.subr.bf16.mxu1 %v3371_v48 }
  0xf2   :  { %1931 = vmatpush1.bf16.msra.mxu0 %v3366_v50 }
  0xf3   :  { %1972 = vmatpush1.bf16.msra.mxu1 %v3369_v62  ;;  %1932 = vmatprep.subr.bf16.mxu0 %v3374_v3  ;;  %v3458_v62 = vld [vmem:[#allocation4 + $0x54] ss:$8 sps:$4 sm:$0xff]  }
  0xf4   :  { %1973 = vmatprep.subr.bf16.mxu1 %v3377_v51 }
  0xf6   :  { %1933 = vmatpush1.bf16.msra.mxu0 %v3372_v16  ;;  %v3456_v16 = vld [vmem:[#allocation4 + $0x50] ss:$8 sps:$4 sm:$0xff]  }
  0xf7   :  { %1974 = vmatpush1.bf16.msra.mxu1 %v3375_v17  ;;  %1934 = vmatprep.subr.bf16.mxu0 %v3380_v52 }
  0xf8   :  { %1975 = vmatprep.subr.bf16.mxu1 %v3383_v54  ;;  %v3461_v54 = vld [vmem:[#allocation4 + $0x44] ss:$8 sps:$4 sm:$0xff]  }
  0xfa   :  { %1935 = vmatpush1.bf16.msra.mxu0 %v3378_v55  ;;  %v3498_v55 = vld [vmem:[#allocation4 + $0x170] ss:$8 sps:$4 sm:$0xff]  }
  0xfb   :  { %1976 = vmatpush1.bf16.msra.mxu1 %v3381_v56  ;;  %1936 = vmatprep.subr.bf16.mxu0 %v3386_v58  ;;  %v3503_v56 = vld [vmem:[#allocation4 + $0x164] ss:$8 sps:$4 sm:$0xff]   ;;  %v3501_v58 = vld [vmem:[#allocation4 + $0x160] ss:$8 sps:$4 sm:$0xff]  }
  0xfc   :  { %1977 = vmatprep.subr.bf16.mxu1 %v3389_v53  ;;  %v3464_v53 = vld [vmem:[#allocation4 + $0x34] ss:$8 sps:$4 sm:$0xff]  }
  0xfe   :  { %1937 = vmatpush1.bf16.msra.mxu0 %v3384_v57  ;;  %v3506_v57 = vld [vmem:[#allocation4 + $0x154] ss:$8 sps:$4 sm:$0xff]  }
  0xff   :  { %1978 = vmatpush1.bf16.msra.mxu1 %v3387_v49  ;;  %1938 = vmatprep.subr.bf16.mxu0 %v3392_v59  ;;  %v3462_v49 = vld [vmem:[#allocation4 + $0x30] ss:$8 sps:$4 sm:$0xff]  }
 0x100   :  { %1979 = vmatprep.subr.bf16.mxu1 %v3395_v60  ;;  %v3504_v59 = vld [vmem:[#allocation4 + $0x150] ss:$8 sps:$4 sm:$0xff]   ;;  %v3467_v60 = vld [vmem:[#allocation4 + $0x24] ss:$8 sps:$4 sm:$0xff]  }
 0x102   :  { %1939 = vmatpush1.bf16.msra.mxu0 %v3390_v61  ;;  %v3509_v61 = vld [vmem:[#allocation4 + $0x144] ss:$8 sps:$4 sm:$0xff]  }
 0x103   :  { %1980 = vmatpush1.bf16.msra.mxu1 %v3393_v63  ;;  %1940 = vmatprep.subr.bf16.mxu0 %v3398_v0  ;;  %v3465_v63 = vld [vmem:[#allocation4 + $0x20] ss:$8 sps:$4 sm:$0xff]  }
 0x104   :  { %1981 = vmatprep.subr.bf16.mxu1 %v3401_v1  ;;  %v3507_v0 = vld [vmem:[#allocation4 + $0x140] ss:$8 sps:$4 sm:$0xff]   ;;  %v3470_v1 = vld [vmem:[#allocation4 + $0x14] ss:$8 sps:$4 sm:$0xff]  }
 0x106   :  { %1941 = vmatpush1.bf16.msra.mxu0 %v3396_v2  ;;  %v3512_v2 = vld [vmem:[#allocation4 + $0x134] ss:$8 sps:$4 sm:$0xff]  }
 0x107   :  { %1982 = vmatpush1.bf16.msra.mxu1 %v3399_v4  ;;  %1942 = vmatprep.subr.bf16.mxu0 %v3404_v5  ;;  %v3468_v4 = vld [vmem:[#allocation4 + $0x10] ss:$8 sps:$4 sm:$0xff]  }
 0x108   :  { %1983 = vmatprep.subr.bf16.mxu1 %v3407_v6  ;;  %v3510_v5 = vld [vmem:[#allocation4 + $0x130] ss:$8 sps:$4 sm:$0xff]   ;;  %v3473_v6 = vld [vmem:[#allocation4 + $0x4] ss:$8 sps:$4 sm:$0xff]  }
 0x10a   :  { %1943 = vmatpush2.bf16.msra.mxu0 %v3402_v7  ;;  %v3515_v7 = vld [vmem:[#allocation4 + $0x124] ss:$8 sps:$4 sm:$0xff]  }
 0x10b   :  { %1984 = vmatpush2.bf16.msra.mxu1 %v3405_v8  ;;  %1944 = vmatprep.subr.bf16.mxu0 %v3410_v9  ;;  %v3471_v8 = vld [vmem:[#allocation4] ss:$8 sps:$4 sm:$0xff]  }
 0x10c   :  { %1985 = vmatprep.subr.bf16.mxu1 %v3413_v10  ;;  %v3513_v9 = vld [vmem:[#allocation4 + $0x120] ss:$8 sps:$4 sm:$0xff]   ;;  %v3476_v10 = vld [vmem:[#allocation4 + $0xf4] ss:$8 sps:$4 sm:$0xff]  }
 0x10e   :  { %1945 = vmatpush2.bf16.msra.mxu0 %v3408_v11  ;;  %v3518_v11 = vld [vmem:[#allocation4 + $0x114] ss:$8 sps:$4 sm:$0xff]  }
 0x10f   :  { %1986 = vmatpush2.bf16.msra.mxu1 %v3411_v12  ;;  %1946 = vmatprep.subr.bf16.mxu0 %v3416_v13  ;;  %v3474_v12 = vld [vmem:[#allocation4 + $0xf0] ss:$8 sps:$4 sm:$0xff]  }
 0x110   :  { %1987 = vmatprep.subr.bf16.mxu1 %v3419_v14  ;;  %v3516_v13 = vld [vmem:[#allocation4 + $0x110] ss:$8 sps:$4 sm:$0xff]   ;;  %v3479_v14 = vld [vmem:[#allocation4 + $0xe4] ss:$8 sps:$4 sm:$0xff]  }
 0x112   :  { %1947 = vmatpush2.bf16.msra.mxu0 %v3414_v15  ;;  %v3521_v15 = vld [vmem:[#allocation4 + $0x104] ss:$8 sps:$4 sm:$0xff]  }
 0x113   :  { %1988 = vmatpush2.bf16.msra.mxu1 %v3417_v18  ;;  %1948 = vmatprep.subr.bf16.mxu0 %v3422_v19  ;;  %v3477_v18 = vld [vmem:[#allocation4 + $0xe0] ss:$8 sps:$4 sm:$0xff]  }
 0x114   :  { %1989 = vmatprep.subr.bf16.mxu1 %v3425_v20  ;;  %v3519_v19 = vld [vmem:[#allocation4 + $0x100] ss:$8 sps:$4 sm:$0xff]   ;;  %v3482_v20 = vld [vmem:[#allocation4 + $0xd4] ss:$8 sps:$4 sm:$0xff]  }
 0x116   :  { %1949 = vmatpush2.bf16.msra.mxu0 %v3420_v21  ;;  %v3524_v21 = vld [vmem:[#allocation4 + $0x1f4] ss:$8 sps:$4 sm:$0xff]  }
 0x117   :  { %1990 = vmatpush2.bf16.msra.mxu1 %v3423_v22  ;;  %1950 = vmatprep.subr.bf16.mxu0 %v3428_v23  ;;  %v3480_v22 = vld [vmem:[#allocation4 + $0xd0] ss:$8 sps:$4 sm:$0xff]  }
 0x118   :  { %1991 = vmatprep.subr.bf16.mxu1 %v3431_v24  ;;  %v3522_v23 = vld [vmem:[#allocation4 + $0x1f0] ss:$8 sps:$4 sm:$0xff]   ;;  %v3485_v24 = vld [vmem:[#allocation4 + $0xc4] ss:$8 sps:$4 sm:$0xff]  }
 0x11a   :  { %1951 = vmatpush2.bf16.msra.mxu0 %v3426_v25  ;;  %v3527_v25 = vld [vmem:[#allocation4 + $0x1e4] ss:$8 sps:$4 sm:$0xff]  }
 0x11b   :  { %1992 = vmatpush2.bf16.msra.mxu1 %v3429_v26  ;;  %1952 = vmatprep.subr.bf16.mxu0 %v3434_v27  ;;  %v3483_v26 = vld [vmem:[#allocation4 + $0xc0] ss:$8 sps:$4 sm:$0xff]  }
 0x11c   :  { %1993 = vmatprep.subr.bf16.mxu1 %v3437_v28  ;;  %v3525_v27 = vld [vmem:[#allocation4 + $0x1e0] ss:$8 sps:$4 sm:$0xff]   ;;  %v3488_v28 = vld [vmem:[#allocation4 + $0xb4] ss:$8 sps:$4 sm:$0xff]  }
 0x11e   :  { %1953 = vmatpush2.bf16.msra.mxu0 %v3432_v29  ;;  %v3530_v29 = vld [vmem:[#allocation4 + $0x1d4] ss:$8 sps:$4 sm:$0xff]  }
 0x11f   :  { %1994 = vmatpush2.bf16.msra.mxu1 %v3435_v30  ;;  %1954 = vmatprep.subr.bf16.mxu0 %v3440_v33  ;;  %v3486_v30 = vld [vmem:[#allocation4 + $0xb0] ss:$8 sps:$4 sm:$0xff]  }
 0x120   :  { %1995 = vmatprep.subr.bf16.mxu1 %v3443_v34  ;;  %v3528_v33 = vld [vmem:[#allocation4 + $0x1d0] ss:$8 sps:$4 sm:$0xff]   ;;  %v3491_v34 = vld [vmem:[#allocation4 + $0xa4] ss:$8 sps:$4 sm:$0xff]  }
 0x122   :  { %1955 = vmatpush2.bf16.msra.mxu0 %v3438_v35  ;;  %v3533_v35 = vld [vmem:[#allocation4 + $0x1c4] ss:$8 sps:$4 sm:$0xff]  }
 0x123   :  { %1996 = vmatpush2.bf16.msra.mxu1 %v3441_v36  ;;  %1956 = vmatprep.subr.bf16.mxu0 %v3446_v37  ;;  %v3489_v36 = vld [vmem:[#allocation4 + $0xa0] ss:$8 sps:$4 sm:$0xff]  }
 0x124   :  { %1997 = vmatprep.subr.bf16.mxu1 %v3449_v38  ;;  %v3531_v37 = vld [vmem:[#allocation4 + $0x1c0] ss:$8 sps:$4 sm:$0xff]   ;;  %v3494_v38 = vld [vmem:[#allocation4 + $0x94] ss:$8 sps:$4 sm:$0xff]  }
 0x126   :  { %1957 = vmatpush2.bf16.msra.mxu0 %v3444_v39  ;;  %v3536_v39 = vld [vmem:[#allocation4 + $0x1b4] ss:$8 sps:$4 sm:$0xff]  }
 0x127   :  { %1998 = vmatpush2.bf16.msra.mxu1 %v3447_v40  ;;  %2416 = vmatprep.subr.bf16.mxu0 %v3452_v41  ;;  %v382_v40 = vsub.s32 0, %v3689_v43  ;;  %v3760_v41 = vld [vmem:[%s3792_s2] sm:$0xf] }
 0x129   :  { %v3746_v45 = vpop.f32.mrf.mxu0  ;;  %1959 = vmatmul.mubr.bf16.vlgmr.msra.gmra.mxu0 %v3732_v31  ;;  %v3500_v31 = vld [vmem:[#allocation4 + $0x174] ss:$8 sps:$4 sm:$0xff]  }
 0x12a   :  { %v3748_v46 = vpop.f32.mrf.mxu1  ;;  %2000 = vmatmul.mubr.bf16.vlgmr.msra.gmra.mxu1 %v3736_v32  ;;  %2417 = vmatpush1.bf16.msra.mxu0 %v3450_v42  ;;  %v3459_v32 = vld [vmem:[#allocation4 + $0x40] ss:$8 sps:$4 sm:$0xff]   ;;  %v386_v42 = vsub.s32 1, %v3689_v43 }
 0x12b   :  { %v3752_v48 = vpop.f32.mrf.mxu0  ;;  %2418 = vmatprep.subr.bf16.mxu0 %v3455_v44  ;;  %2457 = vmatprep.subr.bf16.mxu1 %v3500_v31  ;;  %v3492_v44 = vld [vmem:[#allocation4 + $0x90] ss:$8 sps:$4 sm:$0xff]  }
 0x12c   :  { %v3754_v50 = vpop.f32.mrf.mxu1  ;;  %2458 = vmatpush1.bf16.msra.mxu1 %v3498_v55 }
 0x12d   :  { %v1718_v3 = vpop.f32.mrf.mxu0  ;;  %2459 = vmatprep.subr.bf16.mxu1 %v3503_v56  ;;  %v3539_v56 = vld [vmem:[#allocation4 + $0x1a4] ss:$8 sps:$4 sm:$0xff]  }
 0x12e   :  { %v1759_v51 = vpop.f32.mrf.mxu1  ;;  %2419 = vmatpush1.bf16.msra.mxu0 %v3453_v47  ;;  %v3534_v47 = vld [vmem:[#allocation4 + $0x1b0] ss:$8 sps:$4 sm:$0xff]   ;;  %v383_v3 = vrot.slane %v3760_v41, %v382_v40 }
 0x12f   :  { %v1719_v17 = vpop.f32.mrf.mxu0  ;;  %2420 = vmatprep.subr.bf16.mxu0 %v3458_v62  ;;  %v3497_v62 = vld [vmem:[#allocation4 + $0x84] ss:$8 sps:$4 sm:$0xff]   ;;  %v387_v51 = vrot.slane %v3760_v41, %v386_v42 }
 0x130   :  { %v1760_v52 = vpop.f32.mrf.mxu1  ;;  %2460 = vmatpush1.bf16.msra.mxu1 %v3501_v58  ;;  %v1715_v17 = vadd.f32 %v3746_v45, %v383_v3 }
 0x131   :  { %2461 = vmatprep.subr.bf16.mxu1 %v3506_v57  ;;  %v1717_v52 = vadd.f32 %v3752_v48, %v387_v51 }
 0x132   :  { %2421 = vmatpush1.bf16.msra.mxu0 %v3456_v16  ;;  %v3495_v16 = vld [vmem:[#allocation4 + $0x80] ss:$8 sps:$4 sm:$0xff]  }
 0x133   :  { %2422 = vmatprep.subr.bf16.mxu0 %v3461_v54  ;;  %v1756_v54 = vadd.f32 %v3748_v46, %v1715_v17 }
 0x134   :  { %2462 = vmatpush1.bf16.msra.mxu1 %v3504_v59 }
 0x135   :  { %2463 = vmatprep.subr.bf16.mxu1 %v3509_v61 }
 0x136   :  { %2423 = vmatpush1.bf16.msra.mxu0 %v3459_v32  ;;  %v1758_v32 = vadd.f32 %v3754_v50, %v1717_v52 }
 0x137   :  { %2424 = vmatprep.subr.bf16.mxu0 %v3464_v53  ;;  %v3537_v53 = vld [vmem:[#allocation4 + $0x1a0] ss:$8 sps:$4 sm:$0xff]  }
 0x138   :  { %2464 = vmatpush1.bf16.msra.mxu1 %v3507_v0 }
 0x139   :  { %2465 = vmatprep.subr.bf16.mxu1 %v3512_v2 }
 0x13a   :  { %2425 = vmatpush1.bf16.msra.mxu0 %v3462_v49 }
 0x13b   :  { %2426 = vmatprep.subr.bf16.mxu0 %v3467_v60 }
 0x13c   :  { %2466 = vmatpush1.bf16.msra.mxu1 %v3510_v5  ;;  %v3545_v5 = vld [vmem:[#allocation4 + $0x184] ss:$8 sps:$4 sm:$0xff]  }
 0x13d   :  { %2467 = vmatprep.subr.bf16.mxu1 %v3515_v7  ;;  %v3543_v7 = vld [vmem:[#allocation4 + $0x180] ss:$8 sps:$4 sm:$0xff]  }
 0x13e   :  { %2427 = vmatpush1.bf16.msra.mxu0 %v3465_v63  ;;  %v3542_v63 = vld [vmem:[#allocation4 + $0x194] ss:$8 sps:$4 sm:$0xff]  }
 0x13f   :  { %2428 = vmatprep.subr.bf16.mxu0 %v3470_v1  ;;  %v3540_v1 = vld [vmem:[#allocation4 + $0x190] ss:$8 sps:$4 sm:$0xff]  }
 0x140   :  { %2468 = vmatpush1.bf16.msra.mxu1 %v3513_v9 }
 0x141   :  { %2469 = vmatprep.subr.bf16.mxu1 %v3518_v11 }
 0x142   :  { %2429 = vmatpush1.bf16.msra.mxu0 %v3468_v4 }
 0x143   :  { %2430 = vmatprep.subr.bf16.mxu0 %v3473_v6 }
 0x144   :  { %2470 = vmatpush1.bf16.msra.mxu1 %v3516_v13 }
 0x145   :  { %2471 = vmatprep.subr.bf16.mxu1 %v3521_v15 }
 0x146   :  { %2431 = vmatpush1.bf16.msra.mxu0 %v3471_v8 }
 0x147   :  { %2432 = vmatprep.subr.bf16.mxu0 %v3476_v10 }
 0x148   :  { %2472 = vmatpush1.bf16.msra.mxu1 %v3519_v19 }
 0x149   :  { %2473 = vmatprep.subr.bf16.mxu1 %v3524_v21  ;;  %v3547_v21 = vld [vmem:[#allocation6 + $0x38] sm:$0xff]  }
 0x14a   :  { %2433 = vmatpush2.bf16.msra.mxu0 %v3474_v12 }
 0x14b   :  { %2434 = vmatprep.subr.bf16.mxu0 %v3479_v14 }
 0x14c   :  { %2474 = vmatpush2.bf16.msra.mxu1 %v3522_v23  ;;  %v3549_v23 = vld [vmem:[#allocation6 + $0x30] sm:$0xff]  }
 0x14d   :  { %2475 = vmatprep.subr.bf16.mxu1 %v3527_v25  ;;  %v3551_v25 = vld [vmem:[#allocation6 + $0x28] sm:$0xff]  }
 0x14e   :  { %2435 = vmatpush2.bf16.msra.mxu0 %v3477_v18 }
 0x14f   :  { %2436 = vmatprep.subr.bf16.mxu0 %v3482_v20  ;;  %v3546_v20 = vld [vmem:[#allocation6 + $0x78] sm:$0xff]  }
 0x150   :  { %2476 = vmatpush2.bf16.msra.mxu1 %v3525_v27  ;;  %v3553_v27 = vld [vmem:[#allocation6 + $0x20] sm:$0xff]  }
 0x151   :  { %2477 = vmatprep.subr.bf16.mxu1 %v3530_v29  ;;  %v3555_v29 = vld [vmem:[#allocation6 + $0x18] sm:$0xff]  }
 0x152   :  { %2437 = vmatpush2.bf16.msra.mxu0 %v3480_v22  ;;  %v3548_v22 = vld [vmem:[#allocation6 + $0x70] sm:$0xff]  }
 0x153   :  { %2438 = vmatprep.subr.bf16.mxu0 %v3485_v24  ;;  %v3550_v24 = vld [vmem:[#allocation6 + $0x68] sm:$0xff]  }
 0x154   :  { %2478 = vmatpush2.bf16.msra.mxu1 %v3528_v33  ;;  %v394_v33 = vsub.s32 3, %v3689_v43 }
 0x155   :  { %2479 = vmatprep.subr.bf16.mxu1 %v3533_v35 }
 0x156   :  { %2439 = vmatpush2.bf16.msra.mxu0 %v3483_v26  ;;  %v3552_v26 = vld [vmem:[#allocation6 + $0x60] sm:$0xff]   ;;  %v395_v35 = vrot.slane %v3760_v41, %v394_v33 }
 0x157   :  { %2440 = vmatprep.subr.bf16.mxu0 %v3488_v28  ;;  %v3554_v28 = vld [vmem:[#allocation6 + $0x58] sm:$0xff]  }
 0x158   :  { %2480 = vmatpush2.bf16.msra.mxu1 %v3531_v37 }
 0x159   :  { %2481 = vmatprep.subr.bf16.mxu1 %v3536_v39 }
 0x15a   :  { %2441 = vmatpush2.bf16.msra.mxu0 %v3486_v30  ;;  %v390_v30 = vsub.s32 2, %v3689_v43  ;;  %v3030_v43 = vld [vmem:[%s3796_s6] ss:$0 sm:$0xff] }
 0x15b   :  { %2442 = vmatprep.subr.bf16.mxu0 %v3491_v34 }
 0x15c   :  { %2482 = vmatpush2.bf16.msra.mxu1 %v3534_v47  ;;  %v391_v34 = vrot.slane %v3760_v41, %v390_v30 }
 0x15d   :  { %2483 = vmatprep.subr.bf16.mxu1 %v3539_v56 }
 0x15e   :  { %2443 = vmatpush2.bf16.msra.mxu0 %v3489_v36 }
 0x15f   :  { %2444 = vmatprep.subr.bf16.mxu0 %v3494_v38 }
 0x160   :  { %2484 = vmatpush2.bf16.msra.mxu1 %v3537_v53 }
 0x161   :  { %2485 = vmatprep.subr.bf16.mxu1 %v3542_v63  ;;  %v3558_v63 = vld [vmem:[#allocation6 + $0x48] sm:$0xff]  }
 0x162   :  { %2445 = vmatpush2.bf16.msra.mxu0 %v3492_v44 }
 0x163   :  { %2446 = vmatprep.subr.bf16.mxu0 %v3497_v62 }
 0x164   :  { %2486 = vmatpush2.bf16.msra.mxu1 %v3540_v1 }
 0x165   :  { %2487 = vmatprep.subr.bf16.mxu1 %v3545_v5 }
 0x166   :  { %2447 = vmatpush2.bf16.msra.mxu0 %v3495_v16 }
 0x167   :  { %3032 = vmatprep.subr.bf16.mxu0 %v3546_v20 }
 0x168   :  { %2488 = vmatpush2.bf16.msra.mxu1 %v3543_v7 }
 0x169   :  { %v1796_v55 = vpop.f32.mrf.mxu0 }
 0x16a   :  { %v1837_v31 = vpop.f32.mrf.mxu1  ;;  %v1797_v58 = vadd.f32 %v1796_v55, %v1756_v54 }
 0x16b   :  { %v1798_v57 = vpop.f32.mrf.mxu0 }
 0x16c   :  { %v1839_v49 = vpop.f32.mrf.mxu1  ;;  %v1838_v59 = vadd.f32 %v1837_v31, %v1797_v58  ;;  %v1799_v60 = vadd.f32 %v1798_v57, %v1758_v32 }
 0x16d   :  { %v1800_v61 = vpop.f32.mrf.mxu0 }
 0x16e   :  { %v1841_v45 = vpop.f32.mrf.mxu1  ;;  %v2008_v48 = vmul.f32 0.2, %v1838_v59  ;;  %v1840_v0 = vadd.f32 %v1839_v49, %v1799_v60  ;;  %v3557_v60 = vld [vmem:[#allocation6 + $0x10] sm:$0xff]  }
 0x16f   :  { %v1801_v46 = vpop.f32.mrf.mxu0 }
 0x170   :  { %v1842_v2 = vpop.f32.mrf.mxu1  ;;  %v2009_v4 = vmul.f32 0.2, %v1840_v0  ;;  %v2012_v50 = vmax.f32 %v1838_v59, %v2008_v48  ;;  %v3556_v59 = vld [vmem:[#allocation6 + $0x50] sm:$0xff]   ;;  %v3559_v48 = vld [vmem:[#allocation6 + $0x8] sm:$0xff]   ;;  %v3560_v46 = vld [vmem:[#allocation6 + $0x40] sm:$0xff]  }
 0x171   :  { %v3561_v2 = vld [vmem:[#allocation6] sm:$0xff]  }
 0x172   :  { %v2013_v6 = vmax.f32 %v1840_v0, %v2009_v4  ;;  %v2016_v9 = vpack.c.bf16 %v2012_v50, %v2012_v50  ;;  %v2084_v4 = vld [vmem:[%s3794_s4] sm:$0x3] }
 0x173   :  { %v2089_v50 = vrot.slane %v2084_v4, %v382_v40  ;;  %v2093_v5 = vrot.slane %v2084_v4, %v386_v42 }
 0x174   :  { %v2017_v8 = vpack.c.bf16 %v2013_v6, %v2013_v6 }
 0x176   :  { %2448 = vmatprep.mubr.bf16.mxu0 %v2017_v8 }
 0x177   :  { %2449 = vmatmul.mubr.bf16.vlgmr.msra.gmra.mxu0 %v2016_v9 }
 0x178   :  { %3033 = vmatpush3.bf16.msra.mxu0 %v3547_v21 }
 0x179   :  { %3034 = vmatprep.subr.bf16.mxu0 %v3548_v22 }
 0x17c   :  { %3035 = vmatpush3.bf16.msra.mxu0 %v3549_v23 }
 0x17d   :  { %3036 = vmatprep.subr.bf16.mxu0 %v3550_v24 }
 0x180   :  { %3037 = vmatpush3.bf16.msra.mxu0 %v3551_v25 }
 0x181   :  { %3038 = vmatprep.subr.bf16.mxu0 %v3552_v26 }
 0x184   :  { %3039 = vmatpush3.bf16.msra.mxu0 %v3553_v27 }
 0x185   :  { %3040 = vmatprep.subr.bf16.mxu0 %v3554_v28 }
 0x188   :  { %3041 = vmatpush3.bf16.msra.mxu0 %v3555_v29 }
 0x189   :  { %3042 = vmatprep.subr.bf16.mxu0 %v3556_v59 }
 0x18c   :  { %3043 = vmatpush3.bf16.msra.mxu0 %v3557_v60 }
 0x18d   :  { %3044 = vmatprep.subr.bf16.mxu0 %v3558_v63 }
 0x190   :  { %3045 = vmatpush3.bf16.msra.mxu0 %v3559_v48 }
 0x191   :  { %3046 = vmatprep.subr.bf16.mxu0 %v3560_v46 }
 0x194   :  { %3047 = vmatpush3.bf16.msra.mxu0 %v3561_v2 }
 0x1a9   :  { %v1878_v10 = vpop.f32.mrf.mxu0 }
 0x1aa   :  { %v1919_v11 = vpop.f32.mrf.mxu1  ;;  %v1879_v36 = vadd.f32 %v1878_v10, %v391_v34 }
 0x1ab   :  { %v1880_v12 = vpop.f32.mrf.mxu0 }
 0x1ac   :  { %v1921_v13 = vpop.f32.mrf.mxu1  ;;  %v1881_v37 = vadd.f32 %v1880_v12, %v395_v35  ;;  %v1920_v38 = vadd.f32 %v1919_v11, %v1879_v36 }
 0x1ad   :  { %v1882_v14 = vpop.f32.mrf.mxu0 }
 0x1ae   :  { %v1923_v15 = vpop.f32.mrf.mxu1  ;;  %v1922_v47 = vadd.f32 %v1921_v13, %v1881_v37 }
 0x1af   :  { %v1883_v18 = vpop.f32.mrf.mxu0 }
 0x1b0   :  { %v1924_v19 = vpop.f32.mrf.mxu1 }
 0x1e9   :  { %v1960_v39 = vpop.f32.mrf.mxu0 }
 0x1ea   :  { %v2001_v44 = vpop.f32.mrf.mxu1  ;;  %v1961_v62 = vadd.f32 %v1960_v39, %v1920_v38 }
 0x1eb   :  { %v1962_v3 = vpop.f32.mrf.mxu0 }
 0x1ec   :  { %v2003_v51 = vpop.f32.mrf.mxu1  ;;  %v2002_v16 = vadd.f32 %v2001_v44, %v1961_v62  ;;  %v1963_v17 = vadd.f32 %v1962_v3, %v1922_v47 }
 0x1ed   :  { %v1964_v52 = vpop.f32.mrf.mxu0 }
 0x1ee   :  { %v2005_v54 = vpop.f32.mrf.mxu1  ;;  %v2010_v55 = vmul.f32 0.2, %v2002_v16  ;;  %v2004_v31 = vadd.f32 %v2003_v51, %v1963_v17 }
 0x1ef   :  { %v1965_v56 = vpop.f32.mrf.mxu0 }
 0x1f0   :  { %v2006_v32 = vpop.f32.mrf.mxu1  ;;  %v2011_v58 = vmul.f32 0.2, %v2004_v31  ;;  %v2014_v53 = vmax.f32 %v2002_v16, %v2010_v55 }
 0x1f2   :  { %v2015_v41 = vmax.f32 %v2004_v31, %v2011_v58  ;;  %v2018_v49 = vpack.c.bf16 %v2014_v53, %v2014_v53 }
 0x1f4   :  { %v2019_v57 = vpack.c.bf16 %v2015_v41, %v2015_v41 }
 0x1f6   :  { %2489 = vmatprep.mubr.bf16.mxu1 %v2019_v57 }
 0x1f7   :  { %2490 = vmatmul.mubr.bf16.vlgmr.msra.gmra.mxu1 %v2018_v49 }
 0x237   :  { %v2450_v61 = vpop.f32.mrf.mxu0 }
 0x238   :  { %v2451_v6 = vadd.f32 %v2450_v61, %v2089_v50 }
 0x239   :  { %v2452_v45 = vpop.f32.mrf.mxu0 }
 0x23a   :  { %v2453_v8 = vadd.f32 %v2452_v45, %v2093_v5 }
 0x23b   :  { %v2454_v0 = vpop.f32.mrf.mxu0 }
 0x23d   :  { %v2455_v1 = vpop.f32.mrf.mxu0 }
 0x2b7   :  { %v2491_v7 = vpop.f32.mrf.mxu1 }
 0x2b8   :  { %v2492_v9 = vadd.f32 %v2491_v7, %v2451_v6 }
 0x2b9   :  { %v2493_v10 = vpop.f32.mrf.mxu1 }
 0x2ba   :  { %v2498_v11 = vmul.f32 0.2, %v2492_v9  ;;  %v2494_v12 = vadd.f32 %v2493_v10, %v2453_v8 }
 0x2bb   :  { %v2495_v13 = vpop.f32.mrf.mxu1 }
 0x2bc   :  { %v2499_v14 = vmul.f32 0.2, %v2494_v12  ;;  %v2500_v15 = vmax.f32 %v2492_v9, %v2498_v11 }
 0x2bd   :  { %v2496_v18 = vpop.f32.mrf.mxu1 }
 0x2be   :  { %v2501_v19 = vmax.f32 %v2494_v12, %v2499_v14  ;;  %v2502_v21 = vpack.c.bf16 %v2500_v15, %v2500_v15 }
 0x2c0   :  { %v2503_v20 = vpack.c.bf16 %v2501_v19, %v2501_v19 }
 0x2c2   :  { %2664 = vmatprep.mubr.bf16.mxu0 %v2503_v20 }
 0x2c3   :  { %2665 = vmatmul.mubr.bf16.vlgmr.msra.gmra.mxu0 %v2502_v21 }
 0x383   :  { %v3048_v40 = vpop.f32.mrf.mxu0 }
 0x385   :  { %v3049_v22 = vpop.f32.mrf.mxu0 }
 0x386   :  { %v3050_v42 = vadd.f32 %v3049_v22, %v3048_v40 }
 0x387   :  { %v3051_v23 = vpop.f32.mrf.mxu0 }
 0x388   :  { %v2679_v24 = vadd.f32 %v3050_v42, %v3030_v43 }
 0x389   :  { %v3052_v25 = vpop.f32.mrf.mxu0 }
 0x38a   :  { %v3031_v26 = vmul.f32 -1.442695, %v2679_v24 }
 0x38c   :  { %3562 = vpow2.f32 %v3031_v26 }
 0x399   :  { %v3563_v27 = vpop.eup %3562 }
 0x39a   :  { %v2683_v28 = vadd.f32 1.0, %v3563_v27 }
 0x39c   :  { %3564 = vrcp.f32 %v2683_v28 }
 0x3a9   :  { %v3565_v29 = vpop.eup %3564 }
 0x3aa   :  { %2687 = vst.msk [vmem:[%s3797_s7] sm:$0x3] %vm2686_vm0, %v3565_v29 }
 0x3ab   :  { %2692 = vsyncpa [#allocation3], 1 }
 0x3ac   :  { %2693 = vsyncpa [#allocation5], 1 }

// kernel: _forward.1
= control target key start
LH: loop header
LB: loop body
LE: loop exit
PB: predicated region body
PF: predicated region fallthrough
CT: control target
= control target key end

     0   :  { %12 = vsyncpa [#allocation3], 0  ;;  %s3790_s0 = inlined_call_operand.vmem [shape: f32[2,1024], index: 0, kind: input, shape index: {}]   ;;  %s3791_s1 = inlined_call_operand.hbm [shape: bf16[1024,512], index: 1, kind: input, shape index: {}]   ;;  %s3792_s2 = inlined_call_operand.vmem [shape: f32[1,512], index: 2, kind: input, shape index: {}]   ;;  %s3793_s3 = inlined_call_operand.hbm [shape: bf16[512,256], index: 3, kind: input, shape index: {}]   ;;  %s3794_s4 = inlined_call_operand.vmem [shape: f32[1,256], index: 4, kind: input, shape index: {}]   ;;  %s3795_s5 = inlined_call_operand.hbm [shape: bf16[256,128], index: 5, kind: input, shape index: {}]   ;;  %s3796_s6 = inlined_call_operand.vmem [shape: f32[1,128], index: 6, kind: input, shape index: {}]   ;;  %s3797_s7 = inlined_call_operand.vmem [shape: f32[2,1], index: 7, kind: output, shape index: {}]  }
   0x1   :  { %13 = vsyncpa [#allocation5], 0  ;;  %s3630_s24 = smov [#allocation4]  }
   0x2   :  { %s35_s25 = sshll.u32 %s3630_s24, 4  ;;  %s36_s25 = int_to_ptr.vmem [resolvable:$true] %s35_s25 }
   0x3   :  { %s3574_s26 = scalar_lea.vmem %s36_s25, 8192  ;;  %p3579_p1 = scmp.lt.s32.totalorder %s36_s25, %s36_s25 }
   0x4   :  { %p3575_p0 = scmp.ne.s32.totalorder %s36_s25, %s3574_s26  ;;  %p3580_p2 = scmp.lt.s32.totalorder %s3574_s26, %s3574_s26 }
   0x6   :  { %p3581_p3 = por %p3580_p2, %p3579_p1 }
   0x8   :  { %p3582_p4 = pnand %p3581_p3, %p3575_p0 }
   0xa   :  { %3585 = shalt.err (!%p3582_p4)
}
   0xb   :  { %s3631_s27 = smov 128   ;;  %s3632_s28 = smov 8  }
   0xc   :  { %41 = dma.hbm_to_vmem [thread:$0]  %s3793_s3, 8192, %s36_s25, [#allocation5], %s3631_s27, %s3631_s27, %s3632_s28  }
   0xd   :  { %s3633_s8 = smov [#allocation2]  }
   0xe   :  { %s21_s9 = sshll.u32 %s3633_s8, 4  ;;  %s22_s9 = int_to_ptr.vmem [resolvable:$true] %s21_s9 }
   0xf   :  { %s3594_s10 = scalar_lea.vmem %s22_s9, 32768  ;;  %p3599_p6 = scmp.lt.s32.totalorder %s22_s9, %s22_s9 }
  0x10   :  { %p3595_p5 = scmp.ne.s32.totalorder %s22_s9, %s3594_s10  ;;  %p3600_p7 = scmp.lt.s32.totalorder %s3594_s10, %s3594_s10 }
  0x12   :  { %p3601_p8 = por %p3600_p7, %p3599_p6 }
  0x14   :  { %p3602_p9 = pnand %p3601_p8, %p3595_p5 }
  0x16   :  { %3605 = shalt.err (!%p3602_p9)
}
  0x17   :  { %s3634_s11 = smov 256   ;;  %s3635_s12 = smov 16  }
  0x18   :  { %27 = dma.hbm_to_vmem [thread:$0]  %s3791_s1, 32768, %s22_s9, [#allocation3], %s3634_s11, %s3634_s11, %s3635_s12  }
  0x19   :  { %s3636_s15 = smov [#allocation6]  }
  0x1a   :  { %s49_s16 = sshll.u32 %s3636_s15, 4  ;;  %s50_s16 = int_to_ptr.vmem [resolvable:$true] %s49_s16 }
  0x1b   :  { %s3614_s3 = scalar_lea.vmem %s50_s16, 2048  ;;  %p3619_p11 = scmp.lt.s32.totalorder %s50_s16, %s50_s16 }
  0x1c   :  { %p3615_p10 = scmp.ne.s32.totalorder %s50_s16, %s3614_s3  ;;  %p3620_p12 = scmp.lt.s32.totalorder %s3614_s3, %s3614_s3 }
  0x1e   :  { %p3621_p13 = por %p3620_p12, %p3619_p11 }
  0x20   :  { %p3622_p0 = pnand %p3621_p13, %p3615_p10 }
  0x22   :  { %3625 = shalt.err (!%p3622_p0)
}
  0x23   :  { %s3637_s17 = smov 64   ;;  %s3638_s18 = smov 4  }
  0x24   :  { %55 = dma.hbm_to_vmem [thread:$0]  %s3795_s5, 2048, %s50_s16, [#allocation5], %s3637_s17, %s3637_s17, %s3638_s18  }
  0x25   :  { %3626 = dma.done.wait [#allocation3], 32768  }
  0x26   :  { %3627 = vsyncadd [#allocation3], 4294934528 }
  0x27   :  { %3628 = dma.done.wait [#allocation5], 10240  }
  0x28   :  { %3629 = vsyncadd [#allocation5], 4294957056  ;;  %v3064_v0 = vld [vmem:[#allocation2 + $0xe4] ss:$16 sps:$4 sm:$0xff]   ;;  %v3068_v2 = vld [vmem:[#allocation2 + $0xe0] ss:$16 sps:$4 sm:$0xff]   ;;  %v76_v38 = vlaneseq }
  0x29   :  { %v3066_v1 = vld [vmem:[#allocation2 + $0x2e4] ss:$16 sps:$4 sm:$0xff]   ;;  %1680 = vmatprep.subr.bf16.mxu0 %v3064_v0  ;;  %v3069_v3 = vld [vmem:[#allocation2 + $0x2e0] ss:$16 sps:$4 sm:$0xff]   ;;  %v3639_v36 = vmov 1983009808  }
  0x2a   :  { %1721 = vmatprep.subr.bf16.mxu1 %v3066_v1  ;;  %v3070_v4 = vld [vmem:[#allocation2 + $0xc4] ss:$16 sps:$4 sm:$0xff]   ;;  %1681 = vmatpush1.bf16.msra.mxu0 %v3068_v2  ;;  %v3074_v6 = vld [vmem:[#allocation2 + $0xc0] ss:$16 sps:$4 sm:$0xff]   ;;  %v74_v37 = vunpack.c.l.s4 %v3639_v36  ;;  %v3689_v43 = vshrl.u32 %v76_v38, 7  ;;  %vm2686_vm0 = vcmask 1024  }
  0x2b   :  { %1722 = vmatpush1.bf16.msra.mxu1 %v3069_v3  ;;  %v3072_v5 = vld [vmem:[#allocation2 + $0x2c4] ss:$16 sps:$4 sm:$0xff]   ;;  %1682 = vmatprep.subr.bf16.mxu0 %v3070_v4  ;;  %v3075_v7 = vld [vmem:[#allocation2 + $0x2c0] ss:$16 sps:$4 sm:$0xff]  }
  0x2c   :  { %1723 = vmatprep.subr.bf16.mxu1 %v3072_v5  ;;  %v3076_v8 = vld [vmem:[#allocation2 + $0xa4] ss:$16 sps:$4 sm:$0xff]   ;;  %v3080_v10 = vld [vmem:[#allocation2 + $0xa0] ss:$16 sps:$4 sm:$0xff]   ;;  %v75_v42 = vunpack.c.0.s8 %v74_v37 }
  0x2d   :  { %v3078_v9 = vld [vmem:[#allocation2 + $0x2a4] ss:$16 sps:$4 sm:$0xff]   ;;  %v3081_v11 = vld [vmem:[#allocation2 + $0x2a0] ss:$16 sps:$4 sm:$0xff]  }
  0x2e   :  { %1683 = vmatpush1.bf16.msra.mxu0 %v3074_v6  ;;  %v3082_v12 = vld [vmem:[#allocation2 + $0x84] ss:$16 sps:$4 sm:$0xff]   ;;  %v3086_v14 = vld [vmem:[#allocation2 + $0x80] ss:$16 sps:$4 sm:$0xff]   ;;  %v3692_v49 = vsub.s32 %v75_v42, %v3689_v43  ;;  %v69_v42 = vld [vmem:[%s3790_s0 + $0x8] sm:$0xff] }
  0x2f   :  { %1724 = vmatpush1.bf16.msra.mxu1 %v3075_v7  ;;  %1684 = vmatprep.subr.bf16.mxu0 %v3076_v8  ;;  %v3084_v13 = vld [vmem:[#allocation2 + $0x284] ss:$16 sps:$4 sm:$0xff]   ;;  %v3087_v15 = vld [vmem:[#allocation2 + $0x280] ss:$16 sps:$4 sm:$0xff]  }
  0x30   :  { %1725 = vmatprep.subr.bf16.mxu1 %v3078_v9  ;;  %v3088_v16 = vld [vmem:[#allocation2 + $0x64] ss:$16 sps:$4 sm:$0xff]   ;;  %v3092_v18 = vld [vmem:[#allocation2 + $0x60] ss:$16 sps:$4 sm:$0xff]  }
  0x31   :  { %v3090_v17 = vld [vmem:[#allocation2 + $0x264] ss:$16 sps:$4 sm:$0xff]   ;;  %v3093_v19 = vld [vmem:[#allocation2 + $0x260] ss:$16 sps:$4 sm:$0xff]  }
  0x32   :  { %1685 = vmatpush1.bf16.msra.mxu0 %v3080_v10  ;;  %v3094_v20 = vld [vmem:[#allocation2 + $0x44] ss:$16 sps:$4 sm:$0xff]   ;;  %v3098_v22 = vld [vmem:[#allocation2 + $0x40] ss:$16 sps:$4 sm:$0xff]  }
  0x33   :  { %1726 = vmatpush1.bf16.msra.mxu1 %v3081_v11  ;;  %1686 = vmatprep.subr.bf16.mxu0 %v3082_v12  ;;  %v3096_v21 = vld [vmem:[#allocation2 + $0x244] ss:$16 sps:$4 sm:$0xff]   ;;  %v3099_v23 = vld [vmem:[#allocation2 + $0x240] ss:$16 sps:$4 sm:$0xff]  }
  0x34   :  { %1727 = vmatprep.subr.bf16.mxu1 %v3084_v13  ;;  %v3100_v24 = vld [vmem:[#allocation2 + $0x24] ss:$16 sps:$4 sm:$0xff]   ;;  %v3104_v26 = vld [vmem:[#allocation2 + $0x20] ss:$16 sps:$4 sm:$0xff]  }
  0x35   :  { %v3102_v25 = vld [vmem:[#allocation2 + $0x224] ss:$16 sps:$4 sm:$0xff]   ;;  %v3105_v27 = vld [vmem:[#allocation2 + $0x220] ss:$16 sps:$4 sm:$0xff]  }
  0x36   :  { %1687 = vmatpush1.bf16.msra.mxu0 %v3086_v14  ;;  %v3106_v28 = vld [vmem:[#allocation2 + $0x4] ss:$16 sps:$4 sm:$0xff]   ;;  %v3110_v30 = vld [vmem:[#allocation2] ss:$16 sps:$4 sm:$0xff]  }
  0x37   :  { %1728 = vmatpush1.bf16.msra.mxu1 %v3087_v15  ;;  %1688 = vmatprep.subr.bf16.mxu0 %v3088_v16  ;;  %v3108_v29 = vld [vmem:[#allocation2 + $0x204] ss:$16 sps:$4 sm:$0xff]   ;;  %v3111_v31 = vld [vmem:[#allocation2 + $0x200] ss:$16 sps:$4 sm:$0xff]  }
  0x38   :  { %1729 = vmatprep.subr.bf16.mxu1 %v3090_v17  ;;  %v3112_v32 = vld [vmem:[#allocation2 + $0x1e4] ss:$16 sps:$4 sm:$0xff]   ;;  %v3116_v34 = vld [vmem:[#allocation2 + $0x1e0] ss:$16 sps:$4 sm:$0xff]  }
  0x39   :  { %v3114_v33 = vld [vmem:[#allocation2 + $0x3e4] ss:$16 sps:$4 sm:$0xff]   ;;  %v3117_v35 = vld [vmem:[#allocation2 + $0x3e0] ss:$16 sps:$4 sm:$0xff]  }
  0x3a   :  { %1689 = vmatpush1.bf16.msra.mxu0 %v3092_v18  ;;  %v3118_v39 = vld [vmem:[#allocation2 + $0x1c4] ss:$16 sps:$4 sm:$0xff]   ;;  %v3122_v41 = vld [vmem:[#allocation2 + $0x1c0] ss:$16 sps:$4 sm:$0xff]  }
  0x3b   :  { %1730 = vmatpush1.bf16.msra.mxu1 %v3093_v19  ;;  %1690 = vmatprep.subr.bf16.mxu0 %v3094_v20  ;;  %v3120_v40 = vld [vmem:[#allocation2 + $0x3c4] ss:$16 sps:$4 sm:$0xff]   ;;  %v3123_v44 = vld [vmem:[#allocation2 + $0x3c0] ss:$16 sps:$4 sm:$0xff]  }
  0x3c   :  { %1731 = vmatprep.subr.bf16.mxu1 %v3096_v21  ;;  %v3124_v45 = vld [vmem:[#allocation2 + $0x1a4] ss:$16 sps:$4 sm:$0xff]   ;;  %v3128_v47 = vld [vmem:[#allocation2 + $0x1a0] ss:$16 sps:$4 sm:$0xff]  }
  0x3d   :  { %v3126_v46 = vld [vmem:[#allocation2 + $0x3a4] ss:$16 sps:$4 sm:$0xff]   ;;  %v3129_v48 = vld [vmem:[#allocation2 + $0x3a0] ss:$16 sps:$4 sm:$0xff]  }
  0x3e   :  { %1691 = vmatpush1.bf16.msra.mxu0 %v3098_v22  ;;  %v3130_v50 = vld [vmem:[#allocation2 + $0x184] ss:$16 sps:$4 sm:$0xff]   ;;  %v3134_v53 = vld [vmem:[#allocation2 + $0x180] ss:$16 sps:$4 sm:$0xff]  }
  0x3f   :  { %1732 = vmatpush1.bf16.msra.mxu1 %v3099_v23  ;;  %1692 = vmatprep.subr.bf16.mxu0 %v3100_v24  ;;  %v3132_v51 = vld [vmem:[#allocation2 + $0x384] ss:$16 sps:$4 sm:$0xff]   ;;  %v3135_v56 = vld [vmem:[#allocation2 + $0x380] ss:$16 sps:$4 sm:$0xff]  }
  0x40   :  { %1733 = vmatprep.subr.bf16.mxu1 %v3102_v25  ;;  %v68_v52 = vld [vmem:[%s3790_s0] sm:$0xff] }
  0x41   :  { %v79_v54 = vrot.slane %v68_v52, %v3692_v49  ;;  %v72_v55 = vcombine.high %v68_v52, %v68_v52  ;;  %v3136_v57 = vld [vmem:[#allocation2 + $0x164] ss:$16 sps:$4 sm:$0xff]   ;;  %v3140_v61 = vld [vmem:[#allocation2 + $0x160] ss:$16 sps:$4 sm:$0xff]  }
  0x42   :  { %1693 = vmatpush1.bf16.msra.mxu0 %v3104_v26  ;;  %v3138_v58 = vld [vmem:[#allocation2 + $0x364] ss:$16 sps:$4 sm:$0xff]   ;;  %v3141_v0 = vld [vmem:[#allocation2 + $0x360] ss:$16 sps:$4 sm:$0xff]  }
  0x43   :  { %1734 = vmatpush1.bf16.msra.mxu1 %v3105_v27  ;;  %1694 = vmatprep.subr.bf16.mxu0 %v3106_v28  ;;  %v87_v59 = vcombine.high %v79_v54, %v79_v54  ;;  %v86_v60 = vrot.slane %v72_v55, %v3692_v49  ;;  %v3142_v1 = vld [vmem:[#allocation2 + $0x144] ss:$16 sps:$4 sm:$0xff]   ;;  %v3146_v4 = vld [vmem:[#allocation2 + $0x140] ss:$16 sps:$4 sm:$0xff]   ;;  %v3705_v16 = vpack.c.bf16 %v79_v54, %v79_v54 }
  0x44   :  { %1735 = vmatprep.subr.bf16.mxu1 %v3108_v29  ;;  %v3144_v2 = vld [vmem:[#allocation2 + $0x344] ss:$16 sps:$4 sm:$0xff]   ;;  %v3147_v5 = vld [vmem:[#allocation2 + $0x340] ss:$16 sps:$4 sm:$0xff]  }
  0x45   :  { %v3699_v62 = vpack.c.bf16 %v87_v59, %v87_v59  ;;  %v88_v63 = vcombine.high %v86_v60, %v86_v60  ;;  %v3148_v6 = vld [vmem:[#allocation2 + $0x124] ss:$16 sps:$4 sm:$0xff]   ;;  %v3152_v8 = vld [vmem:[#allocation2 + $0x120] ss:$16 sps:$4 sm:$0xff]   ;;  %v3707_v17 = vpack.c.bf16 %v86_v60, %v86_v60 }
  0x46   :  { %1695 = vmatpush1.bf16.msra.mxu0 %v3110_v30  ;;  %v3150_v7 = vld [vmem:[#allocation2 + $0x324] ss:$16 sps:$4 sm:$0xff]   ;;  %v3153_v9 = vld [vmem:[#allocation2 + $0x320] ss:$16 sps:$4 sm:$0xff]  }
  0x47   :  { %1736 = vmatpush1.bf16.msra.mxu1 %v3111_v31  ;;  %1696 = vmatprep.subr.bf16.mxu0 %v3112_v32  ;;  %v3701_v3 = vpack.c.bf16 %v88_v63, %v88_v63  ;;  %v3154_v10 = vld [vmem:[#allocation2 + $0x104] ss:$16 sps:$4 sm:$0xff]   ;;  %v3158_v12 = vld [vmem:[#allocation2 + $0x100] ss:$16 sps:$4 sm:$0xff]  }
  0x48   :  { %1737 = vmatprep.subr.bf16.mxu1 %v3114_v33  ;;  %1712 = vmatprep.mubr.bf16.mxu0 %v3699_v62  ;;  %v3156_v11 = vld [vmem:[#allocation2 + $0x304] ss:$16 sps:$4 sm:$0xff]   ;;  %v3159_v13 = vld [vmem:[#allocation2 + $0x300] ss:$16 sps:$4 sm:$0xff]  }
  0x49   :  { %1753 = vmatprep.mubr.bf16.mxu1 %v3701_v3  ;;  %v3163_v14 = vld [vmem:[#allocation2 + $0x4e4] ss:$16 sps:$4 sm:$0xff]   ;;  %v3161_v18 = vld [vmem:[#allocation2 + $0x4e0] ss:$16 sps:$4 sm:$0xff]  }
  0x4a   :  { %1697 = vmatpush2.bf16.msra.mxu0 %v3116_v34  ;;  %v3166_v15 = vld [vmem:[#allocation2 + $0x6e4] ss:$16 sps:$4 sm:$0xff]   ;;  %v3164_v19 = vld [vmem:[#allocation2 + $0x6e0] ss:$16 sps:$4 sm:$0xff]  }
  0x4b   :  { %1738 = vmatpush2.bf16.msra.mxu1 %v3117_v35  ;;  %1698 = vmatprep.subr.bf16.mxu0 %v3118_v39  ;;  %v3169_v20 = vld [vmem:[#allocation2 + $0x4c4] ss:$16 sps:$4 sm:$0xff]   ;;  %v3167_v22 = vld [vmem:[#allocation2 + $0x4c0] ss:$16 sps:$4 sm:$0xff]  }
  0x4c   :  { %1739 = vmatprep.subr.bf16.mxu1 %v3120_v40  ;;  %v3172_v21 = vld [vmem:[#allocation2 + $0x6c4] ss:$16 sps:$4 sm:$0xff]   ;;  %v3170_v23 = vld [vmem:[#allocation2 + $0x6c0] ss:$16 sps:$4 sm:$0xff]  }
  0x4d   :  { %v3175_v24 = vld [vmem:[#allocation2 + $0x4a4] ss:$16 sps:$4 sm:$0xff]   ;;  %v3173_v26 = vld [vmem:[#allocation2 + $0x4a0] ss:$16 sps:$4 sm:$0xff]  }
  0x4e   :  { %1699 = vmatpush2.bf16.msra.mxu0 %v3122_v41  ;;  %v3178_v25 = vld [vmem:[#allocation2 + $0x6a4] ss:$16 sps:$4 sm:$0xff]   ;;  %v3176_v27 = vld [vmem:[#allocation2 + $0x6a0] ss:$16 sps:$4 sm:$0xff]  }
  0x4f   :  { %1740 = vmatpush2.bf16.msra.mxu1 %v3123_v44  ;;  %1700 = vmatprep.subr.bf16.mxu0 %v3124_v45  ;;  %v3181_v28 = vld [vmem:[#allocation2 + $0x484] ss:$16 sps:$4 sm:$0xff]   ;;  %v3179_v30 = vld [vmem:[#allocation2 + $0x480] ss:$16 sps:$4 sm:$0xff]   ;;  %v3715_v44 = vrot.slane %v69_v42, %v3692_v49  ;;  %v89_v45 = vcombine.high %v69_v42, %v69_v42  ;;  %v3273_v42 = vld [vmem:[#allocation2 + $0x2a8] ss:$16 sps:$4 sm:$0xff]  }
  0x50   :  { %1741 = vmatprep.subr.bf16.mxu1 %v3126_v46  ;;  %v3184_v29 = vld [vmem:[#allocation2 + $0x684] ss:$16 sps:$4 sm:$0xff]   ;;  %v3182_v31 = vld [vmem:[#allocation2 + $0x680] ss:$16 sps:$4 sm:$0xff]  }
  0x51   :  { %v3187_v32 = vld [vmem:[#allocation2 + $0x464] ss:$16 sps:$4 sm:$0xff]   ;;  %v3185_v34 = vld [vmem:[#allocation2 + $0x460] ss:$16 sps:$4 sm:$0xff]  }
  0x52   :  { %1701 = vmatpush2.bf16.msra.mxu0 %v3128_v47  ;;  %v3190_v33 = vld [vmem:[#allocation2 + $0x664] ss:$16 sps:$4 sm:$0xff]   ;;  %v3188_v35 = vld [vmem:[#allocation2 + $0x660] ss:$16 sps:$4 sm:$0xff]  }
  0x53   :  { %1742 = vmatpush2.bf16.msra.mxu1 %v3129_v48  ;;  %1702 = vmatprep.subr.bf16.mxu0 %v3130_v50  ;;  %v3193_v36 = vld [vmem:[#allocation2 + $0x444] ss:$16 sps:$4 sm:$0xff]   ;;  %v3191_v38 = vld [vmem:[#allocation2 + $0x440] ss:$16 sps:$4 sm:$0xff]   ;;  %v104_v48 = vcombine.high %v3715_v44, %v3715_v44  ;;  %v3720_v50 = vrot.slane %v89_v45, %v3692_v49  ;;  %v3281_v45 = vld [vmem:[#allocation2 + $0x28c] ss:$16 sps:$4 sm:$0xff]  }
  0x54   :  { %1743 = vmatprep.subr.bf16.mxu1 %v3132_v51  ;;  %v3196_v37 = vld [vmem:[#allocation2 + $0x644] ss:$16 sps:$4 sm:$0xff]   ;;  %v3194_v39 = vld [vmem:[#allocation2 + $0x640] ss:$16 sps:$4 sm:$0xff]  }
  0x55   :  { %v3199_v40 = vld [vmem:[#allocation2 + $0x424] ss:$16 sps:$4 sm:$0xff]   ;;  %v3197_v46 = vld [vmem:[#allocation2 + $0x420] ss:$16 sps:$4 sm:$0xff]   ;;  %v105_v54 = vcombine.high %v3720_v50, %v3720_v50 }
  0x56   :  { %1703 = vmatpush2.bf16.msra.mxu0 %v3134_v53  ;;  %v3202_v41 = vld [vmem:[#allocation2 + $0x624] ss:$16 sps:$4 sm:$0xff]   ;;  %v3200_v47 = vld [vmem:[#allocation2 + $0x620] ss:$16 sps:$4 sm:$0xff]   ;;  %v3722_v53 = vpack.c.bf16 %v104_v48, %v104_v48  ;;  %v3284_v48 = vld [vmem:[#allocation2 + $0x6c] ss:$16 sps:$4 sm:$0xff]  }
  0x57   :  { %1744 = vmatpush2.bf16.msra.mxu1 %v3135_v56  ;;  %1704 = vmatprep.subr.bf16.mxu0 %v3136_v57  ;;  %v3205_v51 = vld [vmem:[#allocation2 + $0x404] ss:$16 sps:$4 sm:$0xff]   ;;  %v3203_v55 = vld [vmem:[#allocation2 + $0x400] ss:$16 sps:$4 sm:$0xff]   ;;  %v3726_v57 = vpack.c.bf16 %v105_v54, %v105_v54  ;;  %v3288_v54 = vld [vmem:[#allocation2 + $0x48] ss:$16 sps:$4 sm:$0xff]  }
  0x58   :  { %1745 = vmatprep.subr.bf16.mxu1 %v3138_v58  ;;  %v3208_v52 = vld [vmem:[#allocation2 + $0x604] ss:$16 sps:$4 sm:$0xff]   ;;  %v3206_v56 = vld [vmem:[#allocation2 + $0x600] ss:$16 sps:$4 sm:$0xff]  }
  0x59   :  { %v3211_v58 = vld [vmem:[#allocation2 + $0x5e4] ss:$16 sps:$4 sm:$0xff]   ;;  %v3209_v59 = vld [vmem:[#allocation2 + $0x5e0] ss:$16 sps:$4 sm:$0xff]  }
  0x5a   :  { %1705 = vmatpush2.bf16.msra.mxu0 %v3140_v61  ;;  %v3214_v49 = vld [vmem:[#allocation2 + $0x7e4] ss:$16 sps:$4 sm:$0xff]   ;;  %v3212_v60 = vld [vmem:[#allocation2 + $0x7e0] ss:$16 sps:$4 sm:$0xff]  }
  0x5b   :  { %1746 = vmatpush2.bf16.msra.mxu1 %v3141_v0  ;;  %1706 = vmatprep.subr.bf16.mxu0 %v3142_v1  ;;  %v3217_v61 = vld [vmem:[#allocation2 + $0x5c4] ss:$16 sps:$4 sm:$0xff]   ;;  %v3215_v0 = vld [vmem:[#allocation2 + $0x5c0] ss:$16 sps:$4 sm:$0xff]  }
  0x5c   :  { %1747 = vmatprep.subr.bf16.mxu1 %v3144_v2  ;;  %v3220_v63 = vld [vmem:[#allocation2 + $0x7c4] ss:$16 sps:$4 sm:$0xff]   ;;  %v3218_v1 = vld [vmem:[#allocation2 + $0x7c0] ss:$16 sps:$4 sm:$0xff]  }
  0x5d   :  { %v3223_v2 = vld [vmem:[#allocation2 + $0x5a4] ss:$16 sps:$4 sm:$0xff]  }
  0x5e   :  { %1707 = vmatpush2.bf16.msra.mxu0 %v3146_v4  ;;  %v3226_v4 = vld [vmem:[#allocation2 + $0x7a4] ss:$16 sps:$4 sm:$0xff]  }
  0x5f   :  { %1748 = vmatpush2.bf16.msra.mxu1 %v3147_v5  ;;  %1708 = vmatprep.subr.bf16.mxu0 %v3148_v6  ;;  %v3221_v5 = vld [vmem:[#allocation2 + $0x5a0] ss:$16 sps:$4 sm:$0xff]  }
  0x60   :  { %1749 = vmatprep.subr.bf16.mxu1 %v3150_v7  ;;  %v3224_v6 = vld [vmem:[#allocation2 + $0x7a0] ss:$16 sps:$4 sm:$0xff]   ;;  %v3229_v7 = vld [vmem:[#allocation2 + $0x584] ss:$16 sps:$4 sm:$0xff]  }
  0x62   :  { %1709 = vmatpush2.bf16.msra.mxu0 %v3152_v8  ;;  %v3232_v8 = vld [vmem:[#allocation2 + $0x784] ss:$16 sps:$4 sm:$0xff]  }
  0x63   :  { %1750 = vmatpush2.bf16.msra.mxu1 %v3153_v9  ;;  %1710 = vmatprep.subr.bf16.mxu0 %v3154_v10  ;;  %v3227_v9 = vld [vmem:[#allocation2 + $0x580] ss:$16 sps:$4 sm:$0xff]  }
  0x64   :  { %1751 = vmatprep.subr.bf16.mxu1 %v3156_v11  ;;  %v3230_v10 = vld [vmem:[#allocation2 + $0x780] ss:$16 sps:$4 sm:$0xff]   ;;  %v3235_v11 = vld [vmem:[#allocation2 + $0x564] ss:$16 sps:$4 sm:$0xff]  }
  0x66   :  { %1711 = vmatpush2.bf16.msra.mxu0 %v3158_v12  ;;  %v3238_v12 = vld [vmem:[#allocation2 + $0x764] ss:$16 sps:$4 sm:$0xff]  }
  0x67   :  { %1752 = vmatpush2.bf16.msra.mxu1 %v3159_v13  ;;  %1762 = vmatprep.subr.bf16.mxu0 %v3163_v14  ;;  %v3233_v13 = vld [vmem:[#allocation2 + $0x560] ss:$16 sps:$4 sm:$0xff]  }
  0x68   :  { %1803 = vmatprep.subr.bf16.mxu1 %v3166_v15  ;;  %v3236_v14 = vld [vmem:[#allocation2 + $0x760] ss:$16 sps:$4 sm:$0xff]   ;;  %v3241_v15 = vld [vmem:[#allocation2 + $0x544] ss:$16 sps:$4 sm:$0xff]  }
  0x69   :  { %1713 = vmatmul.mubr.bf16.vlgmr.msra.gmra.mxu0 %v3705_v16 }
  0x6a   :  { %1754 = vmatmul.mubr.bf16.vlgmr.msra.gmra.mxu1 %v3707_v17  ;;  %1763 = vmatpush1.bf16.msra.mxu0 %v3161_v18  ;;  %v3244_v18 = vld [vmem:[#allocation2 + $0x744] ss:$16 sps:$4 sm:$0xff]  }
  0x6b   :  { %1804 = vmatpush1.bf16.msra.mxu1 %v3164_v19  ;;  %1764 = vmatprep.subr.bf16.mxu0 %v3169_v20  ;;  %v3239_v19 = vld [vmem:[#allocation2 + $0x540] ss:$16 sps:$4 sm:$0xff]  }
  0x6c   :  { %1805 = vmatprep.subr.bf16.mxu1 %v3172_v21  ;;  %1794 = vmatprep.mubr.bf16.mxu0 %v3722_v53  ;;  %v3242_v20 = vld [vmem:[#allocation2 + $0x740] ss:$16 sps:$4 sm:$0xff]   ;;  %v3247_v21 = vld [vmem:[#allocation2 + $0x524] ss:$16 sps:$4 sm:$0xff]  }
  0x6d   :  { %1835 = vmatprep.mubr.bf16.mxu1 %v3726_v57 }
  0x6e   :  { %1765 = vmatpush1.bf16.msra.mxu0 %v3167_v22  ;;  %v3250_v22 = vld [vmem:[#allocation2 + $0x724] ss:$16 sps:$4 sm:$0xff]  }
  0x6f   :  { %1806 = vmatpush1.bf16.msra.mxu1 %v3170_v23  ;;  %1766 = vmatprep.subr.bf16.mxu0 %v3175_v24  ;;  %v3245_v23 = vld [vmem:[#allocation2 + $0x520] ss:$16 sps:$4 sm:$0xff]  }
  0x70   :  { %1807 = vmatprep.subr.bf16.mxu1 %v3178_v25  ;;  %v3248_v24 = vld [vmem:[#allocation2 + $0x720] ss:$16 sps:$4 sm:$0xff]   ;;  %v3253_v25 = vld [vmem:[#allocation2 + $0x504] ss:$16 sps:$4 sm:$0xff]  }
  0x72   :  { %1767 = vmatpush1.bf16.msra.mxu0 %v3173_v26  ;;  %v3256_v26 = vld [vmem:[#allocation2 + $0x704] ss:$16 sps:$4 sm:$0xff]  }
  0x73   :  { %1808 = vmatpush1.bf16.msra.mxu1 %v3176_v27  ;;  %1768 = vmatprep.subr.bf16.mxu0 %v3181_v28  ;;  %v3251_v27 = vld [vmem:[#allocation2 + $0x500] ss:$16 sps:$4 sm:$0xff]  }
  0x74   :  { %1809 = vmatprep.subr.bf16.mxu1 %v3184_v29  ;;  %v3254_v28 = vld [vmem:[#allocation2 + $0x700] ss:$16 sps:$4 sm:$0xff]   ;;  %v3260_v29 = vld [vmem:[#allocation2 + $0xec] ss:$16 sps:$4 sm:$0xff]  }
  0x76   :  { %1769 = vmatpush1.bf16.msra.mxu0 %v3179_v30  ;;  %v3263_v30 = vld [vmem:[#allocation2 + $0x2ec] ss:$16 sps:$4 sm:$0xff]  }
  0x77   :  { %1810 = vmatpush1.bf16.msra.mxu1 %v3182_v31  ;;  %1770 = vmatprep.subr.bf16.mxu0 %v3187_v32  ;;  %v3732_v31 = vpack.c.bf16 %v3715_v44, %v3715_v44  ;;  %v3736_v32 = vpack.c.bf16 %v3720_v50, %v3720_v50  ;;  %v3278_v44 = vld [vmem:[#allocation2 + $0x8c] ss:$16 sps:$4 sm:$0xff]  }
  0x78   :  { %1811 = vmatprep.subr.bf16.mxu1 %v3190_v33  ;;  %v3258_v33 = vld [vmem:[#allocation2 + $0xe8] ss:$16 sps:$4 sm:$0xff]   ;;  %v3287_v50 = vld [vmem:[#allocation2 + $0x26c] ss:$16 sps:$4 sm:$0xff]  }
  0x7a   :  { %1771 = vmatpush1.bf16.msra.mxu0 %v3185_v34  ;;  %v3261_v34 = vld [vmem:[#allocation2 + $0x2e8] ss:$16 sps:$4 sm:$0xff]  }
  0x7b   :  { %1812 = vmatpush1.bf16.msra.mxu1 %v3188_v35  ;;  %1772 = vmatprep.subr.bf16.mxu0 %v3193_v36  ;;  %v3266_v35 = vld [vmem:[#allocation2 + $0xcc] ss:$16 sps:$4 sm:$0xff]  }
  0x7c   :  { %1813 = vmatprep.subr.bf16.mxu1 %v3196_v37  ;;  %v3269_v36 = vld [vmem:[#allocation2 + $0x2cc] ss:$16 sps:$4 sm:$0xff]   ;;  %v3264_v37 = vld [vmem:[#allocation2 + $0xc8] ss:$16 sps:$4 sm:$0xff]  }
  0x7e   :  { %1773 = vmatpush1.bf16.msra.mxu0 %v3191_v38  ;;  %v3267_v38 = vld [vmem:[#allocation2 + $0x2c8] ss:$16 sps:$4 sm:$0xff]  }
  0x7f   :  { %1814 = vmatpush1.bf16.msra.mxu1 %v3194_v39  ;;  %1774 = vmatprep.subr.bf16.mxu0 %v3199_v40  ;;  %v3272_v39 = vld [vmem:[#allocation2 + $0xac] ss:$16 sps:$4 sm:$0xff]  }
  0x80   :  { %1815 = vmatprep.subr.bf16.mxu1 %v3202_v41  ;;  %v3275_v40 = vld [vmem:[#allocation2 + $0x2ac] ss:$16 sps:$4 sm:$0xff]   ;;  %v3270_v41 = vld [vmem:[#allocation2 + $0xa8] ss:$16 sps:$4 sm:$0xff]  }
  0x82   :  { %1775 = vmatpush1.bf16.msra.mxu0 %v3197_v46  ;;  %v3276_v46 = vld [vmem:[#allocation2 + $0x88] ss:$16 sps:$4 sm:$0xff]  }
  0x83   :  { %1816 = vmatpush1.bf16.msra.mxu1 %v3200_v47  ;;  %1776 = vmatprep.subr.bf16.mxu0 %v3205_v51  ;;  %v3279_v47 = vld [vmem:[#allocation2 + $0x288] ss:$16 sps:$4 sm:$0xff]   ;;  %v3290_v51 = vld [vmem:[#allocation2 + $0x4c] ss:$16 sps:$4 sm:$0xff]  }
  0x84   :  { %1817 = vmatprep.subr.bf16.mxu1 %v3208_v52  ;;  %v3293_v52 = vld [vmem:[#allocation2 + $0x24c] ss:$16 sps:$4 sm:$0xff]  }
  0x86   :  { %1777 = vmatpush1.bf16.msra.mxu0 %v3203_v55  ;;  %v3291_v55 = vld [vmem:[#allocation2 + $0x248] ss:$16 sps:$4 sm:$0xff]  }
  0x87   :  { %1818 = vmatpush1.bf16.msra.mxu1 %v3206_v56  ;;  %1778 = vmatprep.subr.bf16.mxu0 %v3211_v58  ;;  %v3296_v56 = vld [vmem:[#allocation2 + $0x2c] ss:$16 sps:$4 sm:$0xff]  }
  0x88   :  { %1819 = vmatprep.subr.bf16.mxu1 %v3214_v49  ;;  %v3299_v58 = vld [vmem:[#allocation2 + $0x22c] ss:$16 sps:$4 sm:$0xff]   ;;  %v3294_v49 = vld [vmem:[#allocation2 + $0x28] ss:$16 sps:$4 sm:$0xff]  }
  0x8a   :  { %1779 = vmatpush2.bf16.msra.mxu0 %v3209_v59  ;;  %v3297_v59 = vld [vmem:[#allocation2 + $0x228] ss:$16 sps:$4 sm:$0xff]  }
  0x8b   :  { %1820 = vmatpush2.bf16.msra.mxu1 %v3212_v60  ;;  %1780 = vmatprep.subr.bf16.mxu0 %v3217_v61  ;;  %v3302_v60 = vld [vmem:[#allocation2 + $0xc] ss:$16 sps:$4 sm:$0xff]  }
  0x8c   :  { %1821 = vmatprep.subr.bf16.mxu1 %v3220_v63  ;;  %v3305_v61 = vld [vmem:[#allocation2 + $0x20c] ss:$16 sps:$4 sm:$0xff]   ;;  %v3300_v63 = vld [vmem:[#allocation2 + $0x8] ss:$16 sps:$4 sm:$0xff]  }
  0x8e   :  { %1781 = vmatpush2.bf16.msra.mxu0 %v3215_v0  ;;  %v3303_v0 = vld [vmem:[#allocation2 + $0x208] ss:$16 sps:$4 sm:$0xff]  }
  0x8f   :  { %1822 = vmatpush2.bf16.msra.mxu1 %v3218_v1  ;;  %1782 = vmatprep.subr.bf16.mxu0 %v3223_v2  ;;  %v3308_v1 = vld [vmem:[#allocation2 + $0x1ec] ss:$16 sps:$4 sm:$0xff]  }
  0x90   :  { %1823 = vmatprep.subr.bf16.mxu1 %v3226_v4  ;;  %v3311_v2 = vld [vmem:[#allocation2 + $0x3ec] ss:$16 sps:$4 sm:$0xff]   ;;  %v3306_v4 = vld [vmem:[#allocation2 + $0x1e8] ss:$16 sps:$4 sm:$0xff]  }
  0x92   :  { %1783 = vmatpush2.bf16.msra.mxu0 %v3221_v5  ;;  %v3309_v5 = vld [vmem:[#allocation2 + $0x3e8] ss:$16 sps:$4 sm:$0xff]  }
  0x93   :  { %1824 = vmatpush2.bf16.msra.mxu1 %v3224_v6  ;;  %1784 = vmatprep.subr.bf16.mxu0 %v3229_v7  ;;  %v3314_v6 = vld [vmem:[#allocation2 + $0x1cc] ss:$16 sps:$4 sm:$0xff]  }
  0x94   :  { %1825 = vmatprep.subr.bf16.mxu1 %v3232_v8  ;;  %v3317_v7 = vld [vmem:[#allocation2 + $0x3cc] ss:$16 sps:$4 sm:$0xff]   ;;  %v3312_v8 = vld [vmem:[#allocation2 + $0x1c8] ss:$16 sps:$4 sm:$0xff]  }
  0x96   :  { %1785 = vmatpush2.bf16.msra.mxu0 %v3227_v9  ;;  %v3315_v9 = vld [vmem:[#allocation2 + $0x3c8] ss:$16 sps:$4 sm:$0xff]  }
  0x97   :  { %1826 = vmatpush2.bf16.msra.mxu1 %v3230_v10  ;;  %1786 = vmatprep.subr.bf16.mxu0 %v3235_v11  ;;  %v3320_v10 = vld [vmem:[#allocation2 + $0x1ac] ss:$16 sps:$4 sm:$0xff]  }
  0x98   :  { %1827 = vmatprep.subr.bf16.mxu1 %v3238_v12  ;;  %v3323_v11 = vld [vmem:[#allocation2 + $0x3ac] ss:$16 sps:$4 sm:$0xff]   ;;  %v3318_v12 = vld [vmem:[#allocation2 + $0x1a8] ss:$16 sps:$4 sm:$0xff]  }
  0x9a   :  { %1787 = vmatpush2.bf16.msra.mxu0 %v3233_v13  ;;  %v3321_v13 = vld [vmem:[#allocation2 + $0x3a8] ss:$16 sps:$4 sm:$0xff]  }
  0x9b   :  { %1828 = vmatpush2.bf16.msra.mxu1 %v3236_v14  ;;  %1788 = vmatprep.subr.bf16.mxu0 %v3241_v15  ;;  %v3326_v14 = vld [vmem:[#allocation2 + $0x18c] ss:$16 sps:$4 sm:$0xff]  }
  0x9c   :  { %1829 = vmatprep.subr.bf16.mxu1 %v3244_v18  ;;  %v3329_v15 = vld [vmem:[#allocation2 + $0x38c] ss:$16 sps:$4 sm:$0xff]   ;;  %v3324_v18 = vld [vmem:[#allocation2 + $0x188] ss:$16 sps:$4 sm:$0xff]  }
  0x9e   :  { %1789 = vmatpush2.bf16.msra.mxu0 %v3239_v19  ;;  %v3327_v19 = vld [vmem:[#allocation2 + $0x388] ss:$16 sps:$4 sm:$0xff]  }
  0x9f   :  { %1830 = vmatpush2.bf16.msra.mxu1 %v3242_v20  ;;  %1790 = vmatprep.subr.bf16.mxu0 %v3247_v21  ;;  %v3332_v20 = vld [vmem:[#allocation2 + $0x16c] ss:$16 sps:$4 sm:$0xff]  }
  0xa0   :  { %1831 = vmatprep.subr.bf16.mxu1 %v3250_v22  ;;  %v3335_v21 = vld [vmem:[#allocation2 + $0x36c] ss:$16 sps:$4 sm:$0xff]   ;;  %v3330_v22 = vld [vmem:[#allocation2 + $0x168] ss:$16 sps:$4 sm:$0xff]  }
  0xa2   :  { %1791 = vmatpush2.bf16.msra.mxu0 %v3245_v23  ;;  %v3333_v23 = vld [vmem:[#allocation2 + $0x368] ss:$16 sps:$4 sm:$0xff]  }
  0xa3   :  { %1832 = vmatpush2.bf16.msra.mxu1 %v3248_v24  ;;  %1792 = vmatprep.subr.bf16.mxu0 %v3253_v25  ;;  %v3338_v24 = vld [vmem:[#allocation2 + $0x14c] ss:$16 sps:$4 sm:$0xff]  }
  0xa4   :  { %1833 = vmatprep.subr.bf16.mxu1 %v3256_v26  ;;  %v3341_v25 = vld [vmem:[#allocation2 + $0x34c] ss:$16 sps:$4 sm:$0xff]   ;;  %v3336_v26 = vld [vmem:[#allocation2 + $0x148] ss:$16 sps:$4 sm:$0xff]  }
  0xa6   :  { %1793 = vmatpush2.bf16.msra.mxu0 %v3251_v27  ;;  %v3339_v27 = vld [vmem:[#allocation2 + $0x348] ss:$16 sps:$4 sm:$0xff]  }
  0xa7   :  { %1834 = vmatpush2.bf16.msra.mxu1 %v3254_v28  ;;  %1844 = vmatprep.subr.bf16.mxu0 %v3260_v29  ;;  %v3344_v28 = vld [vmem:[#allocation2 + $0x12c] ss:$16 sps:$4 sm:$0xff]  }
  0xa8   :  { %1885 = vmatprep.subr.bf16.mxu1 %v3263_v30  ;;  %v3347_v29 = vld [vmem:[#allocation2 + $0x32c] ss:$16 sps:$4 sm:$0xff]   ;;  %v3342_v30 = vld [vmem:[#allocation2 + $0x128] ss:$16 sps:$4 sm:$0xff]  }
  0xa9   :  { %1795 = vmatmul.mubr.bf16.vlgmr.msra.gmra.mxu0 %v3732_v31 }
  0xaa   :  { %1836 = vmatmul.mubr.bf16.vlgmr.msra.gmra.mxu1 %v3736_v32  ;;  %1845 = vmatpush1.bf16.msra.mxu0 %v3258_v33  ;;  %v3345_v33 = vld [vmem:[#allocation2 + $0x328] ss:$16 sps:$4 sm:$0xff]  }
  0xab   :  { %1886 = vmatpush1.bf16.msra.mxu1 %v3261_v34  ;;  %1846 = vmatprep.subr.bf16.mxu0 %v3266_v35  ;;  %v3350_v34 = vld [vmem:[#allocation2 + $0x10c] ss:$16 sps:$4 sm:$0xff]  }
  0xac   :  { %1887 = vmatprep.subr.bf16.mxu1 %v3269_v36  ;;  %1876 = vmatprep.mubr.bf16.mxu0 %v3699_v62  ;;  %v3282_v62 = vld [vmem:[#allocation2 + $0x68] ss:$16 sps:$4 sm:$0xff]   ;;  %v3353_v35 = vld [vmem:[#allocation2 + $0x30c] ss:$16 sps:$4 sm:$0xff]  }
  0xad   :  { %1917 = vmatprep.mubr.bf16.mxu1 %v3701_v3  ;;  %v3285_v3 = vld [vmem:[#allocation2 + $0x268] ss:$16 sps:$4 sm:$0xff]  }
  0xae   :  { %1847 = vmatpush1.bf16.msra.mxu0 %v3264_v37  ;;  %v3348_v36 = vld [vmem:[#allocation2 + $0x108] ss:$16 sps:$4 sm:$0xff]  }
  0xaf   :  { %1888 = vmatpush1.bf16.msra.mxu1 %v3267_v38  ;;  %1848 = vmatprep.subr.bf16.mxu0 %v3272_v39  ;;  %v3351_v37 = vld [vmem:[#allocation2 + $0x308] ss:$16 sps:$4 sm:$0xff]   ;;  %v3356_v38 = vld [vmem:[#allocation2 + $0x4ec] ss:$16 sps:$4 sm:$0xff]  }
  0xb0   :  { %1889 = vmatprep.subr.bf16.mxu1 %v3275_v40  ;;  %v3359_v39 = vld [vmem:[#allocation2 + $0x6ec] ss:$16 sps:$4 sm:$0xff]   ;;  %v3354_v40 = vld [vmem:[#allocation2 + $0x4e8] ss:$16 sps:$4 sm:$0xff]  }
  0xb2   :  { %1849 = vmatpush1.bf16.msra.mxu0 %v3270_v41  ;;  %v3357_v41 = vld [vmem:[#allocation2 + $0x6e8] ss:$16 sps:$4 sm:$0xff]  }
  0xb3   :  { %1890 = vmatpush1.bf16.msra.mxu1 %v3273_v42  ;;  %1850 = vmatprep.subr.bf16.mxu0 %v3278_v44  ;;  %v3362_v42 = vld [vmem:[#allocation2 + $0x4cc] ss:$16 sps:$4 sm:$0xff]  }
  0xb4   :  { %1891 = vmatprep.subr.bf16.mxu1 %v3281_v45  ;;  %v3365_v44 = vld [vmem:[#allocation2 + $0x6cc] ss:$16 sps:$4 sm:$0xff]   ;;  %v3360_v45 = vld [vmem:[#allocation2 + $0x4c8] ss:$16 sps:$4 sm:$0xff]  }
  0xb6   :  { %1851 = vmatpush1.bf16.msra.mxu0 %v3276_v46  ;;  %v3363_v46 = vld [vmem:[#allocation2 + $0x6c8] ss:$16 sps:$4 sm:$0xff]  }
  0xb7   :  { %1892 = vmatpush1.bf16.msra.mxu1 %v3279_v47  ;;  %1852 = vmatprep.subr.bf16.mxu0 %v3284_v48  ;;  %v3368_v47 = vld [vmem:[#allocation2 + $0x4ac] ss:$16 sps:$4 sm:$0xff]  }
  0xb8   :  { %1893 = vmatprep.subr.bf16.mxu1 %v3287_v50  ;;  %v3371_v48 = vld [vmem:[#allocation2 + $0x6ac] ss:$16 sps:$4 sm:$0xff]   ;;  %v3366_v50 = vld [vmem:[#allocation2 + $0x4a8] ss:$16 sps:$4 sm:$0xff]  }
  0xba   :  { %1853 = vmatpush1.bf16.msra.mxu0 %v3282_v62  ;;  %v3369_v62 = vld [vmem:[#allocation2 + $0x6a8] ss:$16 sps:$4 sm:$0xff]  }
  0xbb   :  { %1894 = vmatpush1.bf16.msra.mxu1 %v3285_v3  ;;  %1854 = vmatprep.subr.bf16.mxu0 %v3290_v51  ;;  %v3374_v3 = vld [vmem:[#allocation2 + $0x48c] ss:$16 sps:$4 sm:$0xff]  }
  0xbc   :  { %1895 = vmatprep.subr.bf16.mxu1 %v3293_v52  ;;  %v3377_v51 = vld [vmem:[#allocation2 + $0x68c] ss:$16 sps:$4 sm:$0xff]  }
  0xbd   :  { %v3380_v52 = vld [vmem:[#allocation2 + $0x46c] ss:$16 sps:$4 sm:$0xff]  }
  0xbe   :  { %1855 = vmatpush1.bf16.msra.mxu0 %v3288_v54  ;;  %v3383_v54 = vld [vmem:[#allocation2 + $0x66c] ss:$16 sps:$4 sm:$0xff]  }
  0xbf   :  { %1896 = vmatpush1.bf16.msra.mxu1 %v3291_v55  ;;  %1856 = vmatprep.subr.bf16.mxu0 %v3296_v56  ;;  %v3378_v55 = vld [vmem:[#allocation2 + $0x468] ss:$16 sps:$4 sm:$0xff]  }
  0xc0   :  { %1897 = vmatprep.subr.bf16.mxu1 %v3299_v58  ;;  %v3381_v56 = vld [vmem:[#allocation2 + $0x668] ss:$16 sps:$4 sm:$0xff]   ;;  %v3386_v58 = vld [vmem:[#allocation2 + $0x44c] ss:$16 sps:$4 sm:$0xff]  }
  0xc2   :  { %1857 = vmatpush1.bf16.msra.mxu0 %v3294_v49  ;;  %v3387_v49 = vld [vmem:[#allocation2 + $0x648] ss:$16 sps:$4 sm:$0xff]  }
  0xc3   :  { %1898 = vmatpush1.bf16.msra.mxu1 %v3297_v59  ;;  %1858 = vmatprep.subr.bf16.mxu0 %v3302_v60  ;;  %v3392_v59 = vld [vmem:[#allocation2 + $0x42c] ss:$16 sps:$4 sm:$0xff]  }
  0xc4   :  { %1899 = vmatprep.subr.bf16.mxu1 %v3305_v61  ;;  %v3395_v60 = vld [vmem:[#allocation2 + $0x62c] ss:$16 sps:$4 sm:$0xff]   ;;  %v3390_v61 = vld [vmem:[#allocation2 + $0x428] ss:$16 sps:$4 sm:$0xff]  }
  0xc6   :  { %1859 = vmatpush1.bf16.msra.mxu0 %v3300_v63  ;;  %v3393_v63 = vld [vmem:[#allocation2 + $0x628] ss:$16 sps:$4 sm:$0xff]  }
  0xc7   :  { %1900 = vmatpush1.bf16.msra.mxu1 %v3303_v0  ;;  %1860 = vmatprep.subr.bf16.mxu0 %v3308_v1  ;;  %v3398_v0 = vld [vmem:[#allocation2 + $0x40c] ss:$16 sps:$4 sm:$0xff]  }
  0xc8   :  { %1901 = vmatprep.subr.bf16.mxu1 %v3311_v2  ;;  %v3401_v1 = vld [vmem:[#allocation2 + $0x60c] ss:$16 sps:$4 sm:$0xff]   ;;  %v3396_v2 = vld [vmem:[#allocation2 + $0x408] ss:$16 sps:$4 sm:$0xff]  }
  0xca   :  { %1861 = vmatpush2.bf16.msra.mxu0 %v3306_v4  ;;  %v3399_v4 = vld [vmem:[#allocation2 + $0x608] ss:$16 sps:$4 sm:$0xff]  }
  0xcb   :  { %1902 = vmatpush2.bf16.msra.mxu1 %v3309_v5  ;;  %1862 = vmatprep.subr.bf16.mxu0 %v3314_v6  ;;  %v3404_v5 = vld [vmem:[#allocation2 + $0x5ec] ss:$16 sps:$4 sm:$0xff]  }
  0xcc   :  { %1903 = vmatprep.subr.bf16.mxu1 %v3317_v7  ;;  %v3407_v6 = vld [vmem:[#allocation2 + $0x7ec] ss:$16 sps:$4 sm:$0xff]   ;;  %v3402_v7 = vld [vmem:[#allocation2 + $0x5e8] ss:$16 sps:$4 sm:$0xff]  }
  0xce   :  { %1863 = vmatpush2.bf16.msra.mxu0 %v3312_v8  ;;  %v3405_v8 = vld [vmem:[#allocation2 + $0x7e8] ss:$16 sps:$4 sm:$0xff]  }
  0xcf   :  { %1904 = vmatpush2.bf16.msra.mxu1 %v3315_v9  ;;  %1864 = vmatprep.subr.bf16.mxu0 %v3320_v10  ;;  %v3410_v9 = vld [vmem:[#allocation2 + $0x5cc] ss:$16 sps:$4 sm:$0xff]  }
  0xd0   :  { %1905 = vmatprep.subr.bf16.mxu1 %v3323_v11  ;;  %v3413_v10 = vld [vmem:[#allocation2 + $0x7cc] ss:$16 sps:$4 sm:$0xff]   ;;  %v3408_v11 = vld [vmem:[#allocation2 + $0x5c8] ss:$16 sps:$4 sm:$0xff]  }
  0xd2   :  { %1865 = vmatpush2.bf16.msra.mxu0 %v3318_v12  ;;  %v3411_v12 = vld [vmem:[#allocation2 + $0x7c8] ss:$16 sps:$4 sm:$0xff]  }
  0xd3   :  { %1906 = vmatpush2.bf16.msra.mxu1 %v3321_v13  ;;  %1866 = vmatprep.subr.bf16.mxu0 %v3326_v14  ;;  %v3416_v13 = vld [vmem:[#allocation2 + $0x5ac] ss:$16 sps:$4 sm:$0xff]  }
  0xd4   :  { %1907 = vmatprep.subr.bf16.mxu1 %v3329_v15  ;;  %v3419_v14 = vld [vmem:[#allocation2 + $0x7ac] ss:$16 sps:$4 sm:$0xff]   ;;  %v3414_v15 = vld [vmem:[#allocation2 + $0x5a8] ss:$16 sps:$4 sm:$0xff]  }
  0xd6   :  { %1867 = vmatpush2.bf16.msra.mxu0 %v3324_v18  ;;  %v3417_v18 = vld [vmem:[#allocation2 + $0x7a8] ss:$16 sps:$4 sm:$0xff]  }
  0xd7   :  { %1908 = vmatpush2.bf16.msra.mxu1 %v3327_v19  ;;  %1868 = vmatprep.subr.bf16.mxu0 %v3332_v20  ;;  %v3422_v19 = vld [vmem:[#allocation2 + $0x58c] ss:$16 sps:$4 sm:$0xff]  }
  0xd8   :  { %1909 = vmatprep.subr.bf16.mxu1 %v3335_v21  ;;  %v3425_v20 = vld [vmem:[#allocation2 + $0x78c] ss:$16 sps:$4 sm:$0xff]   ;;  %v3420_v21 = vld [vmem:[#allocation2 + $0x588] ss:$16 sps:$4 sm:$0xff]  }
  0xda   :  { %1869 = vmatpush2.bf16.msra.mxu0 %v3330_v22  ;;  %v3423_v22 = vld [vmem:[#allocation2 + $0x788] ss:$16 sps:$4 sm:$0xff]  }
  0xdb   :  { %1910 = vmatpush2.bf16.msra.mxu1 %v3333_v23  ;;  %1870 = vmatprep.subr.bf16.mxu0 %v3338_v24  ;;  %v3428_v23 = vld [vmem:[#allocation2 + $0x56c] ss:$16 sps:$4 sm:$0xff]  }
  0xdc   :  { %1911 = vmatprep.subr.bf16.mxu1 %v3341_v25  ;;  %v3431_v24 = vld [vmem:[#allocation2 + $0x76c] ss:$16 sps:$4 sm:$0xff]   ;;  %v3426_v25 = vld [vmem:[#allocation2 + $0x568] ss:$16 sps:$4 sm:$0xff]  }
  0xde   :  { %1871 = vmatpush2.bf16.msra.mxu0 %v3336_v26  ;;  %v3429_v26 = vld [vmem:[#allocation2 + $0x768] ss:$16 sps:$4 sm:$0xff]  }
  0xdf   :  { %1912 = vmatpush2.bf16.msra.mxu1 %v3339_v27  ;;  %1872 = vmatprep.subr.bf16.mxu0 %v3344_v28  ;;  %v3434_v27 = vld [vmem:[#allocation2 + $0x54c] ss:$16 sps:$4 sm:$0xff]  }
  0xe0   :  { %1913 = vmatprep.subr.bf16.mxu1 %v3347_v29  ;;  %v3437_v28 = vld [vmem:[#allocation2 + $0x74c] ss:$16 sps:$4 sm:$0xff]   ;;  %v3432_v29 = vld [vmem:[#allocation2 + $0x548] ss:$16 sps:$4 sm:$0xff]  }
  0xe2   :  { %1873 = vmatpush2.bf16.msra.mxu0 %v3342_v30  ;;  %v3435_v30 = vld [vmem:[#allocation2 + $0x748] ss:$16 sps:$4 sm:$0xff]  }
  0xe3   :  { %1914 = vmatpush2.bf16.msra.mxu1 %v3345_v33  ;;  %1874 = vmatprep.subr.bf16.mxu0 %v3350_v34  ;;  %v3440_v33 = vld [vmem:[#allocation2 + $0x52c] ss:$16 sps:$4 sm:$0xff]  }
  0xe4   :  { %1915 = vmatprep.subr.bf16.mxu1 %v3353_v35  ;;  %v3443_v34 = vld [vmem:[#allocation2 + $0x72c] ss:$16 sps:$4 sm:$0xff]   ;;  %v3438_v35 = vld [vmem:[#allocation2 + $0x528] ss:$16 sps:$4 sm:$0xff]  }
  0xe6   :  { %1875 = vmatpush2.bf16.msra.mxu0 %v3348_v36  ;;  %v3441_v36 = vld [vmem:[#allocation2 + $0x728] ss:$16 sps:$4 sm:$0xff]  }
  0xe7   :  { %1916 = vmatpush2.bf16.msra.mxu1 %v3351_v37  ;;  %1926 = vmatprep.subr.bf16.mxu0 %v3356_v38  ;;  %v3446_v37 = vld [vmem:[#allocation2 + $0x50c] ss:$16 sps:$4 sm:$0xff]  }
  0xe8   :  { %1967 = vmatprep.subr.bf16.mxu1 %v3359_v39  ;;  %v3449_v38 = vld [vmem:[#allocation2 + $0x70c] ss:$16 sps:$4 sm:$0xff]   ;;  %v3444_v39 = vld [vmem:[#allocation2 + $0x508] ss:$16 sps:$4 sm:$0xff]  }
  0xe9   :  { %1877 = vmatmul.mubr.bf16.vlgmr.msra.gmra.mxu0 %v3705_v16  ;;  %v3372_v16 = vld [vmem:[#allocation2 + $0x488] ss:$16 sps:$4 sm:$0xff]  }
  0xea   :  { %1918 = vmatmul.mubr.bf16.vlgmr.msra.gmra.mxu1 %v3707_v17  ;;  %1927 = vmatpush1.bf16.msra.mxu0 %v3354_v40  ;;  %v3375_v17 = vld [vmem:[#allocation2 + $0x688] ss:$16 sps:$4 sm:$0xff]  }
  0xeb   :  { %1968 = vmatpush1.bf16.msra.mxu1 %v3357_v41  ;;  %1928 = vmatprep.subr.bf16.mxu0 %v3362_v42  ;;  %v3447_v40 = vld [vmem:[#allocation2 + $0x708] ss:$16 sps:$4 sm:$0xff]   ;;  %v3452_v41 = vld [vmem:[#allocation4 + $0x74] ss:$8 sps:$4 sm:$0xff]  }
  0xec   :  { %1969 = vmatprep.subr.bf16.mxu1 %v3365_v44  ;;  %1958 = vmatprep.mubr.bf16.mxu0 %v3722_v53  ;;  %v3389_v53 = vld [vmem:[#allocation2 + $0x64c] ss:$16 sps:$4 sm:$0xff]   ;;  %v3450_v42 = vld [vmem:[#allocation4 + $0x70] ss:$8 sps:$4 sm:$0xff]  }
  0xed   :  { %1999 = vmatprep.mubr.bf16.mxu1 %v3726_v57  ;;  %v3384_v57 = vld [vmem:[#allocation2 + $0x448] ss:$16 sps:$4 sm:$0xff]   ;;  %v3455_v44 = vld [vmem:[#allocation4 + $0x64] ss:$8 sps:$4 sm:$0xff]  }
  0xee   :  { %1929 = vmatpush1.bf16.msra.mxu0 %v3360_v45 }
  0xef   :  { %1970 = vmatpush1.bf16.msra.mxu1 %v3363_v46  ;;  %1930 = vmatprep.subr.bf16.mxu0 %v3368_v47  ;;  %v3453_v47 = vld [vmem:[#allocation4 + $0x60] ss:$8 sps:$4 sm:$0xff]  }
  0xf0   :  { %1971 = vmatprep.subr.bf16.mxu1 %v3371_v48 }
  0xf2   :  { %1931 = vmatpush1.bf16.msra.mxu0 %v3366_v50 }
  0xf3   :  { %1972 = vmatpush1.bf16.msra.mxu1 %v3369_v62  ;;  %1932 = vmatprep.subr.bf16.mxu0 %v3374_v3  ;;  %v3458_v62 = vld [vmem:[#allocation4 + $0x54] ss:$8 sps:$4 sm:$0xff]  }
  0xf4   :  { %1973 = vmatprep.subr.bf16.mxu1 %v3377_v51 }
  0xf6   :  { %1933 = vmatpush1.bf16.msra.mxu0 %v3372_v16  ;;  %v3456_v16 = vld [vmem:[#allocation4 + $0x50] ss:$8 sps:$4 sm:$0xff]  }
  0xf7   :  { %1974 = vmatpush1.bf16.msra.mxu1 %v3375_v17  ;;  %1934 = vmatprep.subr.bf16.mxu0 %v3380_v52 }
  0xf8   :  { %1975 = vmatprep.subr.bf16.mxu1 %v3383_v54  ;;  %v3461_v54 = vld [vmem:[#allocation4 + $0x44] ss:$8 sps:$4 sm:$0xff]  }
  0xfa   :  { %1935 = vmatpush1.bf16.msra.mxu0 %v3378_v55  ;;  %v3498_v55 = vld [vmem:[#allocation4 + $0x170] ss:$8 sps:$4 sm:$0xff]  }
  0xfb   :  { %1976 = vmatpush1.bf16.msra.mxu1 %v3381_v56  ;;  %1936 = vmatprep.subr.bf16.mxu0 %v3386_v58  ;;  %v3503_v56 = vld [vmem:[#allocation4 + $0x164] ss:$8 sps:$4 sm:$0xff]   ;;  %v3501_v58 = vld [vmem:[#allocation4 + $0x160] ss:$8 sps:$4 sm:$0xff]  }
  0xfc   :  { %1977 = vmatprep.subr.bf16.mxu1 %v3389_v53  ;;  %v3464_v53 = vld [vmem:[#allocation4 + $0x34] ss:$8 sps:$4 sm:$0xff]  }
  0xfe   :  { %1937 = vmatpush1.bf16.msra.mxu0 %v3384_v57  ;;  %v3506_v57 = vld [vmem:[#allocation4 + $0x154] ss:$8 sps:$4 sm:$0xff]  }
  0xff   :  { %1978 = vmatpush1.bf16.msra.mxu1 %v3387_v49  ;;  %1938 = vmatprep.subr.bf16.mxu0 %v3392_v59  ;;  %v3462_v49 = vld [vmem:[#allocation4 + $0x30] ss:$8 sps:$4 sm:$0xff]  }
 0x100   :  { %1979 = vmatprep.subr.bf16.mxu1 %v3395_v60  ;;  %v3504_v59 = vld [vmem:[#allocation4 + $0x150] ss:$8 sps:$4 sm:$0xff]   ;;  %v3467_v60 = vld [vmem:[#allocation4 + $0x24] ss:$8 sps:$4 sm:$0xff]  }
 0x102   :  { %1939 = vmatpush1.bf16.msra.mxu0 %v3390_v61  ;;  %v3509_v61 = vld [vmem:[#allocation4 + $0x144] ss:$8 sps:$4 sm:$0xff]  }
 0x103   :  { %1980 = vmatpush1.bf16.msra.mxu1 %v3393_v63  ;;  %1940 = vmatprep.subr.bf16.mxu0 %v3398_v0  ;;  %v3465_v63 = vld [vmem:[#allocation4 + $0x20] ss:$8 sps:$4 sm:$0xff]  }
 0x104   :  { %1981 = vmatprep.subr.bf16.mxu1 %v3401_v1  ;;  %v3507_v0 = vld [vmem:[#allocation4 + $0x140] ss:$8 sps:$4 sm:$0xff]   ;;  %v3470_v1 = vld [vmem:[#allocation4 + $0x14] ss:$8 sps:$4 sm:$0xff]  }
 0x106   :  { %1941 = vmatpush1.bf16.msra.mxu0 %v3396_v2  ;;  %v3512_v2 = vld [vmem:[#allocation4 + $0x134] ss:$8 sps:$4 sm:$0xff]  }
 0x107   :  { %1982 = vmatpush1.bf16.msra.mxu1 %v3399_v4  ;;  %1942 = vmatprep.subr.bf16.mxu0 %v3404_v5  ;;  %v3468_v4 = vld [vmem:[#allocation4 + $0x10] ss:$8 sps:$4 sm:$0xff]  }
 0x108   :  { %1983 = vmatprep.subr.bf16.mxu1 %v3407_v6  ;;  %v3510_v5 = vld [vmem:[#allocation4 + $0x130] ss:$8 sps:$4 sm:$0xff]   ;;  %v3473_v6 = vld [vmem:[#allocation4 + $0x4] ss:$8 sps:$4 sm:$0xff]  }
 0x10a   :  { %1943 = vmatpush2.bf16.msra.mxu0 %v3402_v7  ;;  %v3515_v7 = vld [vmem:[#allocation4 + $0x124] ss:$8 sps:$4 sm:$0xff]  }
 0x10b   :  { %1984 = vmatpush2.bf16.msra.mxu1 %v3405_v8  ;;  %1944 = vmatprep.subr.bf16.mxu0 %v3410_v9  ;;  %v3471_v8 = vld [vmem:[#allocation4] ss:$8 sps:$4 sm:$0xff]  }
 0x10c   :  { %1985 = vmatprep.subr.bf16.mxu1 %v3413_v10  ;;  %v3513_v9 = vld [vmem:[#allocation4 + $0x120] ss:$8 sps:$4 sm:$0xff]   ;;  %v3476_v10 = vld [vmem:[#allocation4 + $0xf4] ss:$8 sps:$4 sm:$0xff]  }
 0x10e   :  { %1945 = vmatpush2.bf16.msra.mxu0 %v3408_v11  ;;  %v3518_v11 = vld [vmem:[#allocation4 + $0x114] ss:$8 sps:$4 sm:$0xff]  }
 0x10f   :  { %1986 = vmatpush2.bf16.msra.mxu1 %v3411_v12  ;;  %1946 = vmatprep.subr.bf16.mxu0 %v3416_v13  ;;  %v3474_v12 = vld [vmem:[#allocation4 + $0xf0] ss:$8 sps:$4 sm:$0xff]  }
 0x110   :  { %1987 = vmatprep.subr.bf16.mxu1 %v3419_v14  ;;  %v3516_v13 = vld [vmem:[#allocation4 + $0x110] ss:$8 sps:$4 sm:$0xff]   ;;  %v3479_v14 = vld [vmem:[#allocation4 + $0xe4] ss:$8 sps:$4 sm:$0xff]  }
 0x112   :  { %1947 = vmatpush2.bf16.msra.mxu0 %v3414_v15  ;;  %v3521_v15 = vld [vmem:[#allocation4 + $0x104] ss:$8 sps:$4 sm:$0xff]  }
 0x113   :  { %1988 = vmatpush2.bf16.msra.mxu1 %v3417_v18  ;;  %1948 = vmatprep.subr.bf16.mxu0 %v3422_v19  ;;  %v3477_v18 = vld [vmem:[#allocation4 + $0xe0] ss:$8 sps:$4 sm:$0xff]  }
 0x114   :  { %1989 = vmatprep.subr.bf16.mxu1 %v3425_v20  ;;  %v3519_v19 = vld [vmem:[#allocation4 + $0x100] ss:$8 sps:$4 sm:$0xff]   ;;  %v3482_v20 = vld [vmem:[#allocation4 + $0xd4] ss:$8 sps:$4 sm:$0xff]  }
 0x116   :  { %1949 = vmatpush2.bf16.msra.mxu0 %v3420_v21  ;;  %v3524_v21 = vld [vmem:[#allocation4 + $0x1f4] ss:$8 sps:$4 sm:$0xff]  }
 0x117   :  { %1990 = vmatpush2.bf16.msra.mxu1 %v3423_v22  ;;  %1950 = vmatprep.subr.bf16.mxu0 %v3428_v23  ;;  %v3480_v22 = vld [vmem:[#allocation4 + $0xd0] ss:$8 sps:$4 sm:$0xff]  }
 0x118   :  { %1991 = vmatprep.subr.bf16.mxu1 %v3431_v24  ;;  %v3522_v23 = vld [vmem:[#allocation4 + $0x1f0] ss:$8 sps:$4 sm:$0xff]   ;;  %v3485_v24 = vld [vmem:[#allocation4 + $0xc4] ss:$8 sps:$4 sm:$0xff]  }
 0x11a   :  { %1951 = vmatpush2.bf16.msra.mxu0 %v3426_v25  ;;  %v3527_v25 = vld [vmem:[#allocation4 + $0x1e4] ss:$8 sps:$4 sm:$0xff]  }
 0x11b   :  { %1992 = vmatpush2.bf16.msra.mxu1 %v3429_v26  ;;  %1952 = vmatprep.subr.bf16.mxu0 %v3434_v27  ;;  %v3483_v26 = vld [vmem:[#allocation4 + $0xc0] ss:$8 sps:$4 sm:$0xff]  }
 0x11c   :  { %1993 = vmatprep.subr.bf16.mxu1 %v3437_v28  ;;  %v3525_v27 = vld [vmem:[#allocation4 + $0x1e0] ss:$8 sps:$4 sm:$0xff]   ;;  %v3488_v28 = vld [vmem:[#allocation4 + $0xb4] ss:$8 sps:$4 sm:$0xff]  }
 0x11e   :  { %1953 = vmatpush2.bf16.msra.mxu0 %v3432_v29  ;;  %v3530_v29 = vld [vmem:[#allocation4 + $0x1d4] ss:$8 sps:$4 sm:$0xff]  }
 0x11f   :  { %1994 = vmatpush2.bf16.msra.mxu1 %v3435_v30  ;;  %1954 = vmatprep.subr.bf16.mxu0 %v3440_v33  ;;  %v3486_v30 = vld [vmem:[#allocation4 + $0xb0] ss:$8 sps:$4 sm:$0xff]  }
 0x120   :  { %1995 = vmatprep.subr.bf16.mxu1 %v3443_v34  ;;  %v3528_v33 = vld [vmem:[#allocation4 + $0x1d0] ss:$8 sps:$4 sm:$0xff]   ;;  %v3491_v34 = vld [vmem:[#allocation4 + $0xa4] ss:$8 sps:$4 sm:$0xff]  }
 0x122   :  { %1955 = vmatpush2.bf16.msra.mxu0 %v3438_v35  ;;  %v3533_v35 = vld [vmem:[#allocation4 + $0x1c4] ss:$8 sps:$4 sm:$0xff]  }
 0x123   :  { %1996 = vmatpush2.bf16.msra.mxu1 %v3441_v36  ;;  %1956 = vmatprep.subr.bf16.mxu0 %v3446_v37  ;;  %v3489_v36 = vld [vmem:[#allocation4 + $0xa0] ss:$8 sps:$4 sm:$0xff]  }
 0x124   :  { %1997 = vmatprep.subr.bf16.mxu1 %v3449_v38  ;;  %v3531_v37 = vld [vmem:[#allocation4 + $0x1c0] ss:$8 sps:$4 sm:$0xff]   ;;  %v3494_v38 = vld [vmem:[#allocation4 + $0x94] ss:$8 sps:$4 sm:$0xff]  }
 0x126   :  { %1957 = vmatpush2.bf16.msra.mxu0 %v3444_v39  ;;  %v3536_v39 = vld [vmem:[#allocation4 + $0x1b4] ss:$8 sps:$4 sm:$0xff]  }
 0x127   :  { %1998 = vmatpush2.bf16.msra.mxu1 %v3447_v40  ;;  %2416 = vmatprep.subr.bf16.mxu0 %v3452_v41  ;;  %v382_v40 = vsub.s32 0, %v3689_v43  ;;  %v3760_v41 = vld [vmem:[%s3792_s2] sm:$0xf] }
 0x129   :  { %v3746_v45 = vpop.f32.mrf.mxu0  ;;  %1959 = vmatmul.mubr.bf16.vlgmr.msra.gmra.mxu0 %v3732_v31  ;;  %v3500_v31 = vld [vmem:[#allocation4 + $0x174] ss:$8 sps:$4 sm:$0xff]  }
 0x12a   :  { %v3748_v46 = vpop.f32.mrf.mxu1  ;;  %2000 = vmatmul.mubr.bf16.vlgmr.msra.gmra.mxu1 %v3736_v32  ;;  %2417 = vmatpush1.bf16.msra.mxu0 %v3450_v42  ;;  %v3459_v32 = vld [vmem:[#allocation4 + $0x40] ss:$8 sps:$4 sm:$0xff]   ;;  %v386_v42 = vsub.s32 1, %v3689_v43 }
 0x12b   :  { %v3752_v48 = vpop.f32.mrf.mxu0  ;;  %2418 = vmatprep.subr.bf16.mxu0 %v3455_v44  ;;  %2457 = vmatprep.subr.bf16.mxu1 %v3500_v31  ;;  %v3492_v44 = vld [vmem:[#allocation4 + $0x90] ss:$8 sps:$4 sm:$0xff]  }
 0x12c   :  { %v3754_v50 = vpop.f32.mrf.mxu1  ;;  %2458 = vmatpush1.bf16.msra.mxu1 %v3498_v55 }
 0x12d   :  { %v1718_v3 = vpop.f32.mrf.mxu0  ;;  %2459 = vmatprep.subr.bf16.mxu1 %v3503_v56  ;;  %v3539_v56 = vld [vmem:[#allocation4 + $0x1a4] ss:$8 sps:$4 sm:$0xff]  }
 0x12e   :  { %v1759_v51 = vpop.f32.mrf.mxu1  ;;  %2419 = vmatpush1.bf16.msra.mxu0 %v3453_v47  ;;  %v3534_v47 = vld [vmem:[#allocation4 + $0x1b0] ss:$8 sps:$4 sm:$0xff]   ;;  %v383_v3 = vrot.slane %v3760_v41, %v382_v40 }
 0x12f   :  { %v1719_v17 = vpop.f32.mrf.mxu0  ;;  %2420 = vmatprep.subr.bf16.mxu0 %v3458_v62  ;;  %v3497_v62 = vld [vmem:[#allocation4 + $0x84] ss:$8 sps:$4 sm:$0xff]   ;;  %v387_v51 = vrot.slane %v3760_v41, %v386_v42 }
 0x130   :  { %v1760_v52 = vpop.f32.mrf.mxu1  ;;  %2460 = vmatpush1.bf16.msra.mxu1 %v3501_v58  ;;  %v1715_v17 = vadd.f32 %v3746_v45, %v383_v3 }
 0x131   :  { %2461 = vmatprep.subr.bf16.mxu1 %v3506_v57  ;;  %v1717_v52 = vadd.f32 %v3752_v48, %v387_v51 }
 0x132   :  { %2421 = vmatpush1.bf16.msra.mxu0 %v3456_v16  ;;  %v3495_v16 = vld [vmem:[#allocation4 + $0x80] ss:$8 sps:$4 sm:$0xff]  }
 0x133   :  { %2422 = vmatprep.subr.bf16.mxu0 %v3461_v54  ;;  %v1756_v54 = vadd.f32 %v3748_v46, %v1715_v17 }
 0x134   :  { %2462 = vmatpush1.bf16.msra.mxu1 %v3504_v59 }
 0x135   :  { %2463 = vmatprep.subr.bf16.mxu1 %v3509_v61 }
 0x136   :  { %2423 = vmatpush1.bf16.msra.mxu0 %v3459_v32  ;;  %v1758_v32 = vadd.f32 %v3754_v50, %v1717_v52 }
 0x137   :  { %2424 = vmatprep.subr.bf16.mxu0 %v3464_v53  ;;  %v3537_v53 = vld [vmem:[#allocation4 + $0x1a0] ss:$8 sps:$4 sm:$0xff]  }
 0x138   :  { %2464 = vmatpush1.bf16.msra.mxu1 %v3507_v0 }
 0x139   :  { %2465 = vmatprep.subr.bf16.mxu1 %v3512_v2 }
 0x13a   :  { %2425 = vmatpush1.bf16.msra.mxu0 %v3462_v49 }
 0x13b   :  { %2426 = vmatprep.subr.bf16.mxu0 %v3467_v60 }
 0x13c   :  { %2466 = vmatpush1.bf16.msra.mxu1 %v3510_v5  ;;  %v3545_v5 = vld [vmem:[#allocation4 + $0x184] ss:$8 sps:$4 sm:$0xff]  }
 0x13d   :  { %2467 = vmatprep.subr.bf16.mxu1 %v3515_v7  ;;  %v3543_v7 = vld [vmem:[#allocation4 + $0x180] ss:$8 sps:$4 sm:$0xff]  }
 0x13e   :  { %2427 = vmatpush1.bf16.msra.mxu0 %v3465_v63  ;;  %v3542_v63 = vld [vmem:[#allocation4 + $0x194] ss:$8 sps:$4 sm:$0xff]  }
 0x13f   :  { %2428 = vmatprep.subr.bf16.mxu0 %v3470_v1  ;;  %v3540_v1 = vld [vmem:[#allocation4 + $0x190] ss:$8 sps:$4 sm:$0xff]  }
 0x140   :  { %2468 = vmatpush1.bf16.msra.mxu1 %v3513_v9 }
 0x141   :  { %2469 = vmatprep.subr.bf16.mxu1 %v3518_v11 }
 0x142   :  { %2429 = vmatpush1.bf16.msra.mxu0 %v3468_v4 }
 0x143   :  { %2430 = vmatprep.subr.bf16.mxu0 %v3473_v6 }
 0x144   :  { %2470 = vmatpush1.bf16.msra.mxu1 %v3516_v13 }
 0x145   :  { %2471 = vmatprep.subr.bf16.mxu1 %v3521_v15 }
 0x146   :  { %2431 = vmatpush1.bf16.msra.mxu0 %v3471_v8 }
 0x147   :  { %2432 = vmatprep.subr.bf16.mxu0 %v3476_v10 }
 0x148   :  { %2472 = vmatpush1.bf16.msra.mxu1 %v3519_v19 }
 0x149   :  { %2473 = vmatprep.subr.bf16.mxu1 %v3524_v21  ;;  %v3547_v21 = vld [vmem:[#allocation6 + $0x38] sm:$0xff]  }
 0x14a   :  { %2433 = vmatpush2.bf16.msra.mxu0 %v3474_v12 }
 0x14b   :  { %2434 = vmatprep.subr.bf16.mxu0 %v3479_v14 }
 0x14c   :  { %2474 = vmatpush2.bf16.msra.mxu1 %v3522_v23  ;;  %v3549_v23 = vld [vmem:[#allocation6 + $0x30] sm:$0xff]  }
 0x14d   :  { %2475 = vmatprep.subr.bf16.mxu1 %v3527_v25  ;;  %v3551_v25 = vld [vmem:[#allocation6 + $0x28] sm:$0xff]  }
 0x14e   :  { %2435 = vmatpush2.bf16.msra.mxu0 %v3477_v18 }
 0x14f   :  { %2436 = vmatprep.subr.bf16.mxu0 %v3482_v20  ;;  %v3546_v20 = vld [vmem:[#allocation6 + $0x78] sm:$0xff]  }
 0x150   :  { %2476 = vmatpush2.bf16.msra.mxu1 %v3525_v27  ;;  %v3553_v27 = vld [vmem:[#allocation6 + $0x20] sm:$0xff]  }
 0x151   :  { %2477 = vmatprep.subr.bf16.mxu1 %v3530_v29  ;;  %v3555_v29 = vld [vmem:[#allocation6 + $0x18] sm:$0xff]  }
 0x152   :  { %2437 = vmatpush2.bf16.msra.mxu0 %v3480_v22  ;;  %v3548_v22 = vld [vmem:[#allocation6 + $0x70] sm:$0xff]  }
 0x153   :  { %2438 = vmatprep.subr.bf16.mxu0 %v3485_v24  ;;  %v3550_v24 = vld [vmem:[#allocation6 + $0x68] sm:$0xff]  }
 0x154   :  { %2478 = vmatpush2.bf16.msra.mxu1 %v3528_v33  ;;  %v394_v33 = vsub.s32 3, %v3689_v43 }
 0x155   :  { %2479 = vmatprep.subr.bf16.mxu1 %v3533_v35 }
 0x156   :  { %2439 = vmatpush2.bf16.msra.mxu0 %v3483_v26  ;;  %v3552_v26 = vld [vmem:[#allocation6 + $0x60] sm:$0xff]   ;;  %v395_v35 = vrot.slane %v3760_v41, %v394_v33 }
 0x157   :  { %2440 = vmatprep.subr.bf16.mxu0 %v3488_v28  ;;  %v3554_v28 = vld [vmem:[#allocation6 + $0x58] sm:$0xff]  }
 0x158   :  { %2480 = vmatpush2.bf16.msra.mxu1 %v3531_v37 }
 0x159   :  { %2481 = vmatprep.subr.bf16.mxu1 %v3536_v39 }
 0x15a   :  { %2441 = vmatpush2.bf16.msra.mxu0 %v3486_v30  ;;  %v390_v30 = vsub.s32 2, %v3689_v43  ;;  %v3030_v43 = vld [vmem:[%s3796_s6] ss:$0 sm:$0xff] }
 0x15b   :  { %2442 = vmatprep.subr.bf16.mxu0 %v3491_v34 }
 0x15c   :  { %2482 = vmatpush2.bf16.msra.mxu1 %v3534_v47  ;;  %v391_v34 = vrot.slane %v3760_v41, %v390_v30 }
 0x15d   :  { %2483 = vmatprep.subr.bf16.mxu1 %v3539_v56 }
 0x15e   :  { %2443 = vmatpush2.bf16.msra.mxu0 %v3489_v36 }
 0x15f   :  { %2444 = vmatprep.subr.bf16.mxu0 %v3494_v38 }
 0x160   :  { %2484 = vmatpush2.bf16.msra.mxu1 %v3537_v53 }
 0x161   :  { %2485 = vmatprep.subr.bf16.mxu1 %v3542_v63  ;;  %v3558_v63 = vld [vmem:[#allocation6 + $0x48] sm:$0xff]  }
 0x162   :  { %2445 = vmatpush2.bf16.msra.mxu0 %v3492_v44 }
 0x163   :  { %2446 = vmatprep.subr.bf16.mxu0 %v3497_v62 }
 0x164   :  { %2486 = vmatpush2.bf16.msra.mxu1 %v3540_v1 }
 0x165   :  { %2487 = vmatprep.subr.bf16.mxu1 %v3545_v5 }
 0x166   :  { %2447 = vmatpush2.bf16.msra.mxu0 %v3495_v16 }
 0x167   :  { %3032 = vmatprep.subr.bf16.mxu0 %v3546_v20 }
 0x168   :  { %2488 = vmatpush2.bf16.msra.mxu1 %v3543_v7 }
 0x169   :  { %v1796_v55 = vpop.f32.mrf.mxu0 }
 0x16a   :  { %v1837_v31 = vpop.f32.mrf.mxu1  ;;  %v1797_v58 = vadd.f32 %v1796_v55, %v1756_v54 }
 0x16b   :  { %v1798_v57 = vpop.f32.mrf.mxu0 }
 0x16c   :  { %v1839_v49 = vpop.f32.mrf.mxu1  ;;  %v1838_v59 = vadd.f32 %v1837_v31, %v1797_v58  ;;  %v1799_v60 = vadd.f32 %v1798_v57, %v1758_v32 }
 0x16d   :  { %v1800_v61 = vpop.f32.mrf.mxu0 }
 0x16e   :  { %v1841_v45 = vpop.f32.mrf.mxu1  ;;  %v2008_v48 = vmul.f32 0.2, %v1838_v59  ;;  %v1840_v0 = vadd.f32 %v1839_v49, %v1799_v60  ;;  %v3557_v60 = vld [vmem:[#allocation6 + $0x10] sm:$0xff]  }
 0x16f   :  { %v1801_v46 = vpop.f32.mrf.mxu0 }
 0x170   :  { %v1842_v2 = vpop.f32.mrf.mxu1  ;;  %v2009_v4 = vmul.f32 0.2, %v1840_v0  ;;  %v2012_v50 = vmax.f32 %v1838_v59, %v2008_v48  ;;  %v3556_v59 = vld [vmem:[#allocation6 + $0x50] sm:$0xff]   ;;  %v3559_v48 = vld [vmem:[#allocation6 + $0x8] sm:$0xff]   ;;  %v3560_v46 = vld [vmem:[#allocation6 + $0x40] sm:$0xff]  }
 0x171   :  { %v3561_v2 = vld [vmem:[#allocation6] sm:$0xff]  }
 0x172   :  { %v2013_v6 = vmax.f32 %v1840_v0, %v2009_v4  ;;  %v2016_v9 = vpack.c.bf16 %v2012_v50, %v2012_v50  ;;  %v2084_v4 = vld [vmem:[%s3794_s4] sm:$0x3] }
 0x173   :  { %v2089_v50 = vrot.slane %v2084_v4, %v382_v40  ;;  %v2093_v5 = vrot.slane %v2084_v4, %v386_v42 }
 0x174   :  { %v2017_v8 = vpack.c.bf16 %v2013_v6, %v2013_v6 }
 0x176   :  { %2448 = vmatprep.mubr.bf16.mxu0 %v2017_v8 }
 0x177   :  { %2449 = vmatmul.mubr.bf16.vlgmr.msra.gmra.mxu0 %v2016_v9 }
 0x178   :  { %3033 = vmatpush3.bf16.msra.mxu0 %v3547_v21 }
 0x179   :  { %3034 = vmatprep.subr.bf16.mxu0 %v3548_v22 }
 0x17c   :  { %3035 = vmatpush3.bf16.msra.mxu0 %v3549_v23 }
 0x17d   :  { %3036 = vmatprep.subr.bf16.mxu0 %v3550_v24 }
 0x180   :  { %3037 = vmatpush3.bf16.msra.mxu0 %v3551_v25 }
 0x181   :  { %3038 = vmatprep.subr.bf16.mxu0 %v3552_v26 }
 0x184   :  { %3039 = vmatpush3.bf16.msra.mxu0 %v3553_v27 }
 0x185   :  { %3040 = vmatprep.subr.bf16.mxu0 %v3554_v28 }
 0x188   :  { %3041 = vmatpush3.bf16.msra.mxu0 %v3555_v29 }
 0x189   :  { %3042 = vmatprep.subr.bf16.mxu0 %v3556_v59 }
 0x18c   :  { %3043 = vmatpush3.bf16.msra.mxu0 %v3557_v60 }
 0x18d   :  { %3044 = vmatprep.subr.bf16.mxu0 %v3558_v63 }
 0x190   :  { %3045 = vmatpush3.bf16.msra.mxu0 %v3559_v48 }
 0x191   :  { %3046 = vmatprep.subr.bf16.mxu0 %v3560_v46 }
 0x194   :  { %3047 = vmatpush3.bf16.msra.mxu0 %v3561_v2 }
 0x1a9   :  { %v1878_v10 = vpop.f32.mrf.mxu0 }
 0x1aa   :  { %v1919_v11 = vpop.f32.mrf.mxu1  ;;  %v1879_v36 = vadd.f32 %v1878_v10, %v391_v34 }
 0x1ab   :  { %v1880_v12 = vpop.f32.mrf.mxu0 }
 0x1ac   :  { %v1921_v13 = vpop.f32.mrf.mxu1  ;;  %v1881_v37 = vadd.f32 %v1880_v12, %v395_v35  ;;  %v1920_v38 = vadd.f32 %v1919_v11, %v1879_v36 }
 0x1ad   :  { %v1882_v14 = vpop.f32.mrf.mxu0 }
 0x1ae   :  { %v1923_v15 = vpop.f32.mrf.mxu1  ;;  %v1922_v47 = vadd.f32 %v1921_v13, %v1881_v37 }
 0x1af   :  { %v1883_v18 = vpop.f32.mrf.mxu0 }
 0x1b0   :  { %v1924_v19 = vpop.f32.mrf.mxu1 }
 0x1e9   :  { %v1960_v39 = vpop.f32.mrf.mxu0 }
 0x1ea   :  { %v2001_v44 = vpop.f32.mrf.mxu1  ;;  %v1961_v62 = vadd.f32 %v1960_v39, %v1920_v38 }
 0x1eb   :  { %v1962_v3 = vpop.f32.mrf.mxu0 }
 0x1ec   :  { %v2003_v51 = vpop.f32.mrf.mxu1  ;;  %v2002_v16 = vadd.f32 %v2001_v44, %v1961_v62  ;;  %v1963_v17 = vadd.f32 %v1962_v3, %v1922_v47 }
 0x1ed   :  { %v1964_v52 = vpop.f32.mrf.mxu0 }
 0x1ee   :  { %v2005_v54 = vpop.f32.mrf.mxu1  ;;  %v2010_v55 = vmul.f32 0.2, %v2002_v16  ;;  %v2004_v31 = vadd.f32 %v2003_v51, %v1963_v17 }
 0x1ef   :  { %v1965_v56 = vpop.f32.mrf.mxu0 }
 0x1f0   :  { %v2006_v32 = vpop.f32.mrf.mxu1  ;;  %v2011_v58 = vmul.f32 0.2, %v2004_v31  ;;  %v2014_v53 = vmax.f32 %v2002_v16, %v2010_v55 }
 0x1f2   :  { %v2015_v41 = vmax.f32 %v2004_v31, %v2011_v58  ;;  %v2018_v49 = vpack.c.bf16 %v2014_v53, %v2014_v53 }
 0x1f4   :  { %v2019_v57 = vpack.c.bf16 %v2015_v41, %v2015_v41 }
 0x1f6   :  { %2489 = vmatprep.mubr.bf16.mxu1 %v2019_v57 }
 0x1f7   :  { %2490 = vmatmul.mubr.bf16.vlgmr.msra.gmra.mxu1 %v2018_v49 }
 0x237   :  { %v2450_v61 = vpop.f32.mrf.mxu0 }
 0x238   :  { %v2451_v6 = vadd.f32 %v2450_v61, %v2089_v50 }
 0x239   :  { %v2452_v45 = vpop.f32.mrf.mxu0 }
 0x23a   :  { %v2453_v8 = vadd.f32 %v2452_v45, %v2093_v5 }
 0x23b   :  { %v2454_v0 = vpop.f32.mrf.mxu0 }
 0x23d   :  { %v2455_v1 = vpop.f32.mrf.mxu0 }
 0x2b7   :  { %v2491_v7 = vpop.f32.mrf.mxu1 }
 0x2b8   :  { %v2492_v9 = vadd.f32 %v2491_v7, %v2451_v6 }
 0x2b9   :  { %v2493_v10 = vpop.f32.mrf.mxu1 }
 0x2ba   :  { %v2498_v11 = vmul.f32 0.2, %v2492_v9  ;;  %v2494_v12 = vadd.f32 %v2493_v10, %v2453_v8 }
 0x2bb   :  { %v2495_v13 = vpop.f32.mrf.mxu1 }
 0x2bc   :  { %v2499_v14 = vmul.f32 0.2, %v2494_v12  ;;  %v2500_v15 = vmax.f32 %v2492_v9, %v2498_v11 }
 0x2bd   :  { %v2496_v18 = vpop.f32.mrf.mxu1 }
 0x2be   :  { %v2501_v19 = vmax.f32 %v2494_v12, %v2499_v14  ;;  %v2502_v21 = vpack.c.bf16 %v2500_v15, %v2500_v15 }
 0x2c0   :  { %v2503_v20 = vpack.c.bf16 %v2501_v19, %v2501_v19 }
 0x2c2   :  { %2664 = vmatprep.mubr.bf16.mxu0 %v2503_v20 }
 0x2c3   :  { %2665 = vmatmul.mubr.bf16.vlgmr.msra.gmra.mxu0 %v2502_v21 }
 0x383   :  { %v3048_v40 = vpop.f32.mrf.mxu0 }
 0x385   :  { %v3049_v22 = vpop.f32.mrf.mxu0 }
 0x386   :  { %v3050_v42 = vadd.f32 %v3049_v22, %v3048_v40 }
 0x387   :  { %v3051_v23 = vpop.f32.mrf.mxu0 }
 0x388   :  { %v2679_v24 = vadd.f32 %v3050_v42, %v3030_v43 }
 0x389   :  { %v3052_v25 = vpop.f32.mrf.mxu0 }
 0x38a   :  { %v3031_v26 = vmul.f32 -1.442695, %v2679_v24 }
 0x38c   :  { %3562 = vpow2.f32 %v3031_v26 }
 0x399   :  { %v3563_v27 = vpop.eup %3562 }
 0x39a   :  { %v2683_v28 = vadd.f32 1.0, %v3563_v27 }
 0x39c   :  { %3564 = vrcp.f32 %v2683_v28 }
 0x3a9   :  { %v3565_v29 = vpop.eup %3564 }
 0x3aa   :  { %2687 = vst.msk [vmem:[%s3797_s7] sm:$0x3] %vm2686_vm0, %v3565_v29 }
 0x3ab   :  { %2692 = vsyncpa [#allocation3], 1 }
 0x3ac   :  { %2693 = vsyncpa [#allocation5], 1 }

</bundles_post_ra>
